<compile_context>
chip_gen: v7x
topology: tpu7x:2x2x1
jax: 0.10.0
libtpu: 0.0.40
codegen_flags: <defaults>
</compile_context>

<pallas_src>
import jax
import jax.numpy as jnp
from jax.experimental import pallas as pl
from jax.experimental.pallas import tpu as pltpu

KW = 4          # conv kernel size (kw in the PyTorch module)
PAD = 1         # padw
EPS = 1e-5      # nn.BatchNorm2d default eps
NEG_SLOPE = 0.2 # LeakyReLU slope


# --------------------------------------------------------------------------- #
# Weight preprocessing (plain JAX, outside the kernel): fold the kernel-column
# taps + column stride of the conv into per-kernel-row matrices so that the
# in-kernel conv is a handful of lane-dense 2-D matmuls.
# --------------------------------------------------------------------------- #
def _make_tap_matrices(w_hwio, wp, ow, stride):
    """w_hwio: [KW, KW, Cin, Cout] ->  B: [KW, wp*Cin, ow*Cout] with
       B[ki, w*Cin + c, o*Cout + co] = W[ki, w - stride*o, c, co]  (0 outside [0,KW))
    so that sum_ki (padded-row ki slab, layout [OH, wp*Cin]) @ B[ki]
    equals the conv output in layout [OH, ow*Cout]."""
    cin, cout = w_hwio.shape[2], w_hwio.shape[3]
    w_idx = jnp.arange(wp)[:, None]
    o_idx = jnp.arange(ow)[None, :]
    kj = w_idx - stride * o_idx                       # [wp, ow]
    valid = (kj >= 0) & (kj < KW)
    kj_c = jnp.clip(kj, 0, KW - 1)
    b = w_hwio[:, kj_c, :, :]                         # [KW, wp, ow, Cin, Cout]
    b = b * valid[None, :, :, None, None].astype(w_hwio.dtype)
    b = jnp.transpose(b, (0, 1, 3, 2, 4))             # [KW, wp, Cin, ow, Cout]
    return b.reshape(KW, wp * cin, ow * cout)


# --------------------------------------------------------------------------- #
# Fused kernel body (built per static plan).
# Activation layout everywhere: 2-D [N*(H+2), (W+2)*C], row = n*(H+2)+h_pad,
# lane = w_pad*C + c, with a zero 1-px border baked in.
# --------------------------------------------------------------------------- #
def _build_kernel(plan, N):
    n_in = 1 + sum(1 + (4 if L["mode"] == "bn_lrelu" else 1) for L in plan)

    def kernel(*refs):
        in_refs = refs[:n_in]
        out_ref = refs[n_in]
        bufs = refs[n_in + 1:]
        it = iter(in_refs)
        x0_ref = next(it)

        # Zero the padded activation buffers once (only the border matters).
        for b in bufs:
            b[...] = jnp.zeros(b.shape, b.dtype)

        cur_ref = x0_ref
        for li, L in enumerate(plan):
            b_ref = next(it)
            if L["mode"] == "bn_lrelu":
                gamma_ref = next(it)
                beta_ref = next(it)
                t_ref = next(it)    # [cout, ow*cout]  channel -> wide broadcast
                tt_ref = next(it)   # [ow*cout, cout]  wide -> channel reduce
            else:
                bias_ref = next(it)

            s, hp, oh, ow, cout = L["stride"], L["hp"], L["oh"], L["ow"], L["cout"]
            owc = ow * cout

            # ---- conv: acc[n] = sum_ki rowsel(n, ki) @ B[ki]   (bf16 MXU, f32 acc)
            if s == 2:
                xs = [cur_ref[pl.ds(n * hp, hp), :].astype(jnp.bfloat16)
                      for n in range(N)]
                o_i = jax.lax.broadcasted_iota(jnp.int32, (oh, hp), 0)
                h_i = jax.lax.broadcasted_iota(jnp.int32, (oh, hp), 1)
                sel = [jnp.where(h_i == s * o_i + ki, 1.0, 0.0).astype(jnp.bfloat16)
                       for ki in range(KW)]

            accs = [jnp.zeros((oh, owc), jnp.float32) for _ in range(N)]
            for ki in range(KW):
                bk = b_ref[ki]                                     # [wp*cin, owc] bf16
                for n in range(N):
                    if s == 2:
                        rows = jnp.dot(sel[ki], xs[n],
                                       preferred_element_type=jnp.float32
                                       ).astype(jnp.bfloat16)      # exact 0/1 select
                    else:
                        rows = cur_ref[pl.ds(n * hp + ki, oh), :].astype(jnp.bfloat16)
                    accs[n] = accs[n] + jnp.dot(rows, bk,
                                                preferred_element_type=jnp.float32)

            # ---- epilogue (all f32)
            outs = []
            if L["mode"] == "bias_lrelu":
                for a in accs:
                    y = a + bias_ref[...]
                    outs.append(jnp.where(y >= 0, y, NEG_SLOPE * y))
            elif L["mode"] == "bn_lrelu":
                # Training-mode BatchNorm: biased batch stats over (N, OH, OW).
                cnt = float(N * oh * ow)
                colsum = jnp.sum(accs[0], axis=0, keepdims=True)
                for a in accs[1:]:
                    colsum = colsum + jnp.sum(a, axis=0, keepdims=True)
                ch_mean = jnp.dot(colsum, tt_ref[...],
                                  preferred_element_type=jnp.float32) * (1.0 / cnt)
                mean_w = jnp.dot(ch_mean, t_ref[...],
                                 preferred_element_type=jnp.float32)
                sqsum = jnp.sum((accs[0] - mean_w) ** 2, axis=0, keepdims=True)
                for a in accs[1:]:
                    sqsum = sqsum + jnp.sum((a - mean_w) ** 2, axis=0, keepdims=True)
                ch_var = jnp.dot(sqsum, tt_ref[...],
                                 preferred_element_type=jnp.float32) * (1.0 / cnt)
                inv_w = jnp.dot(jax.lax.rsqrt(ch_var + EPS), t_ref[...],
                                preferred_element_type=jnp.float32)
                for a in accs:
                    y = (a - mean_w) * inv_w * gamma_ref[...] + beta_ref[...]
                    outs.append(jnp.where(y >= 0, y, NEG_SLOPE * y))
            else:  # bias_sigmoid
                for a in accs:
                    y = a + bias_ref[...]
                    outs.append(1.0 / (1.0 + jnp.exp(-y)))

            # ---- write: next layer's padded VMEM buffer, or the final output
            if li + 1 < len(plan):
                nxt = bufs[li]
                hpn = oh + 2
                for n in range(N):
                    nxt[pl.ds(n * hpn + 1, oh), pl.ds(cout, owc)] = outs[n]
                cur_ref = nxt
            else:
                for n in range(N):
                    out_ref[pl.ds(n * oh, oh), :] = outs[n]

    return kernel, n_in


def _full_spec(shape):
    nd = len(shape)
    return pl.BlockSpec(tuple(shape), lambda i, _nd=nd: (0,) * _nd)


# --------------------------------------------------------------------------- #
# Public forward: params is a pytree of arrays only (jit-safe).
# --------------------------------------------------------------------------- #
@jax.jit
def discriminator_forward(x_nchw, params):
    params = tuple(params)
    N, cin0, H, W = x_nchw.shape
    n_layers = len(params) - 2

    # Static per-layer plan derived from shapes (trace-time Python ints only).
    plan = []
    h, w, cin = H, W, cin0
    for idx, p in enumerate(params):
        cout = p["w"].shape[-1]
        stride = 2 if idx < n_layers else 1
        if idx == 0:
            mode = "bias_lrelu"
        elif idx == len(params) - 1:
            mode = "bias_sigmoid"
        else:
            mode = "bn_lrelu"
        oh = (h + 2 * PAD - KW) // stride + 1
        ow = (w + 2 * PAD - KW) // stride + 1
        plan.append(dict(mode=mode, stride=stride, cin=cin, cout=cout,
                         hp=h + 2 * PAD, wp=w + 2 * PAD, oh=oh, ow=ow))
        h, w, cin = oh, ow, cout

    # One-time, tiny XLA glue: pad the input once and flatten to the 2-D layout.
    x = jnp.transpose(x_nchw, (0, 2, 3, 1)).astype(jnp.float32)     # NCHW -> NHWC
    x = jnp.pad(x, ((0, 0), (PAD, PAD), (PAD, PAD), (0, 0)))
    x0 = x.reshape(N * (H + 2 * PAD), (W + 2 * PAD) * cin0)

    operands = [x0]
    for p, L in zip(params, plan):
        wt = p["w"].astype(jnp.float32)
        operands.append(
            _make_tap_matrices(wt, L["wp"], L["ow"], L["stride"]).astype(jnp.bfloat16))
        cout, ow = L["cout"], L["ow"]
        if L["mode"] == "bn_lrelu":
            operands.append(jnp.tile(p["gamma"].reshape(1, cout), (1, ow)))
            operands.append(jnp.tile(p["beta"].reshape(1, cout), (1, ow)))
            t = jnp.tile(jnp.eye(cout, dtype=jnp.float32), (1, ow))  # [cout, ow*cout]
            operands.append(t)
            operands.append(t.T)
        else:
            operands.append(jnp.tile(p["b"].reshape(1, cout), (1, ow)))

    kernel, n_in = _build_kernel(plan, N)
    assert n_in == len(operands)

    last = plan[-1]
    out_rows, out_cols = N * last["oh"], last["ow"] * last["cout"]
    scratch = [
        pltpu.VMEM((N * (L["oh"] + 2), (L["ow"] + 2) * L["cout"]), jnp.float32)
        for L in plan[:-1]
    ]

    out = pl.pallas_call(
        kernel,
        out_shape=jax.ShapeDtypeStruct((out_rows, out_cols), jnp.float32),
        grid=(1,),
        in_specs=[_full_spec(op.shape) for op in operands],
        out_specs=_full_spec((out_rows, out_cols)),
        scratch_shapes=scratch,
        compiler_params=pltpu.CompilerParams(dimension_semantics=("arbitrary",)),
    )(*operands)

    y = out.reshape(N, last["oh"], last["ow"], last["cout"])
    return jnp.transpose(y, (0, 3, 1, 2))                           # NHWC -> NCHW


# --------------------------------------------------------------------------- #
# Synthetic parameters (shapes match NLayerDiscriminator) — arrays only.
# --------------------------------------------------------------------------- #
def init_params(key, input_nc=3, ndf=8, n_layers=3):
    def conv_w(k, cin, cout):
        return 0.02 * jax.random.normal(k, (KW, KW, cin, cout), jnp.float32)  # HWIO

    keys = iter(jax.random.split(key, 2 * (n_layers + 2)))
    params = []
    # Conv(input_nc -> ndf, s2, bias) + LeakyReLU
    params.append(dict(w=conv_w(next(keys), input_nc, ndf),
                       b=0.01 * jax.random.normal(next(keys), (ndf,), jnp.float32)))
    nf_mult = 1
    for n in range(1, n_layers):
        nf_prev, nf_mult = nf_mult, min(2 ** n, 8)
        params.append(dict(w=conv_w(next(keys), ndf * nf_prev, ndf * nf_mult),
                           gamma=jnp.ones((ndf * nf_mult,), jnp.float32),
                           beta=jnp.zeros((ndf * nf_mult,), jnp.float32)))
        _ = next(keys)
    nf_prev, nf_mult = nf_mult, min(2 ** n_layers, 8)
    params.append(dict(w=conv_w(next(keys), ndf * nf_prev, ndf * nf_mult),
                       gamma=jnp.ones((ndf * nf_mult,), jnp.float32),
                       beta=jnp.zeros((ndf * nf_mult,), jnp.float32)))
    _ = next(keys)
    # Conv(ndf*nf_mult -> 1, s1, bias) + Sigmoid
    params.append(dict(w=conv_w(next(keys), ndf * nf_mult, 1),
                       b=0.01 * jax.random.normal(next(keys), (1,), jnp.float32)))
    return tuple(params)


# Pure-JAX reference (same semantics) for a correctness check.
def _reference_forward(x_nchw, params):
    x = jnp.transpose(x_nchw, (0, 2, 3, 1)).astype(jnp.float32)
    n_layers = len(params) - 2
    for idx, p in enumerate(params):
        stride = 2 if idx < n_layers else 1
        y = jax.lax.conv_general_dilated(
            x, p["w"].astype(jnp.float32), window_strides=(stride, stride),
            padding=((PAD, PAD), (PAD, PAD)),
            dimension_numbers=("NHWC", "HWIO", "NHWC"))
        if idx == 0:
            y = y + p["b"].reshape(1, 1, 1, -1)
            y = jnp.where(y >= 0, y, NEG_SLOPE * y)
        elif idx == len(params) - 1:
            y = y + p["b"].reshape(1, 1, 1, -1)
            y = jax.nn.sigmoid(y)
        else:
            mean = jnp.mean(y, axis=(0, 1, 2), keepdims=True)
            var = jnp.mean((y - mean) ** 2, axis=(0, 1, 2), keepdims=True)
            y = ((y - mean) * jax.lax.rsqrt(var + EPS)
                 * p["gamma"].reshape(1, 1, 1, -1) + p["beta"].reshape(1, 1, 1, -1))
            y = jnp.where(y >= 0, y, NEG_SLOPE * y)
        x = y
    return jnp.transpose(x, (0, 3, 1, 2))


if __name__ == "__main__":
    key = jax.random.PRNGKey(0)
    k_x, k_p = jax.random.split(key)
    # n_layers=3 with 4x4/s1/p1 tail convs needs spatial >= 32 for a valid output.
    x = jax.random.normal(k_x, (2, 3, 32, 32), jnp.float32)
    params = init_params(k_p, input_nc=3, ndf=8, n_layers=3)

    y = discriminator_forward(x, params)
    y = jax.block_until_ready(y)

    assert y.shape == (2, 1, 2, 2), y.shape
    assert bool(jnp.all(jnp.isfinite(y)))
    assert bool(jnp.all((y > 0.0) & (y < 1.0)))     # sigmoid output range

    y_ref = _reference_forward(x, params)
    max_err = float(jnp.max(jnp.abs(y - y_ref)))
    assert max_err < 5e-2, max_err                  # bf16-matmul tolerance

    print("KERNEL_OK")
</pallas_src>

<mosaic_0001>
module attributes {stable_mosaic.version = 11 : i64} {
  func.func @kernel(%arg0: i32, %arg1: memref<68x102xf32, #tpu.memory_space<vmem>>, %arg2: memref<4x102x128xbf16, #tpu.memory_space<vmem>>, %arg3: memref<1x128xf32, #tpu.memory_space<vmem>>, %arg4: memref<4x144x128xbf16, #tpu.memory_space<vmem>>, %arg5: memref<1x128xf32, #tpu.memory_space<vmem>>, %arg6: memref<1x128xf32, #tpu.memory_space<vmem>>, %arg7: memref<16x128xf32, #tpu.memory_space<vmem>>, %arg8: memref<128x16xf32, #tpu.memory_space<vmem>>, %arg9: memref<4x160x128xbf16, #tpu.memory_space<vmem>>, %arg10: memref<1x128xf32, #tpu.memory_space<vmem>>, %arg11: memref<1x128xf32, #tpu.memory_space<vmem>>, %arg12: memref<32x128xf32, #tpu.memory_space<vmem>>, %arg13: memref<128x32xf32, #tpu.memory_space<vmem>>, %arg14: memref<4x192x192xbf16, #tpu.memory_space<vmem>>, %arg15: memref<1x192xf32, #tpu.memory_space<vmem>>, %arg16: memref<1x192xf32, #tpu.memory_space<vmem>>, %arg17: memref<64x192xf32, #tpu.memory_space<vmem>>, %arg18: memref<192x64xf32, #tpu.memory_space<vmem>>, %arg19: memref<4x320x2xbf16, #tpu.memory_space<vmem>>, %arg20: memref<1x2xf32, #tpu.memory_space<vmem>>, %arg21: memref<4x2xf32, #tpu.memory_space<vmem>>, %arg22: memref<36x144xf32, #tpu.memory_space<vmem>>, %arg23: memref<20x160xf32, #tpu.memory_space<vmem>>, %arg24: memref<12x192xf32, #tpu.memory_space<vmem>>, %arg25: memref<10x320xf32, #tpu.memory_space<vmem>>) attributes {dimension_semantics = [#tpu.dimension_semantics<arbitrary>], iteration_bounds = array<i64: 1>, scalar_prefetch = 0 : i64, scratch_operands = 4 : i64, tpu.core_type = #tpu.core_type<tc>, window_params = [{pipeline_mode = #tpu.pipeline_mode<synchronous>, transform_indices = @transform_0, window_bounds = array<i64: 68, 102>}, {pipeline_mode = #tpu.pipeline_mode<synchronous>, transform_indices = @transform_1, window_bounds = array<i64: 4, 102, 128>}, {pipeline_mode = #tpu.pipeline_mode<synchronous>, transform_indices = @transform_2, window_bounds = array<i64: 1, 128>}, {pipeline_mode = #tpu.pipeline_mode<synchronous>, transform_indices = @transform_3, window_bounds = array<i64: 4, 144, 128>}, {pipeline_mode = #tpu.pipeline_mode<synchronous>, transform_indices = @transform_4, window_bounds = array<i64: 1, 128>}, {pipeline_mode = #tpu.pipeline_mode<synchronous>, transform_indices = @transform_5, window_bounds = array<i64: 1, 128>}, {pipeline_mode = #tpu.pipeline_mode<synchronous>, transform_indices = @transform_6, window_bounds = array<i64: 16, 128>}, {pipeline_mode = #tpu.pipeline_mode<synchronous>, transform_indices = @transform_7, window_bounds = array<i64: 128, 16>}, {pipeline_mode = #tpu.pipeline_mode<synchronous>, transform_indices = @transform_8, window_bounds = array<i64: 4, 160, 128>}, {pipeline_mode = #tpu.pipeline_mode<synchronous>, transform_indices = @transform_9, window_bounds = array<i64: 1, 128>}, {pipeline_mode = #tpu.pipeline_mode<synchronous>, transform_indices = @transform_10, window_bounds = array<i64: 1, 128>}, {pipeline_mode = #tpu.pipeline_mode<synchronous>, transform_indices = @transform_11, window_bounds = array<i64: 32, 128>}, {pipeline_mode = #tpu.pipeline_mode<synchronous>, transform_indices = @transform_12, window_bounds = array<i64: 128, 32>}, {pipeline_mode = #tpu.pipeline_mode<synchronous>, transform_indices = @transform_13, window_bounds = array<i64: 4, 192, 192>}, {pipeline_mode = #tpu.pipeline_mode<synchronous>, transform_indices = @transform_14, window_bounds = array<i64: 1, 192>}, {pipeline_mode = #tpu.pipeline_mode<synchronous>, transform_indices = @transform_15, window_bounds = array<i64: 1, 192>}, {pipeline_mode = #tpu.pipeline_mode<synchronous>, transform_indices = @transform_16, window_bounds = array<i64: 64, 192>}, {pipeline_mode = #tpu.pipeline_mode<synchronous>, transform_indices = @transform_17, window_bounds = array<i64: 192, 64>}, {pipeline_mode = #tpu.pipeline_mode<synchronous>, transform_indices = @transform_18, window_bounds = array<i64: 4, 320, 2>}, {pipeline_mode = #tpu.pipeline_mode<synchronous>, transform_indices = @transform_19, window_bounds = array<i64: 1, 2>}, {pipeline_mode = #tpu.pipeline_mode<synchronous>, transform_indices = @transform_20, window_bounds = array<i64: 4, 2>}]} {
    %cst = arith.constant 0.000000e+00 : f32
    %0 = vector.broadcast %cst : f32 to vector<36x144xf32>
    %c0 = arith.constant 0 : index
    %c0_0 = arith.constant 0 : index
    %1 = vector.load %arg22[%c0, %c0_0] : memref<36x144xf32, #tpu.memory_space<vmem>>, vector<36x144xf32>
    tpu.vector_store %arg22[%c0, %c0_0], %0 {strides = array<i32>} : memref<36x144xf32, #tpu.memory_space<vmem>>, vector<36x144xf32>,
    %cst_1 = arith.constant 0.000000e+00 : f32
    %2 = vector.broadcast %cst_1 : f32 to vector<20x160xf32>
    %c0_2 = arith.constant 0 : index
    %c0_3 = arith.constant 0 : index
    %3 = vector.load %arg23[%c0_2, %c0_3] : memref<20x160xf32, #tpu.memory_space<vmem>>, vector<20x160xf32>
    tpu.vector_store %arg23[%c0_2, %c0_3], %2 {strides = array<i32>} : memref<20x160xf32, #tpu.memory_space<vmem>>, vector<20x160xf32>,
    %cst_4 = arith.constant 0.000000e+00 : f32
    %4 = vector.broadcast %cst_4 : f32 to vector<12x192xf32>
    %c0_5 = arith.constant 0 : index
    %c0_6 = arith.constant 0 : index
    %5 = vector.load %arg24[%c0_5, %c0_6] : memref<12x192xf32, #tpu.memory_space<vmem>>, vector<12x192xf32>
    tpu.vector_store %arg24[%c0_5, %c0_6], %4 {strides = array<i32>} : memref<12x192xf32, #tpu.memory_space<vmem>>, vector<12x192xf32>,
    %cst_7 = arith.constant 0.000000e+00 : f32
    %6 = vector.broadcast %cst_7 : f32 to vector<10x320xf32>
    %c0_8 = arith.constant 0 : index
    %c0_9 = arith.constant 0 : index
    %7 = vector.load %arg25[%c0_8, %c0_9] : memref<10x320xf32, #tpu.memory_space<vmem>>, vector<10x320xf32>
    tpu.vector_store %arg25[%c0_8, %c0_9], %6 {strides = array<i32>} : memref<10x320xf32, #tpu.memory_space<vmem>>, vector<10x320xf32>,
    %c0_10 = arith.constant 0 : index
    %c0_11 = arith.constant 0 : index
    %8 = vector.load %arg1[%c0_10, %c0_11] : memref<68x102xf32, #tpu.memory_space<vmem>>, vector<34x102xf32>
    %9 = arith.truncf %8 : vector<34x102xf32> to vector<34x102xbf16>
    %c34 = arith.constant 34 : index
    %c0_12 = arith.constant 0 : index
    %10 = vector.load %arg1[%c34, %c0_12] : memref<68x102xf32, #tpu.memory_space<vmem>>, vector<34x102xf32>
    %11 = arith.truncf %10 : vector<34x102xf32> to vector<34x102xbf16>
    %12 = tpu.iota {dimensions = array<i32: 0>} : vector<16x34xi32>
    %13 = tpu.iota {dimensions = array<i32: 1>} : vector<16x34xi32>
    %c2_i32 = arith.constant 2 : i32
    %14 = vector.broadcast %c2_i32 : i32 to vector<16x34xi32>
    %15 = arith.muli %14, %12 : vector<16x34xi32>
    %c0_i32 = arith.constant 0 : i32
    %16 = vector.broadcast %c0_i32 : i32 to vector<16x34xi32>
    %17 = arith.addi %15, %16 : vector<16x34xi32>
    %18 = arith.cmpi eq, %13, %17 : vector<16x34xi32>
    %cst_13 = arith.constant 1.000000e+00 : f32
    %cst_14 = arith.constant 0.000000e+00 : f32
    %19 = vector.broadcast %cst_13 : f32 to vector<16x34xf32>
    %20 = vector.broadcast %cst_14 : f32 to vector<16x34xf32>
    %21 = arith.select %18, %19, %20 : vector<16x34xi1>, vector<16x34xf32>
    %22 = arith.truncf %21 : vector<16x34xf32> to vector<16x34xbf16>
    %c2_i32_15 = arith.constant 2 : i32
    %23 = vector.broadcast %c2_i32_15 : i32 to vector<16x34xi32>
    %24 = arith.muli %23, %12 : vector<16x34xi32>
    %c1_i32 = arith.constant 1 : i32
    %25 = vector.broadcast %c1_i32 : i32 to vector<16x34xi32>
    %26 = arith.addi %24, %25 : vector<16x34xi32>
    %27 = arith.cmpi eq, %13, %26 : vector<16x34xi32>
    %cst_16 = arith.constant 1.000000e+00 : f32
    %cst_17 = arith.constant 0.000000e+00 : f32
    %28 = vector.broadcast %cst_16 : f32 to vector<16x34xf32>
    %29 = vector.broadcast %cst_17 : f32 to vector<16x34xf32>
    %30 = arith.select %27, %28, %29 : vector<16x34xi1>, vector<16x34xf32>
    %31 = arith.truncf %30 : vector<16x34xf32> to vector<16x34xbf16>
    %c2_i32_18 = arith.constant 2 : i32
    %32 = vector.broadcast %c2_i32_18 : i32 to vector<16x34xi32>
    %33 = arith.muli %32, %12 : vector<16x34xi32>
    %c2_i32_19 = arith.constant 2 : i32
    %34 = vector.broadcast %c2_i32_19 : i32 to vector<16x34xi32>
    %35 = arith.addi %33, %34 : vector<16x34xi32>
    %36 = arith.cmpi eq, %13, %35 : vector<16x34xi32>
    %cst_20 = arith.constant 1.000000e+00 : f32
    %cst_21 = arith.constant 0.000000e+00 : f32
    %37 = vector.broadcast %cst_20 : f32 to vector<16x34xf32>
    %38 = vector.broadcast %cst_21 : f32 to vector<16x34xf32>
    %39 = arith.select %36, %37, %38 : vector<16x34xi1>, vector<16x34xf32>
    %40 = arith.truncf %39 : vector<16x34xf32> to vector<16x34xbf16>
    %c2_i32_22 = arith.constant 2 : i32
    %41 = vector.broadcast %c2_i32_22 : i32 to vector<16x34xi32>
    %42 = arith.muli %41, %12 : vector<16x34xi32>
    %c3_i32 = arith.constant 3 : i32
    %43 = vector.broadcast %c3_i32 : i32 to vector<16x34xi32>
    %44 = arith.addi %42, %43 : vector<16x34xi32>
    %45 = arith.cmpi eq, %13, %44 : vector<16x34xi32>
    %cst_23 = arith.constant 1.000000e+00 : f32
    %cst_24 = arith.constant 0.000000e+00 : f32
    %46 = vector.broadcast %cst_23 : f32 to vector<16x34xf32>
    %47 = vector.broadcast %cst_24 : f32 to vector<16x34xf32>
    %48 = arith.select %45, %46, %47 : vector<16x34xi1>, vector<16x34xf32>
    %49 = arith.truncf %48 : vector<16x34xf32> to vector<16x34xbf16>
    %cst_25 = arith.constant 0.000000e+00 : f32
    %50 = vector.broadcast %cst_25 : f32 to vector<16x128xf32>
    %cst_26 = arith.constant 0.000000e+00 : f32
    %51 = vector.broadcast %cst_26 : f32 to vector<16x128xf32>
    %c0_27 = arith.constant 0 : index
    %c0_28 = arith.constant 0 : index
    %c0_29 = arith.constant 0 : index
    %52 = vector.load %arg2[%c0_27, %c0_28, %c0_29] : memref<4x102x128xbf16, #tpu.memory_space<vmem>>, vector<1x102x128xbf16>
    %53 = vector.shape_cast %52 : vector<1x102x128xbf16> to vector<102x128xbf16>
    %cst_30 = arith.constant dense<0.000000e+00> : vector<16x102xf32>
    %54 = tpu.matmul %22, %9, %cst_30 {dimension_numbers = #tpu.dot_dimension_numbers<[1], [0], [0], [1], [0, 0, 1, 1], [], []>} : vector<16x34xbf16>, vector<34x102xbf16>, vector<16x102xf32> -> vector<16x102xf32>
    %55 = arith.truncf %54 : vector<16x102xf32> to vector<16x102xbf16>
    %cst_31 = arith.constant dense<0.000000e+00> : vector<16x128xf32>
    %56 = tpu.matmul %55, %53, %cst_31 {dimension_numbers = #tpu.dot_dimension_numbers<[1], [0], [0], [1], [0, 0, 1, 1], [], []>} : vector<16x102xbf16>, vector<102x128xbf16>, vector<16x128xf32> -> vector<16x128xf32>
    %57 = arith.addf %50, %56 : vector<16x128xf32>
    %cst_32 = arith.constant dense<0.000000e+00> : vector<16x102xf32>
    %58 = tpu.matmul %22, %11, %cst_32 {dimension_numbers = #tpu.dot_dimension_numbers<[1], [0], [0], [1], [0, 0, 1, 1], [], []>} : vector<16x34xbf16>, vector<34x102xbf16>, vector<16x102xf32> -> vector<16x102xf32>
    %59 = arith.truncf %58 : vector<16x102xf32> to vector<16x102xbf16>
    %cst_33 = arith.constant dense<0.000000e+00> : vector<16x128xf32>
    %60 = tpu.matmul %59, %53, %cst_33 {dimension_numbers = #tpu.dot_dimension_numbers<[1], [0], [0], [1], [0, 0, 1, 1], [], []>} : vector<16x102xbf16>, vector<102x128xbf16>, vector<16x128xf32> -> vector<16x128xf32>
    %61 = arith.addf %51, %60 : vector<16x128xf32>
    %c1 = arith.constant 1 : index
    %c0_34 = arith.constant 0 : index
    %c0_35 = arith.constant 0 : index
    %62 = vector.load %arg2[%c1, %c0_34, %c0_35] : memref<4x102x128xbf16, #tpu.memory_space<vmem>>, vector<1x102x128xbf16>
    %63 = vector.shape_cast %62 : vector<1x102x128xbf16> to vector<102x128xbf16>
    %cst_36 = arith.constant dense<0.000000e+00> : vector<16x102xf32>
    %64 = tpu.matmul %31, %9, %cst_36 {dimension_numbers = #tpu.dot_dimension_numbers<[1], [0], [0], [1], [0, 0, 1, 1], [], []>} : vector<16x34xbf16>, vector<34x102xbf16>, vector<16x102xf32> -> vector<16x102xf32>
    %65 = arith.truncf %64 : vector<16x102xf32> to vector<16x102xbf16>
    %cst_37 = arith.constant dense<0.000000e+00> : vector<16x128xf32>
    %66 = tpu.matmul %65, %63, %cst_37 {dimension_numbers = #tpu.dot_dimension_numbers<[1], [0], [0], [1], [0, 0, 1, 1], [], []>} : vector<16x102xbf16>, vector<102x128xbf16>, vector<16x128xf32> -> vector<16x128xf32>
    %67 = arith.addf %57, %66 : vector<16x128xf32>
    %cst_38 = arith.constant dense<0.000000e+00> : vector<16x102xf32>
    %68 = tpu.matmul %31, %11, %cst_38 {dimension_numbers = #tpu.dot_dimension_numbers<[1], [0], [0], [1], [0, 0, 1, 1], [], []>} : vector<16x34xbf16>, vector<34x102xbf16>, vector<16x102xf32> -> vector<16x102xf32>
    %69 = arith.truncf %68 : vector<16x102xf32> to vector<16x102xbf16>
    %cst_39 = arith.constant dense<0.000000e+00> : vector<16x128xf32>
    %70 = tpu.matmul %69, %63, %cst_39 {dimension_numbers = #tpu.dot_dimension_numbers<[1], [0], [0], [1], [0, 0, 1, 1], [], []>} : vector<16x102xbf16>, vector<102x128xbf16>, vector<16x128xf32> -> vector<16x128xf32>
    %71 = arith.addf %61, %70 : vector<16x128xf32>
    %c2 = arith.constant 2 : index
    %c0_40 = arith.constant 0 : index
    %c0_41 = arith.constant 0 : index
    %72 = vector.load %arg2[%c2, %c0_40, %c0_41] : memref<4x102x128xbf16, #tpu.memory_space<vmem>>, vector<1x102x128xbf16>
    %73 = vector.shape_cast %72 : vector<1x102x128xbf16> to vector<102x128xbf16>
    %cst_42 = arith.constant dense<0.000000e+00> : vector<16x102xf32>
    %74 = tpu.matmul %40, %9, %cst_42 {dimension_numbers = #tpu.dot_dimension_numbers<[1], [0], [0], [1], [0, 0, 1, 1], [], []>} : vector<16x34xbf16>, vector<34x102xbf16>, vector<16x102xf32> -> vector<16x102xf32>
    %75 = arith.truncf %74 : vector<16x102xf32> to vector<16x102xbf16>
    %cst_43 = arith.constant dense<0.000000e+00> : vector<16x128xf32>
    %76 = tpu.matmul %75, %73, %cst_43 {dimension_numbers = #tpu.dot_dimension_numbers<[1], [0], [0], [1], [0, 0, 1, 1], [], []>} : vector<16x102xbf16>, vector<102x128xbf16>, vector<16x128xf32> -> vector<16x128xf32>
    %77 = arith.addf %67, %76 : vector<16x128xf32>
    %cst_44 = arith.constant dense<0.000000e+00> : vector<16x102xf32>
    %78 = tpu.matmul %40, %11, %cst_44 {dimension_numbers = #tpu.dot_dimension_numbers<[1], [0], [0], [1], [0, 0, 1, 1], [], []>} : vector<16x34xbf16>, vector<34x102xbf16>, vector<16x102xf32> -> vector<16x102xf32>
    %79 = arith.truncf %78 : vector<16x102xf32> to vector<16x102xbf16>
    %cst_45 = arith.constant dense<0.000000e+00> : vector<16x128xf32>
    %80 = tpu.matmul %79, %73, %cst_45 {dimension_numbers = #tpu.dot_dimension_numbers<[1], [0], [0], [1], [0, 0, 1, 1], [], []>} : vector<16x102xbf16>, vector<102x128xbf16>, vector<16x128xf32> -> vector<16x128xf32>
    %81 = arith.addf %71, %80 : vector<16x128xf32>
    %c3 = arith.constant 3 : index
    %c0_46 = arith.constant 0 : index
    %c0_47 = arith.constant 0 : index
    %82 = vector.load %arg2[%c3, %c0_46, %c0_47] : memref<4x102x128xbf16, #tpu.memory_space<vmem>>, vector<1x102x128xbf16>
    %83 = vector.shape_cast %82 : vector<1x102x128xbf16> to vector<102x128xbf16>
    %cst_48 = arith.constant dense<0.000000e+00> : vector<16x102xf32>
    %84 = tpu.matmul %49, %9, %cst_48 {dimension_numbers = #tpu.dot_dimension_numbers<[1], [0], [0], [1], [0, 0, 1, 1], [], []>} : vector<16x34xbf16>, vector<34x102xbf16>, vector<16x102xf32> -> vector<16x102xf32>
    %85 = arith.truncf %84 : vector<16x102xf32> to vector<16x102xbf16>
    %cst_49 = arith.constant dense<0.000000e+00> : vector<16x128xf32>
    %86 = tpu.matmul %85, %83, %cst_49 {dimension_numbers = #tpu.dot_dimension_numbers<[1], [0], [0], [1], [0, 0, 1, 1], [], []>} : vector<16x102xbf16>, vector<102x128xbf16>, vector<16x128xf32> -> vector<16x128xf32>
    %87 = arith.addf %77, %86 : vector<16x128xf32>
    %cst_50 = arith.constant dense<0.000000e+00> : vector<16x102xf32>
    %88 = tpu.matmul %49, %11, %cst_50 {dimension_numbers = #tpu.dot_dimension_numbers<[1], [0], [0], [1], [0, 0, 1, 1], [], []>} : vector<16x34xbf16>, vector<34x102xbf16>, vector<16x102xf32> -> vector<16x102xf32>
    %89 = arith.truncf %88 : vector<16x102xf32> to vector<16x102xbf16>
    %cst_51 = arith.constant dense<0.000000e+00> : vector<16x128xf32>
    %90 = tpu.matmul %89, %83, %cst_51 {dimension_numbers = #tpu.dot_dimension_numbers<[1], [0], [0], [1], [0, 0, 1, 1], [], []>} : vector<16x102xbf16>, vector<102x128xbf16>, vector<16x128xf32> -> vector<16x128xf32>
    %91 = arith.addf %81, %90 : vector<16x128xf32>
    %c0_52 = arith.constant 0 : index
    %c0_53 = arith.constant 0 : index
    %92 = vector.load %arg3[%c0_52, %c0_53] : memref<1x128xf32, #tpu.memory_space<vmem>>, vector<1x128xf32>
    %93 = vector.broadcast %92 : vector<1x128xf32> to vector<16x128xf32>
    %94 = arith.addf %87, %93 : vector<16x128xf32>
    %cst_54 = arith.constant 0.000000e+00 : f32
    %95 = vector.broadcast %cst_54 : f32 to vector<16x128xf32>
    %96 = arith.cmpf oge, %94, %95 : vector<16x128xf32>
    %cst_55 = arith.constant 2.000000e-01 : f32
    %97 = vector.broadcast %cst_55 : f32 to vector<16x128xf32>
    %98 = arith.mulf %97, %94 : vector<16x128xf32>
    %99 = arith.select %96, %94, %98 : vector<16x128xi1>, vector<16x128xf32>
    %c0_56 = arith.constant 0 : index
    %c0_57 = arith.constant 0 : index
    %100 = vector.load %arg3[%c0_56, %c0_57] : memref<1x128xf32, #tpu.memory_space<vmem>>, vector<1x128xf32>
    %101 = vector.broadcast %100 : vector<1x128xf32> to vector<16x128xf32>
    %102 = arith.addf %91, %101 : vector<16x128xf32>
    %cst_58 = arith.constant 0.000000e+00 : f32
    %103 = vector.broadcast %cst_58 : f32 to vector<16x128xf32>
    %104 = arith.cmpf oge, %102, %103 : vector<16x128xf32>
    %cst_59 = arith.constant 2.000000e-01 : f32
    %105 = vector.broadcast %cst_59 : f32 to vector<16x128xf32>
    %106 = arith.mulf %105, %102 : vector<16x128xf32>
    %107 = arith.select %104, %102, %106 : vector<16x128xi1>, vector<16x128xf32>
    %c1_60 = arith.constant 1 : index
    %c8 = arith.constant 8 : index
    %108 = vector.load %arg22[%c1_60, %c8] : memref<36x144xf32, #tpu.memory_space<vmem>>, vector<16x128xf32>
    tpu.vector_store %arg22[%c1_60, %c8], %99 {strides = array<i32>} : memref<36x144xf32, #tpu.memory_space<vmem>>, vector<16x128xf32>,
    %c19 = arith.constant 19 : index
    %c8_61 = arith.constant 8 : index
    %109 = vector.load %arg22[%c19, %c8_61] : memref<36x144xf32, #tpu.memory_space<vmem>>, vector<16x128xf32>
    tpu.vector_store %arg22[%c19, %c8_61], %107 {strides = array<i32>} : memref<36x144xf32, #tpu.memory_space<vmem>>, vector<16x128xf32>,
    %c0_62 = arith.constant 0 : index
    %c0_63 = arith.constant 0 : index
    %110 = vector.load %arg22[%c0_62, %c0_63] : memref<36x144xf32, #tpu.memory_space<vmem>>, vector<18x144xf32>
    %111 = arith.truncf %110 : vector<18x144xf32> to vector<18x144xbf16>
    %c18 = arith.constant 18 : index
    %c0_64 = arith.constant 0 : index
    %112 = vector.load %arg22[%c18, %c0_64] : memref<36x144xf32, #tpu.memory_space<vmem>>, vector<18x144xf32>
    %113 = arith.truncf %112 : vector<18x144xf32> to vector<18x144xbf16>
    %114 = tpu.iota {dimensions = array<i32: 0>} : vector<8x18xi32>
    %115 = tpu.iota {dimensions = array<i32: 1>} : vector<8x18xi32>
    %c2_i32_65 = arith.constant 2 : i32
    %116 = vector.broadcast %c2_i32_65 : i32 to vector<8x18xi32>
    %117 = arith.muli %116, %114 : vector<8x18xi32>
    %c0_i32_66 = arith.constant 0 : i32
    %118 = vector.broadcast %c0_i32_66 : i32 to vector<8x18xi32>
    %119 = arith.addi %117, %118 : vector<8x18xi32>
    %120 = arith.cmpi eq, %115, %119 : vector<8x18xi32>
    %cst_67 = arith.constant 1.000000e+00 : f32
    %cst_68 = arith.constant 0.000000e+00 : f32
    %121 = vector.broadcast %cst_67 : f32 to vector<8x18xf32>
    %122 = vector.broadcast %cst_68 : f32 to vector<8x18xf32>
    %123 = arith.select %120, %121, %122 : vector<8x18xi1>, vector<8x18xf32>
    %124 = arith.truncf %123 : vector<8x18xf32> to vector<8x18xbf16>
    %c2_i32_69 = arith.constant 2 : i32
    %125 = vector.broadcast %c2_i32_69 : i32 to vector<8x18xi32>
    %126 = arith.muli %125, %114 : vector<8x18xi32>
    %c1_i32_70 = arith.constant 1 : i32
    %127 = vector.broadcast %c1_i32_70 : i32 to vector<8x18xi32>
    %128 = arith.addi %126, %127 : vector<8x18xi32>
    %129 = arith.cmpi eq, %115, %128 : vector<8x18xi32>
    %cst_71 = arith.constant 1.000000e+00 : f32
    %cst_72 = arith.constant 0.000000e+00 : f32
    %130 = vector.broadcast %cst_71 : f32 to vector<8x18xf32>
    %131 = vector.broadcast %cst_72 : f32 to vector<8x18xf32>
    %132 = arith.select %129, %130, %131 : vector<8x18xi1>, vector<8x18xf32>
    %133 = arith.truncf %132 : vector<8x18xf32> to vector<8x18xbf16>
    %c2_i32_73 = arith.constant 2 : i32
    %134 = vector.broadcast %c2_i32_73 : i32 to vector<8x18xi32>
    %135 = arith.muli %134, %114 : vector<8x18xi32>
    %c2_i32_74 = arith.constant 2 : i32
    %136 = vector.broadcast %c2_i32_74 : i32 to vector<8x18xi32>
    %137 = arith.addi %135, %136 : vector<8x18xi32>
    %138 = arith.cmpi eq, %115, %137 : vector<8x18xi32>
    %cst_75 = arith.constant 1.000000e+00 : f32
    %cst_76 = arith.constant 0.000000e+00 : f32
    %139 = vector.broadcast %cst_75 : f32 to vector<8x18xf32>
    %140 = vector.broadcast %cst_76 : f32 to vector<8x18xf32>
    %141 = arith.select %138, %139, %140 : vector<8x18xi1>, vector<8x18xf32>
    %142 = arith.truncf %141 : vector<8x18xf32> to vector<8x18xbf16>
    %c2_i32_77 = arith.constant 2 : i32
    %143 = vector.broadcast %c2_i32_77 : i32 to vector<8x18xi32>
    %144 = arith.muli %143, %114 : vector<8x18xi32>
    %c3_i32_78 = arith.constant 3 : i32
    %145 = vector.broadcast %c3_i32_78 : i32 to vector<8x18xi32>
    %146 = arith.addi %144, %145 : vector<8x18xi32>
    %147 = arith.cmpi eq, %115, %146 : vector<8x18xi32>
    %cst_79 = arith.constant 1.000000e+00 : f32
    %cst_80 = arith.constant 0.000000e+00 : f32
    %148 = vector.broadcast %cst_79 : f32 to vector<8x18xf32>
    %149 = vector.broadcast %cst_80 : f32 to vector<8x18xf32>
    %150 = arith.select %147, %148, %149 : vector<8x18xi1>, vector<8x18xf32>
    %151 = arith.truncf %150 : vector<8x18xf32> to vector<8x18xbf16>
    %cst_81 = arith.constant 0.000000e+00 : f32
    %152 = vector.broadcast %cst_81 : f32 to vector<8x128xf32>
    %cst_82 = arith.constant 0.000000e+00 : f32
    %153 = vector.broadcast %cst_82 : f32 to vector<8x128xf32>
    %c0_83 = arith.constant 0 : index
    %c0_84 = arith.constant 0 : index
    %c0_85 = arith.constant 0 : index
    %154 = vector.load %arg4[%c0_83, %c0_84, %c0_85] : memref<4x144x128xbf16, #tpu.memory_space<vmem>>, vector<1x144x128xbf16>
    %155 = vector.shape_cast %154 : vector<1x144x128xbf16> to vector<144x128xbf16>
    %cst_86 = arith.constant dense<0.000000e+00> : vector<8x144xf32>
    %156 = tpu.matmul %124, %111, %cst_86 {dimension_numbers = #tpu.dot_dimension_numbers<[1], [0], [0], [1], [0, 0, 1, 1], [], []>} : vector<8x18xbf16>, vector<18x144xbf16>, vector<8x144xf32> -> vector<8x144xf32>
    %157 = arith.truncf %156 : vector<8x144xf32> to vector<8x144xbf16>
    %cst_87 = arith.constant dense<0.000000e+00> : vector<8x128xf32>
    %158 = tpu.matmul %157, %155, %cst_87 {dimension_numbers = #tpu.dot_dimension_numbers<[1], [0], [0], [1], [0, 0, 1, 1], [], []>} : vector<8x144xbf16>, vector<144x128xbf16>, vector<8x128xf32> -> vector<8x128xf32>
    %159 = arith.addf %152, %158 : vector<8x128xf32>
    %cst_88 = arith.constant dense<0.000000e+00> : vector<8x144xf32>
    %160 = tpu.matmul %124, %113, %cst_88 {dimension_numbers = #tpu.dot_dimension_numbers<[1], [0], [0], [1], [0, 0, 1, 1], [], []>} : vector<8x18xbf16>, vector<18x144xbf16>, vector<8x144xf32> -> vector<8x144xf32>
    %161 = arith.truncf %160 : vector<8x144xf32> to vector<8x144xbf16>
    %cst_89 = arith.constant dense<0.000000e+00> : vector<8x128xf32>
    %162 = tpu.matmul %161, %155, %cst_89 {dimension_numbers = #tpu.dot_dimension_numbers<[1], [0], [0], [1], [0, 0, 1, 1], [], []>} : vector<8x144xbf16>, vector<144x128xbf16>, vector<8x128xf32> -> vector<8x128xf32>
    %163 = arith.addf %153, %162 : vector<8x128xf32>
    %c1_90 = arith.constant 1 : index
    %c0_91 = arith.constant 0 : index
    %c0_92 = arith.constant 0 : index
    %164 = vector.load %arg4[%c1_90, %c0_91, %c0_92] : memref<4x144x128xbf16, #tpu.memory_space<vmem>>, vector<1x144x128xbf16>
    %165 = vector.shape_cast %164 : vector<1x144x128xbf16> to vector<144x128xbf16>
    %cst_93 = arith.constant dense<0.000000e+00> : vector<8x144xf32>
    %166 = tpu.matmul %133, %111, %cst_93 {dimension_numbers = #tpu.dot_dimension_numbers<[1], [0], [0], [1], [0, 0, 1, 1], [], []>} : vector<8x18xbf16>, vector<18x144xbf16>, vector<8x144xf32> -> vector<8x144xf32>
    %167 = arith.truncf %166 : vector<8x144xf32> to vector<8x144xbf16>
    %cst_94 = arith.constant dense<0.000000e+00> : vector<8x128xf32>
    %168 = tpu.matmul %167, %165, %cst_94 {dimension_numbers = #tpu.dot_dimension_numbers<[1], [0], [0], [1], [0, 0, 1, 1], [], []>} : vector<8x144xbf16>, vector<144x128xbf16>, vector<8x128xf32> -> vector<8x128xf32>
    %169 = arith.addf %159, %168 : vector<8x128xf32>
    %cst_95 = arith.constant dense<0.000000e+00> : vector<8x144xf32>
    %170 = tpu.matmul %133, %113, %cst_95 {dimension_numbers = #tpu.dot_dimension_numbers<[1], [0], [0], [1], [0, 0, 1, 1], [], []>} : vector<8x18xbf16>, vector<18x144xbf16>, vector<8x144xf32> -> vector<8x144xf32>
    %171 = arith.truncf %170 : vector<8x144xf32> to vector<8x144xbf16>
    %cst_96 = arith.constant dense<0.000000e+00> : vector<8x128xf32>
    %172 = tpu.matmul %171, %165, %cst_96 {dimension_numbers = #tpu.dot_dimension_numbers<[1], [0], [0], [1], [0, 0, 1, 1], [], []>} : vector<8x144xbf16>, vector<144x128xbf16>, vector<8x128xf32> -> vector<8x128xf32>
    %173 = arith.addf %163, %172 : vector<8x128xf32>
    %c2_97 = arith.constant 2 : index
    %c0_98 = arith.constant 0 : index
    %c0_99 = arith.constant 0 : index
    %174 = vector.load %arg4[%c2_97, %c0_98, %c0_99] : memref<4x144x128xbf16, #tpu.memory_space<vmem>>, vector<1x144x128xbf16>
    %175 = vector.shape_cast %174 : vector<1x144x128xbf16> to vector<144x128xbf16>
    %cst_100 = arith.constant dense<0.000000e+00> : vector<8x144xf32>
    %176 = tpu.matmul %142, %111, %cst_100 {dimension_numbers = #tpu.dot_dimension_numbers<[1], [0], [0], [1], [0, 0, 1, 1], [], []>} : vector<8x18xbf16>, vector<18x144xbf16>, vector<8x144xf32> -> vector<8x144xf32>
    %177 = arith.truncf %176 : vector<8x144xf32> to vector<8x144xbf16>
    %cst_101 = arith.constant dense<0.000000e+00> : vector<8x128xf32>
    %178 = tpu.matmul %177, %175, %cst_101 {dimension_numbers = #tpu.dot_dimension_numbers<[1], [0], [0], [1], [0, 0, 1, 1], [], []>} : vector<8x144xbf16>, vector<144x128xbf16>, vector<8x128xf32> -> vector<8x128xf32>
    %179 = arith.addf %169, %178 : vector<8x128xf32>
    %cst_102 = arith.constant dense<0.000000e+00> : vector<8x144xf32>
    %180 = tpu.matmul %142, %113, %cst_102 {dimension_numbers = #tpu.dot_dimension_numbers<[1], [0], [0], [1], [0, 0, 1, 1], [], []>} : vector<8x18xbf16>, vector<18x144xbf16>, vector<8x144xf32> -> vector<8x144xf32>
    %181 = arith.truncf %180 : vector<8x144xf32> to vector<8x144xbf16>
    %cst_103 = arith.constant dense<0.000000e+00> : vector<8x128xf32>
    %182 = tpu.matmul %181, %175, %cst_103 {dimension_numbers = #tpu.dot_dimension_numbers<[1], [0], [0], [1], [0, 0, 1, 1], [], []>} : vector<8x144xbf16>, vector<144x128xbf16>, vector<8x128xf32> -> vector<8x128xf32>
    %183 = arith.addf %173, %182 : vector<8x128xf32>
    %c3_104 = arith.constant 3 : index
    %c0_105 = arith.constant 0 : index
    %c0_106 = arith.constant 0 : index
    %184 = vector.load %arg4[%c3_104, %c0_105, %c0_106] : memref<4x144x128xbf16, #tpu.memory_space<vmem>>, vector<1x144x128xbf16>
    %185 = vector.shape_cast %184 : vector<1x144x128xbf16> to vector<144x128xbf16>
    %cst_107 = arith.constant dense<0.000000e+00> : vector<8x144xf32>
    %186 = tpu.matmul %151, %111, %cst_107 {dimension_numbers = #tpu.dot_dimension_numbers<[1], [0], [0], [1], [0, 0, 1, 1], [], []>} : vector<8x18xbf16>, vector<18x144xbf16>, vector<8x144xf32> -> vector<8x144xf32>
    %187 = arith.truncf %186 : vector<8x144xf32> to vector<8x144xbf16>
    %cst_108 = arith.constant dense<0.000000e+00> : vector<8x128xf32>
    %188 = tpu.matmul %187, %185, %cst_108 {dimension_numbers = #tpu.dot_dimension_numbers<[1], [0], [0], [1], [0, 0, 1, 1], [], []>} : vector<8x144xbf16>, vector<144x128xbf16>, vector<8x128xf32> -> vector<8x128xf32>
    %189 = arith.addf %179, %188 : vector<8x128xf32>
    %cst_109 = arith.constant dense<0.000000e+00> : vector<8x144xf32>
    %190 = tpu.matmul %151, %113, %cst_109 {dimension_numbers = #tpu.dot_dimension_numbers<[1], [0], [0], [1], [0, 0, 1, 1], [], []>} : vector<8x18xbf16>, vector<18x144xbf16>, vector<8x144xf32> -> vector<8x144xf32>
    %191 = arith.truncf %190 : vector<8x144xf32> to vector<8x144xbf16>
    %cst_110 = arith.constant dense<0.000000e+00> : vector<8x128xf32>
    %192 = tpu.matmul %191, %185, %cst_110 {dimension_numbers = #tpu.dot_dimension_numbers<[1], [0], [0], [1], [0, 0, 1, 1], [], []>} : vector<8x144xbf16>, vector<144x128xbf16>, vector<8x128xf32> -> vector<8x128xf32>
    %193 = arith.addf %183, %192 : vector<8x128xf32>
    %cst_111 = arith.constant dense<0.000000e+00> : vector<128xf32>
    %194 = vector.multi_reduction <add>, %189, %cst_111 [0] : vector<8x128xf32> to vector<128xf32>
    %195 = vector.shape_cast %194 : vector<128xf32> to vector<1x128xf32>
    %cst_112 = arith.constant dense<0.000000e+00> : vector<128xf32>
    %196 = vector.multi_reduction <add>, %193, %cst_112 [0] : vector<8x128xf32> to vector<128xf32>
    %197 = vector.shape_cast %196 : vector<128xf32> to vector<1x128xf32>
    %198 = arith.addf %195, %197 : vector<1x128xf32>
    %c0_113 = arith.constant 0 : index
    %c0_114 = arith.constant 0 : index
    %199 = vector.load %arg8[%c0_113, %c0_114] : memref<128x16xf32, #tpu.memory_space<vmem>>, vector<128x16xf32>
    %cst_115 = arith.constant dense<0.000000e+00> : vector<1x16xf32>
    %200 = tpu.matmul %198, %199, %cst_115 {dimension_numbers = #tpu.dot_dimension_numbers<[1], [0], [0], [1], [0, 0, 1, 1], [], []>} : vector<1x128xf32>, vector<128x16xf32>, vector<1x16xf32> -> vector<1x16xf32>
    %cst_116 = arith.constant 7.812500e-03 : f32
    %201 = vector.broadcast %cst_116 : f32 to vector<1x16xf32>
    %202 = arith.mulf %200, %201 : vector<1x16xf32>
    %c0_117 = arith.constant 0 : index
    %c0_118 = arith.constant 0 : index
    %203 = vector.load %arg7[%c0_117, %c0_118] : memref<16x128xf32, #tpu.memory_space<vmem>>, vector<16x128xf32>
    %cst_119 = arith.constant dense<0.000000e+00> : vector<1x128xf32>
    %204 = tpu.matmul %202, %203, %cst_119 {dimension_numbers = #tpu.dot_dimension_numbers<[1], [0], [0], [1], [0, 0, 1, 1], [], []>} : vector<1x16xf32>, vector<16x128xf32>, vector<1x128xf32> -> vector<1x128xf32>
    %205 = vector.broadcast %204 : vector<1x128xf32> to vector<8x128xf32>
    %206 = arith.subf %189, %205 : vector<8x128xf32>
    %207 = arith.mulf %206, %206 : vector<8x128xf32>
    %cst_120 = arith.constant dense<0.000000e+00> : vector<128xf32>
    %208 = vector.multi_reduction <add>, %207, %cst_120 [0] : vector<8x128xf32> to vector<128xf32>
    %209 = vector.shape_cast %208 : vector<128xf32> to vector<1x128xf32>
    %210 = vector.broadcast %204 : vector<1x128xf32> to vector<8x128xf32>
    %211 = arith.subf %193, %210 : vector<8x128xf32>
    %212 = arith.mulf %211, %211 : vector<8x128xf32>
    %cst_121 = arith.constant dense<0.000000e+00> : vector<128xf32>
    %213 = vector.multi_reduction <add>, %212, %cst_121 [0] : vector<8x128xf32> to vector<128xf32>
    %214 = vector.shape_cast %213 : vector<128xf32> to vector<1x128xf32>
    %215 = arith.addf %209, %214 : vector<1x128xf32>
    %c0_122 = arith.constant 0 : index
    %c0_123 = arith.constant 0 : index
    %216 = vector.load %arg8[%c0_122, %c0_123] : memref<128x16xf32, #tpu.memory_space<vmem>>, vector<128x16xf32>
    %cst_124 = arith.constant dense<0.000000e+00> : vector<1x16xf32>
    %217 = tpu.matmul %215, %216, %cst_124 {dimension_numbers = #tpu.dot_dimension_numbers<[1], [0], [0], [1], [0, 0, 1, 1], [], []>} : vector<1x128xf32>, vector<128x16xf32>, vector<1x16xf32> -> vector<1x16xf32>
    %cst_125 = arith.constant 7.812500e-03 : f32
    %218 = vector.broadcast %cst_125 : f32 to vector<1x16xf32>
    %219 = arith.mulf %217, %218 : vector<1x16xf32>
    %cst_126 = arith.constant 9.99999974E-6 : f32
    %220 = vector.broadcast %cst_126 : f32 to vector<1x16xf32>
    %221 = arith.addf %219, %220 : vector<1x16xf32>
    %222 = math.rsqrt %221 : vector<1x16xf32>
    %c0_127 = arith.constant 0 : index
    %c0_128 = arith.constant 0 : index
    %223 = vector.load %arg7[%c0_127, %c0_128] : memref<16x128xf32, #tpu.memory_space<vmem>>, vector<16x128xf32>
    %cst_129 = arith.constant dense<0.000000e+00> : vector<1x128xf32>
    %224 = tpu.matmul %222, %223, %cst_129 {dimension_numbers = #tpu.dot_dimension_numbers<[1], [0], [0], [1], [0, 0, 1, 1], [], []>} : vector<1x16xf32>, vector<16x128xf32>, vector<1x128xf32> -> vector<1x128xf32>
    %225 = vector.broadcast %204 : vector<1x128xf32> to vector<8x128xf32>
    %226 = arith.subf %189, %225 : vector<8x128xf32>
    %227 = vector.broadcast %224 : vector<1x128xf32> to vector<8x128xf32>
    %228 = arith.mulf %226, %227 : vector<8x128xf32>
    %c0_130 = arith.constant 0 : index
    %c0_131 = arith.constant 0 : index
    %229 = vector.load %arg5[%c0_130, %c0_131] : memref<1x128xf32, #tpu.memory_space<vmem>>, vector<1x128xf32>
    %230 = vector.broadcast %229 : vector<1x128xf32> to vector<8x128xf32>
    %231 = arith.mulf %228, %230 : vector<8x128xf32>
    %c0_132 = arith.constant 0 : index
    %c0_133 = arith.constant 0 : index
    %232 = vector.load %arg6[%c0_132, %c0_133] : memref<1x128xf32, #tpu.memory_space<vmem>>, vector<1x128xf32>
    %233 = vector.broadcast %232 : vector<1x128xf32> to vector<8x128xf32>
    %234 = arith.addf %231, %233 : vector<8x128xf32>
    %cst_134 = arith.constant 0.000000e+00 : f32
    %235 = vector.broadcast %cst_134 : f32 to vector<8x128xf32>
    %236 = arith.cmpf oge, %234, %235 : vector<8x128xf32>
    %cst_135 = arith.constant 2.000000e-01 : f32
    %237 = vector.broadcast %cst_135 : f32 to vector<8x128xf32>
    %238 = arith.mulf %237, %234 : vector<8x128xf32>
    %239 = arith.select %236, %234, %238 : vector<8x128xi1>, vector<8x128xf32>
    %240 = vector.broadcast %204 : vector<1x128xf32> to vector<8x128xf32>
    %241 = arith.subf %193, %240 : vector<8x128xf32>
    %242 = vector.broadcast %224 : vector<1x128xf32> to vector<8x128xf32>
    %243 = arith.mulf %241, %242 : vector<8x128xf32>
    %c0_136 = arith.constant 0 : index
    %c0_137 = arith.constant 0 : index
    %244 = vector.load %arg5[%c0_136, %c0_137] : memref<1x128xf32, #tpu.memory_space<vmem>>, vector<1x128xf32>
    %245 = vector.broadcast %244 : vector<1x128xf32> to vector<8x128xf32>
    %246 = arith.mulf %243, %245 : vector<8x128xf32>
    %c0_138 = arith.constant 0 : index
    %c0_139 = arith.constant 0 : index
    %247 = vector.load %arg6[%c0_138, %c0_139] : memref<1x128xf32, #tpu.memory_space<vmem>>, vector<1x128xf32>
    %248 = vector.broadcast %247 : vector<1x128xf32> to vector<8x128xf32>
    %249 = arith.addf %246, %248 : vector<8x128xf32>
    %cst_140 = arith.constant 0.000000e+00 : f32
    %250 = vector.broadcast %cst_140 : f32 to vector<8x128xf32>
    %251 = arith.cmpf oge, %249, %250 : vector<8x128xf32>
    %cst_141 = arith.constant 2.000000e-01 : f32
    %252 = vector.broadcast %cst_141 : f32 to vector<8x128xf32>
    %253 = arith.mulf %252, %249 : vector<8x128xf32>
    %254 = arith.select %251, %249, %253 : vector<8x128xi1>, vector<8x128xf32>
    %c1_142 = arith.constant 1 : index
    %c16 = arith.constant 16 : index
    %255 = vector.load %arg23[%c1_142, %c16] : memref<20x160xf32, #tpu.memory_space<vmem>>, vector<8x128xf32>
    tpu.vector_store %arg23[%c1_142, %c16], %239 {strides = array<i32>} : memref<20x160xf32, #tpu.memory_space<vmem>>, vector<8x128xf32>,
    %c11 = arith.constant 11 : index
    %c16_143 = arith.constant 16 : index
    %256 = vector.load %arg23[%c11, %c16_143] : memref<20x160xf32, #tpu.memory_space<vmem>>, vector<8x128xf32>
    tpu.vector_store %arg23[%c11, %c16_143], %254 {strides = array<i32>} : memref<20x160xf32, #tpu.memory_space<vmem>>, vector<8x128xf32>,
    %c0_144 = arith.constant 0 : index
    %c0_145 = arith.constant 0 : index
    %257 = vector.load %arg23[%c0_144, %c0_145] : memref<20x160xf32, #tpu.memory_space<vmem>>, vector<10x160xf32>
    %258 = arith.truncf %257 : vector<10x160xf32> to vector<10x160xbf16>
    %c10 = arith.constant 10 : index
    %c0_146 = arith.constant 0 : index
    %259 = vector.load %arg23[%c10, %c0_146] : memref<20x160xf32, #tpu.memory_space<vmem>>, vector<10x160xf32>
    %260 = arith.truncf %259 : vector<10x160xf32> to vector<10x160xbf16>
    %261 = tpu.iota {dimensions = array<i32: 0>} : vector<4x10xi32>
    %262 = tpu.iota {dimensions = array<i32: 1>} : vector<4x10xi32>
    %c2_i32_147 = arith.constant 2 : i32
    %263 = vector.broadcast %c2_i32_147 : i32 to vector<4x10xi32>
    %264 = arith.muli %263, %261 : vector<4x10xi32>
    %c0_i32_148 = arith.constant 0 : i32
    %265 = vector.broadcast %c0_i32_148 : i32 to vector<4x10xi32>
    %266 = arith.addi %264, %265 : vector<4x10xi32>
    %267 = arith.cmpi eq, %262, %266 : vector<4x10xi32>
    %cst_149 = arith.constant 1.000000e+00 : f32
    %cst_150 = arith.constant 0.000000e+00 : f32
    %268 = vector.broadcast %cst_149 : f32 to vector<4x10xf32>
    %269 = vector.broadcast %cst_150 : f32 to vector<4x10xf32>
    %270 = arith.select %267, %268, %269 : vector<4x10xi1>, vector<4x10xf32>
    %271 = arith.truncf %270 : vector<4x10xf32> to vector<4x10xbf16>
    %c2_i32_151 = arith.constant 2 : i32
    %272 = vector.broadcast %c2_i32_151 : i32 to vector<4x10xi32>
    %273 = arith.muli %272, %261 : vector<4x10xi32>
    %c1_i32_152 = arith.constant 1 : i32
    %274 = vector.broadcast %c1_i32_152 : i32 to vector<4x10xi32>
    %275 = arith.addi %273, %274 : vector<4x10xi32>
    %276 = arith.cmpi eq, %262, %275 : vector<4x10xi32>
    %cst_153 = arith.constant 1.000000e+00 : f32
    %cst_154 = arith.constant 0.000000e+00 : f32
    %277 = vector.broadcast %cst_153 : f32 to vector<4x10xf32>
    %278 = vector.broadcast %cst_154 : f32 to vector<4x10xf32>
    %279 = arith.select %276, %277, %278 : vector<4x10xi1>, vector<4x10xf32>
    %280 = arith.truncf %279 : vector<4x10xf32> to vector<4x10xbf16>
    %c2_i32_155 = arith.constant 2 : i32
    %281 = vector.broadcast %c2_i32_155 : i32 to vector<4x10xi32>
    %282 = arith.muli %281, %261 : vector<4x10xi32>
    %c2_i32_156 = arith.constant 2 : i32
    %283 = vector.broadcast %c2_i32_156 : i32 to vector<4x10xi32>
    %284 = arith.addi %282, %283 : vector<4x10xi32>
    %285 = arith.cmpi eq, %262, %284 : vector<4x10xi32>
    %cst_157 = arith.constant 1.000000e+00 : f32
    %cst_158 = arith.constant 0.000000e+00 : f32
    %286 = vector.broadcast %cst_157 : f32 to vector<4x10xf32>
    %287 = vector.broadcast %cst_158 : f32 to vector<4x10xf32>
    %288 = arith.select %285, %286, %287 : vector<4x10xi1>, vector<4x10xf32>
    %289 = arith.truncf %288 : vector<4x10xf32> to vector<4x10xbf16>
    %c2_i32_159 = arith.constant 2 : i32
    %290 = vector.broadcast %c2_i32_159 : i32 to vector<4x10xi32>
    %291 = arith.muli %290, %261 : vector<4x10xi32>
    %c3_i32_160 = arith.constant 3 : i32
    %292 = vector.broadcast %c3_i32_160 : i32 to vector<4x10xi32>
    %293 = arith.addi %291, %292 : vector<4x10xi32>
    %294 = arith.cmpi eq, %262, %293 : vector<4x10xi32>
    %cst_161 = arith.constant 1.000000e+00 : f32
    %cst_162 = arith.constant 0.000000e+00 : f32
    %295 = vector.broadcast %cst_161 : f32 to vector<4x10xf32>
    %296 = vector.broadcast %cst_162 : f32 to vector<4x10xf32>
    %297 = arith.select %294, %295, %296 : vector<4x10xi1>, vector<4x10xf32>
    %298 = arith.truncf %297 : vector<4x10xf32> to vector<4x10xbf16>
    %cst_163 = arith.constant 0.000000e+00 : f32
    %299 = vector.broadcast %cst_163 : f32 to vector<4x128xf32>
    %cst_164 = arith.constant 0.000000e+00 : f32
    %300 = vector.broadcast %cst_164 : f32 to vector<4x128xf32>
    %c0_165 = arith.constant 0 : index
    %c0_166 = arith.constant 0 : index
    %c0_167 = arith.constant 0 : index
    %301 = vector.load %arg9[%c0_165, %c0_166, %c0_167] : memref<4x160x128xbf16, #tpu.memory_space<vmem>>, vector<1x160x128xbf16>
    %302 = vector.shape_cast %301 : vector<1x160x128xbf16> to vector<160x128xbf16>
    %cst_168 = arith.constant dense<0.000000e+00> : vector<4x160xf32>
    %303 = tpu.matmul %271, %258, %cst_168 {dimension_numbers = #tpu.dot_dimension_numbers<[1], [0], [0], [1], [0, 0, 1, 1], [], []>} : vector<4x10xbf16>, vector<10x160xbf16>, vector<4x160xf32> -> vector<4x160xf32>
    %304 = arith.truncf %303 : vector<4x160xf32> to vector<4x160xbf16>
    %cst_169 = arith.constant dense<0.000000e+00> : vector<4x128xf32>
    %305 = tpu.matmul %304, %302, %cst_169 {dimension_numbers = #tpu.dot_dimension_numbers<[1], [0], [0], [1], [0, 0, 1, 1], [], []>} : vector<4x160xbf16>, vector<160x128xbf16>, vector<4x128xf32> -> vector<4x128xf32>
    %306 = arith.addf %299, %305 : vector<4x128xf32>
    %cst_170 = arith.constant dense<0.000000e+00> : vector<4x160xf32>
    %307 = tpu.matmul %271, %260, %cst_170 {dimension_numbers = #tpu.dot_dimension_numbers<[1], [0], [0], [1], [0, 0, 1, 1], [], []>} : vector<4x10xbf16>, vector<10x160xbf16>, vector<4x160xf32> -> vector<4x160xf32>
    %308 = arith.truncf %307 : vector<4x160xf32> to vector<4x160xbf16>
    %cst_171 = arith.constant dense<0.000000e+00> : vector<4x128xf32>
    %309 = tpu.matmul %308, %302, %cst_171 {dimension_numbers = #tpu.dot_dimension_numbers<[1], [0], [0], [1], [0, 0, 1, 1], [], []>} : vector<4x160xbf16>, vector<160x128xbf16>, vector<4x128xf32> -> vector<4x128xf32>
    %310 = arith.addf %300, %309 : vector<4x128xf32>
    %c1_172 = arith.constant 1 : index
    %c0_173 = arith.constant 0 : index
    %c0_174 = arith.constant 0 : index
    %311 = vector.load %arg9[%c1_172, %c0_173, %c0_174] : memref<4x160x128xbf16, #tpu.memory_space<vmem>>, vector<1x160x128xbf16>
    %312 = vector.shape_cast %311 : vector<1x160x128xbf16> to vector<160x128xbf16>
    %cst_175 = arith.constant dense<0.000000e+00> : vector<4x160xf32>
    %313 = tpu.matmul %280, %258, %cst_175 {dimension_numbers = #tpu.dot_dimension_numbers<[1], [0], [0], [1], [0, 0, 1, 1], [], []>} : vector<4x10xbf16>, vector<10x160xbf16>, vector<4x160xf32> -> vector<4x160xf32>
    %314 = arith.truncf %313 : vector<4x160xf32> to vector<4x160xbf16>
    %cst_176 = arith.constant dense<0.000000e+00> : vector<4x128xf32>
    %315 = tpu.matmul %314, %312, %cst_176 {dimension_numbers = #tpu.dot_dimension_numbers<[1], [0], [0], [1], [0, 0, 1, 1], [], []>} : vector<4x160xbf16>, vector<160x128xbf16>, vector<4x128xf32> -> vector<4x128xf32>
    %316 = arith.addf %306, %315 : vector<4x128xf32>
    %cst_177 = arith.constant dense<0.000000e+00> : vector<4x160xf32>
    %317 = tpu.matmul %280, %260, %cst_177 {dimension_numbers = #tpu.dot_dimension_numbers<[1], [0], [0], [1], [0, 0, 1, 1], [], []>} : vector<4x10xbf16>, vector<10x160xbf16>, vector<4x160xf32> -> vector<4x160xf32>
    %318 = arith.truncf %317 : vector<4x160xf32> to vector<4x160xbf16>
    %cst_178 = arith.constant dense<0.000000e+00> : vector<4x128xf32>
    %319 = tpu.matmul %318, %312, %cst_178 {dimension_numbers = #tpu.dot_dimension_numbers<[1], [0], [0], [1], [0, 0, 1, 1], [], []>} : vector<4x160xbf16>, vector<160x128xbf16>, vector<4x128xf32> -> vector<4x128xf32>
    %320 = arith.addf %310, %319 : vector<4x128xf32>
    %c2_179 = arith.constant 2 : index
    %c0_180 = arith.constant 0 : index
    %c0_181 = arith.constant 0 : index
    %321 = vector.load %arg9[%c2_179, %c0_180, %c0_181] : memref<4x160x128xbf16, #tpu.memory_space<vmem>>, vector<1x160x128xbf16>
    %322 = vector.shape_cast %321 : vector<1x160x128xbf16> to vector<160x128xbf16>
    %cst_182 = arith.constant dense<0.000000e+00> : vector<4x160xf32>
    %323 = tpu.matmul %289, %258, %cst_182 {dimension_numbers = #tpu.dot_dimension_numbers<[1], [0], [0], [1], [0, 0, 1, 1], [], []>} : vector<4x10xbf16>, vector<10x160xbf16>, vector<4x160xf32> -> vector<4x160xf32>
    %324 = arith.truncf %323 : vector<4x160xf32> to vector<4x160xbf16>
    %cst_183 = arith.constant dense<0.000000e+00> : vector<4x128xf32>
    %325 = tpu.matmul %324, %322, %cst_183 {dimension_numbers = #tpu.dot_dimension_numbers<[1], [0], [0], [1], [0, 0, 1, 1], [], []>} : vector<4x160xbf16>, vector<160x128xbf16>, vector<4x128xf32> -> vector<4x128xf32>
    %326 = arith.addf %316, %325 : vector<4x128xf32>
    %cst_184 = arith.constant dense<0.000000e+00> : vector<4x160xf32>
    %327 = tpu.matmul %289, %260, %cst_184 {dimension_numbers = #tpu.dot_dimension_numbers<[1], [0], [0], [1], [0, 0, 1, 1], [], []>} : vector<4x10xbf16>, vector<10x160xbf16>, vector<4x160xf32> -> vector<4x160xf32>
    %328 = arith.truncf %327 : vector<4x160xf32> to vector<4x160xbf16>
    %cst_185 = arith.constant dense<0.000000e+00> : vector<4x128xf32>
    %329 = tpu.matmul %328, %322, %cst_185 {dimension_numbers = #tpu.dot_dimension_numbers<[1], [0], [0], [1], [0, 0, 1, 1], [], []>} : vector<4x160xbf16>, vector<160x128xbf16>, vector<4x128xf32> -> vector<4x128xf32>
    %330 = arith.addf %320, %329 : vector<4x128xf32>
    %c3_186 = arith.constant 3 : index
    %c0_187 = arith.constant 0 : index
    %c0_188 = arith.constant 0 : index
    %331 = vector.load %arg9[%c3_186, %c0_187, %c0_188] : memref<4x160x128xbf16, #tpu.memory_space<vmem>>, vector<1x160x128xbf16>
    %332 = vector.shape_cast %331 : vector<1x160x128xbf16> to vector<160x128xbf16>
    %cst_189 = arith.constant dense<0.000000e+00> : vector<4x160xf32>
    %333 = tpu.matmul %298, %258, %cst_189 {dimension_numbers = #tpu.dot_dimension_numbers<[1], [0], [0], [1], [0, 0, 1, 1], [], []>} : vector<4x10xbf16>, vector<10x160xbf16>, vector<4x160xf32> -> vector<4x160xf32>
    %334 = arith.truncf %333 : vector<4x160xf32> to vector<4x160xbf16>
    %cst_190 = arith.constant dense<0.000000e+00> : vector<4x128xf32>
    %335 = tpu.matmul %334, %332, %cst_190 {dimension_numbers = #tpu.dot_dimension_numbers<[1], [0], [0], [1], [0, 0, 1, 1], [], []>} : vector<4x160xbf16>, vector<160x128xbf16>, vector<4x128xf32> -> vector<4x128xf32>
    %336 = arith.addf %326, %335 : vector<4x128xf32>
    %cst_191 = arith.constant dense<0.000000e+00> : vector<4x160xf32>
    %337 = tpu.matmul %298, %260, %cst_191 {dimension_numbers = #tpu.dot_dimension_numbers<[1], [0], [0], [1], [0, 0, 1, 1], [], []>} : vector<4x10xbf16>, vector<10x160xbf16>, vector<4x160xf32> -> vector<4x160xf32>
    %338 = arith.truncf %337 : vector<4x160xf32> to vector<4x160xbf16>
    %cst_192 = arith.constant dense<0.000000e+00> : vector<4x128xf32>
    %339 = tpu.matmul %338, %332, %cst_192 {dimension_numbers = #tpu.dot_dimension_numbers<[1], [0], [0], [1], [0, 0, 1, 1], [], []>} : vector<4x160xbf16>, vector<160x128xbf16>, vector<4x128xf32> -> vector<4x128xf32>
    %340 = arith.addf %330, %339 : vector<4x128xf32>
    %cst_193 = arith.constant dense<0.000000e+00> : vector<128xf32>
    %341 = vector.multi_reduction <add>, %336, %cst_193 [0] : vector<4x128xf32> to vector<128xf32>
    %342 = vector.shape_cast %341 : vector<128xf32> to vector<1x128xf32>
    %cst_194 = arith.constant dense<0.000000e+00> : vector<128xf32>
    %343 = vector.multi_reduction <add>, %340, %cst_194 [0] : vector<4x128xf32> to vector<128xf32>
    %344 = vector.shape_cast %343 : vector<128xf32> to vector<1x128xf32>
    %345 = arith.addf %342, %344 : vector<1x128xf32>
    %c0_195 = arith.constant 0 : index
    %c0_196 = arith.constant 0 : index
    %346 = vector.load %arg13[%c0_195, %c0_196] : memref<128x32xf32, #tpu.memory_space<vmem>>, vector<128x32xf32>
    %cst_197 = arith.constant dense<0.000000e+00> : vector<1x32xf32>
    %347 = tpu.matmul %345, %346, %cst_197 {dimension_numbers = #tpu.dot_dimension_numbers<[1], [0], [0], [1], [0, 0, 1, 1], [], []>} : vector<1x128xf32>, vector<128x32xf32>, vector<1x32xf32> -> vector<1x32xf32>
    %cst_198 = arith.constant 3.125000e-02 : f32
    %348 = vector.broadcast %cst_198 : f32 to vector<1x32xf32>
    %349 = arith.mulf %347, %348 : vector<1x32xf32>
    %c0_199 = arith.constant 0 : index
    %c0_200 = arith.constant 0 : index
    %350 = vector.load %arg12[%c0_199, %c0_200] : memref<32x128xf32, #tpu.memory_space<vmem>>, vector<32x128xf32>
    %cst_201 = arith.constant dense<0.000000e+00> : vector<1x128xf32>
    %351 = tpu.matmul %349, %350, %cst_201 {dimension_numbers = #tpu.dot_dimension_numbers<[1], [0], [0], [1], [0, 0, 1, 1], [], []>} : vector<1x32xf32>, vector<32x128xf32>, vector<1x128xf32> -> vector<1x128xf32>
    %352 = vector.broadcast %351 : vector<1x128xf32> to vector<4x128xf32>
    %353 = arith.subf %336, %352 : vector<4x128xf32>
    %354 = arith.mulf %353, %353 : vector<4x128xf32>
    %cst_202 = arith.constant dense<0.000000e+00> : vector<128xf32>
    %355 = vector.multi_reduction <add>, %354, %cst_202 [0] : vector<4x128xf32> to vector<128xf32>
    %356 = vector.shape_cast %355 : vector<128xf32> to vector<1x128xf32>
    %357 = vector.broadcast %351 : vector<1x128xf32> to vector<4x128xf32>
    %358 = arith.subf %340, %357 : vector<4x128xf32>
    %359 = arith.mulf %358, %358 : vector<4x128xf32>
    %cst_203 = arith.constant dense<0.000000e+00> : vector<128xf32>
    %360 = vector.multi_reduction <add>, %359, %cst_203 [0] : vector<4x128xf32> to vector<128xf32>
    %361 = vector.shape_cast %360 : vector<128xf32> to vector<1x128xf32>
    %362 = arith.addf %356, %361 : vector<1x128xf32>
    %c0_204 = arith.constant 0 : index
    %c0_205 = arith.constant 0 : index
    %363 = vector.load %arg13[%c0_204, %c0_205] : memref<128x32xf32, #tpu.memory_space<vmem>>, vector<128x32xf32>
    %cst_206 = arith.constant dense<0.000000e+00> : vector<1x32xf32>
    %364 = tpu.matmul %362, %363, %cst_206 {dimension_numbers = #tpu.dot_dimension_numbers<[1], [0], [0], [1], [0, 0, 1, 1], [], []>} : vector<1x128xf32>, vector<128x32xf32>, vector<1x32xf32> -> vector<1x32xf32>
    %cst_207 = arith.constant 3.125000e-02 : f32
    %365 = vector.broadcast %cst_207 : f32 to vector<1x32xf32>
    %366 = arith.mulf %364, %365 : vector<1x32xf32>
    %cst_208 = arith.constant 9.99999974E-6 : f32
    %367 = vector.broadcast %cst_208 : f32 to vector<1x32xf32>
    %368 = arith.addf %366, %367 : vector<1x32xf32>
    %369 = math.rsqrt %368 : vector<1x32xf32>
    %c0_209 = arith.constant 0 : index
    %c0_210 = arith.constant 0 : index
    %370 = vector.load %arg12[%c0_209, %c0_210] : memref<32x128xf32, #tpu.memory_space<vmem>>, vector<32x128xf32>
    %cst_211 = arith.constant dense<0.000000e+00> : vector<1x128xf32>
    %371 = tpu.matmul %369, %370, %cst_211 {dimension_numbers = #tpu.dot_dimension_numbers<[1], [0], [0], [1], [0, 0, 1, 1], [], []>} : vector<1x32xf32>, vector<32x128xf32>, vector<1x128xf32> -> vector<1x128xf32>
    %372 = vector.broadcast %351 : vector<1x128xf32> to vector<4x128xf32>
    %373 = arith.subf %336, %372 : vector<4x128xf32>
    %374 = vector.broadcast %371 : vector<1x128xf32> to vector<4x128xf32>
    %375 = arith.mulf %373, %374 : vector<4x128xf32>
    %c0_212 = arith.constant 0 : index
    %c0_213 = arith.constant 0 : index
    %376 = vector.load %arg10[%c0_212, %c0_213] : memref<1x128xf32, #tpu.memory_space<vmem>>, vector<1x128xf32>
    %377 = vector.broadcast %376 : vector<1x128xf32> to vector<4x128xf32>
    %378 = arith.mulf %375, %377 : vector<4x128xf32>
    %c0_214 = arith.constant 0 : index
    %c0_215 = arith.constant 0 : index
    %379 = vector.load %arg11[%c0_214, %c0_215] : memref<1x128xf32, #tpu.memory_space<vmem>>, vector<1x128xf32>
    %380 = vector.broadcast %379 : vector<1x128xf32> to vector<4x128xf32>
    %381 = arith.addf %378, %380 : vector<4x128xf32>
    %cst_216 = arith.constant 0.000000e+00 : f32
    %382 = vector.broadcast %cst_216 : f32 to vector<4x128xf32>
    %383 = arith.cmpf oge, %381, %382 : vector<4x128xf32>
    %cst_217 = arith.constant 2.000000e-01 : f32
    %384 = vector.broadcast %cst_217 : f32 to vector<4x128xf32>
    %385 = arith.mulf %384, %381 : vector<4x128xf32>
    %386 = arith.select %383, %381, %385 : vector<4x128xi1>, vector<4x128xf32>
    %387 = vector.broadcast %351 : vector<1x128xf32> to vector<4x128xf32>
    %388 = arith.subf %340, %387 : vector<4x128xf32>
    %389 = vector.broadcast %371 : vector<1x128xf32> to vector<4x128xf32>
    %390 = arith.mulf %388, %389 : vector<4x128xf32>
    %c0_218 = arith.constant 0 : index
    %c0_219 = arith.constant 0 : index
    %391 = vector.load %arg10[%c0_218, %c0_219] : memref<1x128xf32, #tpu.memory_space<vmem>>, vector<1x128xf32>
    %392 = vector.broadcast %391 : vector<1x128xf32> to vector<4x128xf32>
    %393 = arith.mulf %390, %392 : vector<4x128xf32>
    %c0_220 = arith.constant 0 : index
    %c0_221 = arith.constant 0 : index
    %394 = vector.load %arg11[%c0_220, %c0_221] : memref<1x128xf32, #tpu.memory_space<vmem>>, vector<1x128xf32>
    %395 = vector.broadcast %394 : vector<1x128xf32> to vector<4x128xf32>
    %396 = arith.addf %393, %395 : vector<4x128xf32>
    %cst_222 = arith.constant 0.000000e+00 : f32
    %397 = vector.broadcast %cst_222 : f32 to vector<4x128xf32>
    %398 = arith.cmpf oge, %396, %397 : vector<4x128xf32>
    %cst_223 = arith.constant 2.000000e-01 : f32
    %399 = vector.broadcast %cst_223 : f32 to vector<4x128xf32>
    %400 = arith.mulf %399, %396 : vector<4x128xf32>
    %401 = arith.select %398, %396, %400 : vector<4x128xi1>, vector<4x128xf32>
    %c1_224 = arith.constant 1 : index
    %c32 = arith.constant 32 : index
    %402 = vector.load %arg24[%c1_224, %c32] : memref<12x192xf32, #tpu.memory_space<vmem>>, vector<4x128xf32>
    tpu.vector_store %arg24[%c1_224, %c32], %386 {strides = array<i32>} : memref<12x192xf32, #tpu.memory_space<vmem>>, vector<4x128xf32>,
    %c7 = arith.constant 7 : index
    %c32_225 = arith.constant 32 : index
    %403 = vector.load %arg24[%c7, %c32_225] : memref<12x192xf32, #tpu.memory_space<vmem>>, vector<4x128xf32>
    tpu.vector_store %arg24[%c7, %c32_225], %401 {strides = array<i32>} : memref<12x192xf32, #tpu.memory_space<vmem>>, vector<4x128xf32>,
    %cst_226 = arith.constant 0.000000e+00 : f32
    %404 = vector.broadcast %cst_226 : f32 to vector<3x192xf32>
    %cst_227 = arith.constant 0.000000e+00 : f32
    %405 = vector.broadcast %cst_227 : f32 to vector<3x192xf32>
    %c0_228 = arith.constant 0 : index
    %c0_229 = arith.constant 0 : index
    %c0_230 = arith.constant 0 : index
    %406 = vector.load %arg14[%c0_228, %c0_229, %c0_230] : memref<4x192x192xbf16, #tpu.memory_space<vmem>>, vector<1x192x192xbf16>
    %407 = vector.shape_cast %406 : vector<1x192x192xbf16> to vector<192x192xbf16>
    %c0_231 = arith.constant 0 : index
    %c0_232 = arith.constant 0 : index
    %408 = vector.load %arg24[%c0_231, %c0_232] : memref<12x192xf32, #tpu.memory_space<vmem>>, vector<3x192xf32>
    %409 = arith.truncf %408 : vector<3x192xf32> to vector<3x192xbf16>
    %cst_233 = arith.constant dense<0.000000e+00> : vector<3x192xf32>
    %410 = tpu.matmul %409, %407, %cst_233 {dimension_numbers = #tpu.dot_dimension_numbers<[1], [0], [0], [1], [0, 0, 1, 1], [], []>} : vector<3x192xbf16>, vector<192x192xbf16>, vector<3x192xf32> -> vector<3x192xf32>
    %411 = arith.addf %404, %410 : vector<3x192xf32>
    %c6 = arith.constant 6 : index
    %c0_234 = arith.constant 0 : index
    %412 = vector.load %arg24[%c6, %c0_234] : memref<12x192xf32, #tpu.memory_space<vmem>>, vector<3x192xf32>
    %413 = arith.truncf %412 : vector<3x192xf32> to vector<3x192xbf16>
    %cst_235 = arith.constant dense<0.000000e+00> : vector<3x192xf32>
    %414 = tpu.matmul %413, %407, %cst_235 {dimension_numbers = #tpu.dot_dimension_numbers<[1], [0], [0], [1], [0, 0, 1, 1], [], []>} : vector<3x192xbf16>, vector<192x192xbf16>, vector<3x192xf32> -> vector<3x192xf32>
    %415 = arith.addf %405, %414 : vector<3x192xf32>
    %c1_236 = arith.constant 1 : index
    %c0_237 = arith.constant 0 : index
    %c0_238 = arith.constant 0 : index
    %416 = vector.load %arg14[%c1_236, %c0_237, %c0_238] : memref<4x192x192xbf16, #tpu.memory_space<vmem>>, vector<1x192x192xbf16>
    %417 = vector.shape_cast %416 : vector<1x192x192xbf16> to vector<192x192xbf16>
    %c1_239 = arith.constant 1 : index
    %c0_240 = arith.constant 0 : index
    %418 = vector.load %arg24[%c1_239, %c0_240] : memref<12x192xf32, #tpu.memory_space<vmem>>, vector<3x192xf32>
    %419 = arith.truncf %418 : vector<3x192xf32> to vector<3x192xbf16>
    %cst_241 = arith.constant dense<0.000000e+00> : vector<3x192xf32>
    %420 = tpu.matmul %419, %417, %cst_241 {dimension_numbers = #tpu.dot_dimension_numbers<[1], [0], [0], [1], [0, 0, 1, 1], [], []>} : vector<3x192xbf16>, vector<192x192xbf16>, vector<3x192xf32> -> vector<3x192xf32>
    %421 = arith.addf %411, %420 : vector<3x192xf32>
    %c7_242 = arith.constant 7 : index
    %c0_243 = arith.constant 0 : index
    %422 = vector.load %arg24[%c7_242, %c0_243] : memref<12x192xf32, #tpu.memory_space<vmem>>, vector<3x192xf32>
    %423 = arith.truncf %422 : vector<3x192xf32> to vector<3x192xbf16>
    %cst_244 = arith.constant dense<0.000000e+00> : vector<3x192xf32>
    %424 = tpu.matmul %423, %417, %cst_244 {dimension_numbers = #tpu.dot_dimension_numbers<[1], [0], [0], [1], [0, 0, 1, 1], [], []>} : vector<3x192xbf16>, vector<192x192xbf16>, vector<3x192xf32> -> vector<3x192xf32>
    %425 = arith.addf %415, %424 : vector<3x192xf32>
    %c2_245 = arith.constant 2 : index
    %c0_246 = arith.constant 0 : index
    %c0_247 = arith.constant 0 : index
    %426 = vector.load %arg14[%c2_245, %c0_246, %c0_247] : memref<4x192x192xbf16, #tpu.memory_space<vmem>>, vector<1x192x192xbf16>
    %427 = vector.shape_cast %426 : vector<1x192x192xbf16> to vector<192x192xbf16>
    %c2_248 = arith.constant 2 : index
    %c0_249 = arith.constant 0 : index
    %428 = vector.load %arg24[%c2_248, %c0_249] : memref<12x192xf32, #tpu.memory_space<vmem>>, vector<3x192xf32>
    %429 = arith.truncf %428 : vector<3x192xf32> to vector<3x192xbf16>
    %cst_250 = arith.constant dense<0.000000e+00> : vector<3x192xf32>
    %430 = tpu.matmul %429, %427, %cst_250 {dimension_numbers = #tpu.dot_dimension_numbers<[1], [0], [0], [1], [0, 0, 1, 1], [], []>} : vector<3x192xbf16>, vector<192x192xbf16>, vector<3x192xf32> -> vector<3x192xf32>
    %431 = arith.addf %421, %430 : vector<3x192xf32>
    %c8_251 = arith.constant 8 : index
    %c0_252 = arith.constant 0 : index
    %432 = vector.load %arg24[%c8_251, %c0_252] : memref<12x192xf32, #tpu.memory_space<vmem>>, vector<3x192xf32>
    %433 = arith.truncf %432 : vector<3x192xf32> to vector<3x192xbf16>
    %cst_253 = arith.constant dense<0.000000e+00> : vector<3x192xf32>
    %434 = tpu.matmul %433, %427, %cst_253 {dimension_numbers = #tpu.dot_dimension_numbers<[1], [0], [0], [1], [0, 0, 1, 1], [], []>} : vector<3x192xbf16>, vector<192x192xbf16>, vector<3x192xf32> -> vector<3x192xf32>
    %435 = arith.addf %425, %434 : vector<3x192xf32>
    %c3_254 = arith.constant 3 : index
    %c0_255 = arith.constant 0 : index
    %c0_256 = arith.constant 0 : index
    %436 = vector.load %arg14[%c3_254, %c0_255, %c0_256] : memref<4x192x192xbf16, #tpu.memory_space<vmem>>, vector<1x192x192xbf16>
    %437 = vector.shape_cast %436 : vector<1x192x192xbf16> to vector<192x192xbf16>
    %c3_257 = arith.constant 3 : index
    %c0_258 = arith.constant 0 : index
    %438 = vector.load %arg24[%c3_257, %c0_258] : memref<12x192xf32, #tpu.memory_space<vmem>>, vector<3x192xf32>
    %439 = arith.truncf %438 : vector<3x192xf32> to vector<3x192xbf16>
    %cst_259 = arith.constant dense<0.000000e+00> : vector<3x192xf32>
    %440 = tpu.matmul %439, %437, %cst_259 {dimension_numbers = #tpu.dot_dimension_numbers<[1], [0], [0], [1], [0, 0, 1, 1], [], []>} : vector<3x192xbf16>, vector<192x192xbf16>, vector<3x192xf32> -> vector<3x192xf32>
    %441 = arith.addf %431, %440 : vector<3x192xf32>
    %c9 = arith.constant 9 : index
    %c0_260 = arith.constant 0 : index
    %442 = vector.load %arg24[%c9, %c0_260] : memref<12x192xf32, #tpu.memory_space<vmem>>, vector<3x192xf32>
    %443 = arith.truncf %442 : vector<3x192xf32> to vector<3x192xbf16>
    %cst_261 = arith.constant dense<0.000000e+00> : vector<3x192xf32>
    %444 = tpu.matmul %443, %437, %cst_261 {dimension_numbers = #tpu.dot_dimension_numbers<[1], [0], [0], [1], [0, 0, 1, 1], [], []>} : vector<3x192xbf16>, vector<192x192xbf16>, vector<3x192xf32> -> vector<3x192xf32>
    %445 = arith.addf %435, %444 : vector<3x192xf32>
    %cst_262 = arith.constant dense<0.000000e+00> : vector<192xf32>
    %446 = vector.multi_reduction <add>, %441, %cst_262 [0] : vector<3x192xf32> to vector<192xf32>
    %447 = vector.shape_cast %446 : vector<192xf32> to vector<1x192xf32>
    %cst_263 = arith.constant dense<0.000000e+00> : vector<192xf32>
    %448 = vector.multi_reduction <add>, %445, %cst_263 [0] : vector<3x192xf32> to vector<192xf32>
    %449 = vector.shape_cast %448 : vector<192xf32> to vector<1x192xf32>
    %450 = arith.addf %447, %449 : vector<1x192xf32>
    %c0_264 = arith.constant 0 : index
    %c0_265 = arith.constant 0 : index
    %451 = vector.load %arg18[%c0_264, %c0_265] : memref<192x64xf32, #tpu.memory_space<vmem>>, vector<192x64xf32>
    %cst_266 = arith.constant dense<0.000000e+00> : vector<1x64xf32>
    %452 = tpu.matmul %450, %451, %cst_266 {dimension_numbers = #tpu.dot_dimension_numbers<[1], [0], [0], [1], [0, 0, 1, 1], [], []>} : vector<1x192xf32>, vector<192x64xf32>, vector<1x64xf32> -> vector<1x64xf32>
    %cst_267 = arith.constant 0.055555556 : f32
    %453 = vector.broadcast %cst_267 : f32 to vector<1x64xf32>
    %454 = arith.mulf %452, %453 : vector<1x64xf32>
    %c0_268 = arith.constant 0 : index
    %c0_269 = arith.constant 0 : index
    %455 = vector.load %arg17[%c0_268, %c0_269] : memref<64x192xf32, #tpu.memory_space<vmem>>, vector<64x192xf32>
    %cst_270 = arith.constant dense<0.000000e+00> : vector<1x192xf32>
    %456 = tpu.matmul %454, %455, %cst_270 {dimension_numbers = #tpu.dot_dimension_numbers<[1], [0], [0], [1], [0, 0, 1, 1], [], []>} : vector<1x64xf32>, vector<64x192xf32>, vector<1x192xf32> -> vector<1x192xf32>
    %457 = vector.broadcast %456 : vector<1x192xf32> to vector<3x192xf32>
    %458 = arith.subf %441, %457 : vector<3x192xf32>
    %459 = arith.mulf %458, %458 : vector<3x192xf32>
    %cst_271 = arith.constant dense<0.000000e+00> : vector<192xf32>
    %460 = vector.multi_reduction <add>, %459, %cst_271 [0] : vector<3x192xf32> to vector<192xf32>
    %461 = vector.shape_cast %460 : vector<192xf32> to vector<1x192xf32>
    %462 = vector.broadcast %456 : vector<1x192xf32> to vector<3x192xf32>
    %463 = arith.subf %445, %462 : vector<3x192xf32>
    %464 = arith.mulf %463, %463 : vector<3x192xf32>
    %cst_272 = arith.constant dense<0.000000e+00> : vector<192xf32>
    %465 = vector.multi_reduction <add>, %464, %cst_272 [0] : vector<3x192xf32> to vector<192xf32>
    %466 = vector.shape_cast %465 : vector<192xf32> to vector<1x192xf32>
    %467 = arith.addf %461, %466 : vector<1x192xf32>
    %c0_273 = arith.constant 0 : index
    %c0_274 = arith.constant 0 : index
    %468 = vector.load %arg18[%c0_273, %c0_274] : memref<192x64xf32, #tpu.memory_space<vmem>>, vector<192x64xf32>
    %cst_275 = arith.constant dense<0.000000e+00> : vector<1x64xf32>
    %469 = tpu.matmul %467, %468, %cst_275 {dimension_numbers = #tpu.dot_dimension_numbers<[1], [0], [0], [1], [0, 0, 1, 1], [], []>} : vector<1x192xf32>, vector<192x64xf32>, vector<1x64xf32> -> vector<1x64xf32>
    %cst_276 = arith.constant 0.055555556 : f32
    %470 = vector.broadcast %cst_276 : f32 to vector<1x64xf32>
    %471 = arith.mulf %469, %470 : vector<1x64xf32>
    %cst_277 = arith.constant 9.99999974E-6 : f32
    %472 = vector.broadcast %cst_277 : f32 to vector<1x64xf32>
    %473 = arith.addf %471, %472 : vector<1x64xf32>
    %474 = math.rsqrt %473 : vector<1x64xf32>
    %c0_278 = arith.constant 0 : index
    %c0_279 = arith.constant 0 : index
    %475 = vector.load %arg17[%c0_278, %c0_279] : memref<64x192xf32, #tpu.memory_space<vmem>>, vector<64x192xf32>
    %cst_280 = arith.constant dense<0.000000e+00> : vector<1x192xf32>
    %476 = tpu.matmul %474, %475, %cst_280 {dimension_numbers = #tpu.dot_dimension_numbers<[1], [0], [0], [1], [0, 0, 1, 1], [], []>} : vector<1x64xf32>, vector<64x192xf32>, vector<1x192xf32> -> vector<1x192xf32>
    %477 = vector.broadcast %456 : vector<1x192xf32> to vector<3x192xf32>
    %478 = arith.subf %441, %477 : vector<3x192xf32>
    %479 = vector.broadcast %476 : vector<1x192xf32> to vector<3x192xf32>
    %480 = arith.mulf %478, %479 : vector<3x192xf32>
    %c0_281 = arith.constant 0 : index
    %c0_282 = arith.constant 0 : index
    %481 = vector.load %arg15[%c0_281, %c0_282] : memref<1x192xf32, #tpu.memory_space<vmem>>, vector<1x192xf32>
    %482 = vector.broadcast %481 : vector<1x192xf32> to vector<3x192xf32>
    %483 = arith.mulf %480, %482 : vector<3x192xf32>
    %c0_283 = arith.constant 0 : index
    %c0_284 = arith.constant 0 : index
    %484 = vector.load %arg16[%c0_283, %c0_284] : memref<1x192xf32, #tpu.memory_space<vmem>>, vector<1x192xf32>
    %485 = vector.broadcast %484 : vector<1x192xf32> to vector<3x192xf32>
    %486 = arith.addf %483, %485 : vector<3x192xf32>
    %cst_285 = arith.constant 0.000000e+00 : f32
    %487 = vector.broadcast %cst_285 : f32 to vector<3x192xf32>
    %488 = arith.cmpf oge, %486, %487 : vector<3x192xf32>
    %cst_286 = arith.constant 2.000000e-01 : f32
    %489 = vector.broadcast %cst_286 : f32 to vector<3x192xf32>
    %490 = arith.mulf %489, %486 : vector<3x192xf32>
    %491 = arith.select %488, %486, %490 : vector<3x192xi1>, vector<3x192xf32>
    %492 = vector.broadcast %456 : vector<1x192xf32> to vector<3x192xf32>
    %493 = arith.subf %445, %492 : vector<3x192xf32>
    %494 = vector.broadcast %476 : vector<1x192xf32> to vector<3x192xf32>
    %495 = arith.mulf %493, %494 : vector<3x192xf32>
    %c0_287 = arith.constant 0 : index
    %c0_288 = arith.constant 0 : index
    %496 = vector.load %arg15[%c0_287, %c0_288] : memref<1x192xf32, #tpu.memory_space<vmem>>, vector<1x192xf32>
    %497 = vector.broadcast %496 : vector<1x192xf32> to vector<3x192xf32>
    %498 = arith.mulf %495, %497 : vector<3x192xf32>
    %c0_289 = arith.constant 0 : index
    %c0_290 = arith.constant 0 : index
    %499 = vector.load %arg16[%c0_289, %c0_290] : memref<1x192xf32, #tpu.memory_space<vmem>>, vector<1x192xf32>
    %500 = vector.broadcast %499 : vector<1x192xf32> to vector<3x192xf32>
    %501 = arith.addf %498, %500 : vector<3x192xf32>
    %cst_291 = arith.constant 0.000000e+00 : f32
    %502 = vector.broadcast %cst_291 : f32 to vector<3x192xf32>
    %503 = arith.cmpf oge, %501, %502 : vector<3x192xf32>
    %cst_292 = arith.constant 2.000000e-01 : f32
    %504 = vector.broadcast %cst_292 : f32 to vector<3x192xf32>
    %505 = arith.mulf %504, %501 : vector<3x192xf32>
    %506 = arith.select %503, %501, %505 : vector<3x192xi1>, vector<3x192xf32>
    %c1_293 = arith.constant 1 : index
    %c64 = arith.constant 64 : index
    %507 = vector.load %arg25[%c1_293, %c64] : memref<10x320xf32, #tpu.memory_space<vmem>>, vector<3x192xf32>
    tpu.vector_store %arg25[%c1_293, %c64], %491 {strides = array<i32>} : memref<10x320xf32, #tpu.memory_space<vmem>>, vector<3x192xf32>,
    %c6_294 = arith.constant 6 : index
    %c64_295 = arith.constant 64 : index
    %508 = vector.load %arg25[%c6_294, %c64_295] : memref<10x320xf32, #tpu.memory_space<vmem>>, vector<3x192xf32>
    tpu.vector_store %arg25[%c6_294, %c64_295], %506 {strides = array<i32>} : memref<10x320xf32, #tpu.memory_space<vmem>>, vector<3x192xf32>,
    %cst_296 = arith.constant 0.000000e+00 : f32
    %509 = vector.broadcast %cst_296 : f32 to vector<2x2xf32>
    %cst_297 = arith.constant 0.000000e+00 : f32
    %510 = vector.broadcast %cst_297 : f32 to vector<2x2xf32>
    %c0_298 = arith.constant 0 : index
    %c0_299 = arith.constant 0 : index
    %c0_300 = arith.constant 0 : index
    %511 = vector.load %arg19[%c0_298, %c0_299, %c0_300] : memref<4x320x2xbf16, #tpu.memory_space<vmem>>, vector<1x320x2xbf16>
    %512 = vector.shape_cast %511 : vector<1x320x2xbf16> to vector<320x2xbf16>
    %c0_301 = arith.constant 0 : index
    %c0_302 = arith.constant 0 : index
    %513 = vector.load %arg25[%c0_301, %c0_302] : memref<10x320xf32, #tpu.memory_space<vmem>>, vector<2x320xf32>
    %514 = arith.truncf %513 : vector<2x320xf32> to vector<2x320xbf16>
    %cst_303 = arith.constant dense<0.000000e+00> : vector<2x2xf32>
    %515 = tpu.matmul %514, %512, %cst_303 {dimension_numbers = #tpu.dot_dimension_numbers<[1], [0], [0], [1], [0, 0, 1, 1], [], []>} : vector<2x320xbf16>, vector<320x2xbf16>, vector<2x2xf32> -> vector<2x2xf32>
    %516 = arith.addf %509, %515 : vector<2x2xf32>
    %c5 = arith.constant 5 : index
    %c0_304 = arith.constant 0 : index
    %517 = vector.load %arg25[%c5, %c0_304] : memref<10x320xf32, #tpu.memory_space<vmem>>, vector<2x320xf32>
    %518 = arith.truncf %517 : vector<2x320xf32> to vector<2x320xbf16>
    %cst_305 = arith.constant dense<0.000000e+00> : vector<2x2xf32>
    %519 = tpu.matmul %518, %512, %cst_305 {dimension_numbers = #tpu.dot_dimension_numbers<[1], [0], [0], [1], [0, 0, 1, 1], [], []>} : vector<2x320xbf16>, vector<320x2xbf16>, vector<2x2xf32> -> vector<2x2xf32>
    %520 = arith.addf %510, %519 : vector<2x2xf32>
    %c1_306 = arith.constant 1 : index
    %c0_307 = arith.constant 0 : index
    %c0_308 = arith.constant 0 : index
    %521 = vector.load %arg19[%c1_306, %c0_307, %c0_308] : memref<4x320x2xbf16, #tpu.memory_space<vmem>>, vector<1x320x2xbf16>
    %522 = vector.shape_cast %521 : vector<1x320x2xbf16> to vector<320x2xbf16>
    %c1_309 = arith.constant 1 : index
    %c0_310 = arith.constant 0 : index
    %523 = vector.load %arg25[%c1_309, %c0_310] : memref<10x320xf32, #tpu.memory_space<vmem>>, vector<2x320xf32>
    %524 = arith.truncf %523 : vector<2x320xf32> to vector<2x320xbf16>
    %cst_311 = arith.constant dense<0.000000e+00> : vector<2x2xf32>
    %525 = tpu.matmul %524, %522, %cst_311 {dimension_numbers = #tpu.dot_dimension_numbers<[1], [0], [0], [1], [0, 0, 1, 1], [], []>} : vector<2x320xbf16>, vector<320x2xbf16>, vector<2x2xf32> -> vector<2x2xf32>
    %526 = arith.addf %516, %525 : vector<2x2xf32>
    %c6_312 = arith.constant 6 : index
    %c0_313 = arith.constant 0 : index
    %527 = vector.load %arg25[%c6_312, %c0_313] : memref<10x320xf32, #tpu.memory_space<vmem>>, vector<2x320xf32>
    %528 = arith.truncf %527 : vector<2x320xf32> to vector<2x320xbf16>
    %cst_314 = arith.constant dense<0.000000e+00> : vector<2x2xf32>
    %529 = tpu.matmul %528, %522, %cst_314 {dimension_numbers = #tpu.dot_dimension_numbers<[1], [0], [0], [1], [0, 0, 1, 1], [], []>} : vector<2x320xbf16>, vector<320x2xbf16>, vector<2x2xf32> -> vector<2x2xf32>
    %530 = arith.addf %520, %529 : vector<2x2xf32>
    %c2_315 = arith.constant 2 : index
    %c0_316 = arith.constant 0 : index
    %c0_317 = arith.constant 0 : index
    %531 = vector.load %arg19[%c2_315, %c0_316, %c0_317] : memref<4x320x2xbf16, #tpu.memory_space<vmem>>, vector<1x320x2xbf16>
    %532 = vector.shape_cast %531 : vector<1x320x2xbf16> to vector<320x2xbf16>
    %c2_318 = arith.constant 2 : index
    %c0_319 = arith.constant 0 : index
    %533 = vector.load %arg25[%c2_318, %c0_319] : memref<10x320xf32, #tpu.memory_space<vmem>>, vector<2x320xf32>
    %534 = arith.truncf %533 : vector<2x320xf32> to vector<2x320xbf16>
    %cst_320 = arith.constant dense<0.000000e+00> : vector<2x2xf32>
    %535 = tpu.matmul %534, %532, %cst_320 {dimension_numbers = #tpu.dot_dimension_numbers<[1], [0], [0], [1], [0, 0, 1, 1], [], []>} : vector<2x320xbf16>, vector<320x2xbf16>, vector<2x2xf32> -> vector<2x2xf32>
    %536 = arith.addf %526, %535 : vector<2x2xf32>
    %c7_321 = arith.constant 7 : index
    %c0_322 = arith.constant 0 : index
    %537 = vector.load %arg25[%c7_321, %c0_322] : memref<10x320xf32, #tpu.memory_space<vmem>>, vector<2x320xf32>
    %538 = arith.truncf %537 : vector<2x320xf32> to vector<2x320xbf16>
    %cst_323 = arith.constant dense<0.000000e+00> : vector<2x2xf32>
    %539 = tpu.matmul %538, %532, %cst_323 {dimension_numbers = #tpu.dot_dimension_numbers<[1], [0], [0], [1], [0, 0, 1, 1], [], []>} : vector<2x320xbf16>, vector<320x2xbf16>, vector<2x2xf32> -> vector<2x2xf32>
    %540 = arith.addf %530, %539 : vector<2x2xf32>
    %c3_324 = arith.constant 3 : index
    %c0_325 = arith.constant 0 : index
    %c0_326 = arith.constant 0 : index
    %541 = vector.load %arg19[%c3_324, %c0_325, %c0_326] : memref<4x320x2xbf16, #tpu.memory_space<vmem>>, vector<1x320x2xbf16>
    %542 = vector.shape_cast %541 : vector<1x320x2xbf16> to vector<320x2xbf16>
    %c3_327 = arith.constant 3 : index
    %c0_328 = arith.constant 0 : index
    %543 = vector.load %arg25[%c3_327, %c0_328] : memref<10x320xf32, #tpu.memory_space<vmem>>, vector<2x320xf32>
    %544 = arith.truncf %543 : vector<2x320xf32> to vector<2x320xbf16>
    %cst_329 = arith.constant dense<0.000000e+00> : vector<2x2xf32>
    %545 = tpu.matmul %544, %542, %cst_329 {dimension_numbers = #tpu.dot_dimension_numbers<[1], [0], [0], [1], [0, 0, 1, 1], [], []>} : vector<2x320xbf16>, vector<320x2xbf16>, vector<2x2xf32> -> vector<2x2xf32>
    %546 = arith.addf %536, %545 : vector<2x2xf32>
    %c8_330 = arith.constant 8 : index
    %c0_331 = arith.constant 0 : index
    %547 = vector.load %arg25[%c8_330, %c0_331] : memref<10x320xf32, #tpu.memory_space<vmem>>, vector<2x320xf32>
    %548 = arith.truncf %547 : vector<2x320xf32> to vector<2x320xbf16>
    %cst_332 = arith.constant dense<0.000000e+00> : vector<2x2xf32>
    %549 = tpu.matmul %548, %542, %cst_332 {dimension_numbers = #tpu.dot_dimension_numbers<[1], [0], [0], [1], [0, 0, 1, 1], [], []>} : vector<2x320xbf16>, vector<320x2xbf16>, vector<2x2xf32> -> vector<2x2xf32>
    %550 = arith.addf %540, %549 : vector<2x2xf32>
    %c0_333 = arith.constant 0 : index
    %c0_334 = arith.constant 0 : index
    %551 = vector.load %arg20[%c0_333, %c0_334] : memref<1x2xf32, #tpu.memory_space<vmem>>, vector<1x2xf32>
    %552 = vector.broadcast %551 : vector<1x2xf32> to vector<2x2xf32>
    %553 = arith.addf %546, %552 : vector<2x2xf32>
    %cst_335 = arith.constant 0.000000e+00 : f32
    %554 = vector.broadcast %cst_335 : f32 to vector<2x2xf32>
    %555 = arith.subf %554, %553 : vector<2x2xf32>
    %556 = math.exp %555 : vector<2x2xf32>
    %cst_336 = arith.constant 1.000000e+00 : f32
    %557 = vector.broadcast %cst_336 : f32 to vector<2x2xf32>
    %558 = arith.addf %557, %556 : vector<2x2xf32>
    %cst_337 = arith.constant 1.000000e+00 : f32
    %559 = vector.broadcast %cst_337 : f32 to vector<2x2xf32>
    %560 = arith.divf %559, %558 : vector<2x2xf32>
    %c0_338 = arith.constant 0 : index
    %c0_339 = arith.constant 0 : index
    %561 = vector.load %arg20[%c0_338, %c0_339] : memref<1x2xf32, #tpu.memory_space<vmem>>, vector<1x2xf32>
    %562 = vector.broadcast %561 : vector<1x2xf32> to vector<2x2xf32>
    %563 = arith.addf %550, %562 : vector<2x2xf32>
    %cst_340 = arith.constant 0.000000e+00 : f32
    %564 = vector.broadcast %cst_340 : f32 to vector<2x2xf32>
    %565 = arith.subf %564, %563 : vector<2x2xf32>
    %566 = math.exp %565 : vector<2x2xf32>
    %cst_341 = arith.constant 1.000000e+00 : f32
    %567 = vector.broadcast %cst_341 : f32 to vector<2x2xf32>
    %568 = arith.addf %567, %566 : vector<2x2xf32>
    %cst_342 = arith.constant 1.000000e+00 : f32
    %569 = vector.broadcast %cst_342 : f32 to vector<2x2xf32>
    %570 = arith.divf %569, %568 : vector<2x2xf32>
    %c0_343 = arith.constant 0 : index
    %c0_344 = arith.constant 0 : index
    %571 = vector.load %arg21[%c0_343, %c0_344] : memref<4x2xf32, #tpu.memory_space<vmem>>, vector<2x2xf32>
    tpu.vector_store %arg21[%c0_343, %c0_344], %560 {strides = array<i32>} : memref<4x2xf32, #tpu.memory_space<vmem>>, vector<2x2xf32>,
    %c2_345 = arith.constant 2 : index
    %c0_346 = arith.constant 0 : index
    %572 = vector.load %arg21[%c2_345, %c0_346] : memref<4x2xf32, #tpu.memory_space<vmem>>, vector<2x2xf32>
    tpu.vector_store %arg21[%c2_345, %c0_346], %570 {strides = array<i32>} : memref<4x2xf32, #tpu.memory_space<vmem>>, vector<2x2xf32>,
    return
  }
  func.func @transform_0(%arg0: i32) -> (i32, i32) {
    %c0_i32 = arith.constant 0 : i32
    %c0_i32_0 = arith.constant 0 : i32
    %c0_i32_1 = arith.constant 0 : i32
    return %c0_i32, %c0_i32_0 : i32, i32
  }
  func.func @transform_1(%arg0: i32) -> (i32, i32, i32) {
    %c0_i32 = arith.constant 0 : i32
    %c0_i32_0 = arith.constant 0 : i32
    %c0_i32_1 = arith.constant 0 : i32
    %c0_i32_2 = arith.constant 0 : i32
    return %c0_i32, %c0_i32_0, %c0_i32_1 : i32, i32, i32
  }
  func.func @transform_2(%arg0: i32) -> (i32, i32) {
    %c0_i32 = arith.constant 0 : i32
    %c0_i32_0 = arith.constant 0 : i32
    %c0_i32_1 = arith.constant 0 : i32
    return %c0_i32, %c0_i32_0 : i32, i32
  }
  func.func @transform_3(%arg0: i32) -> (i32, i32, i32) {
    %c0_i32 = arith.constant 0 : i32
    %c0_i32_0 = arith.constant 0 : i32
    %c0_i32_1 = arith.constant 0 : i32
    %c0_i32_2 = arith.constant 0 : i32
    return %c0_i32, %c0_i32_0, %c0_i32_1 : i32, i32, i32
  }
  func.func @transform_4(%arg0: i32) -> (i32, i32) {
    %c0_i32 = arith.constant 0 : i32
    %c0_i32_0 = arith.constant 0 : i32
    %c0_i32_1 = arith.constant 0 : i32
    return %c0_i32, %c0_i32_0 : i32, i32
  }
  func.func @transform_5(%arg0: i32) -> (i32, i32) {
    %c0_i32 = arith.constant 0 : i32
    %c0_i32_0 = arith.constant 0 : i32
    %c0_i32_1 = arith.constant 0 : i32
    return %c0_i32, %c0_i32_0 : i32, i32
  }
  func.func @transform_6(%arg0: i32) -> (i32, i32) {
    %c0_i32 = arith.constant 0 : i32
    %c0_i32_0 = arith.constant 0 : i32
    %c0_i32_1 = arith.constant 0 : i32
    return %c0_i32, %c0_i32_0 : i32, i32
  }
  func.func @transform_7(%arg0: i32) -> (i32, i32) {
    %c0_i32 = arith.constant 0 : i32
    %c0_i32_0 = arith.constant 0 : i32
    %c0_i32_1 = arith.constant 0 : i32
    return %c0_i32, %c0_i32_0 : i32, i32
  }
  func.func @transform_8(%arg0: i32) -> (i32, i32, i32) {
    %c0_i32 = arith.constant 0 : i32
    %c0_i32_0 = arith.constant 0 : i32
    %c0_i32_1 = arith.constant 0 : i32
    %c0_i32_2 = arith.constant 0 : i32
    return %c0_i32, %c0_i32_0, %c0_i32_1 : i32, i32, i32
  }
  func.func @transform_9(%arg0: i32) -> (i32, i32) {
    %c0_i32 = arith.constant 0 : i32
    %c0_i32_0 = arith.constant 0 : i32
    %c0_i32_1 = arith.constant 0 : i32
    return %c0_i32, %c0_i32_0 : i32, i32
  }
  func.func @transform_10(%arg0: i32) -> (i32, i32) {
    %c0_i32 = arith.constant 0 : i32
    %c0_i32_0 = arith.constant 0 : i32
    %c0_i32_1 = arith.constant 0 : i32
    return %c0_i32, %c0_i32_0 : i32, i32
  }
  func.func @transform_11(%arg0: i32) -> (i32, i32) {
    %c0_i32 = arith.constant 0 : i32
    %c0_i32_0 = arith.constant 0 : i32
    %c0_i32_1 = arith.constant 0 : i32
    return %c0_i32, %c0_i32_0 : i32, i32
  }
  func.func @transform_12(%arg0: i32) -> (i32, i32) {
    %c0_i32 = arith.constant 0 : i32
    %c0_i32_0 = arith.constant 0 : i32
    %c0_i32_1 = arith.constant 0 : i32
    return %c0_i32, %c0_i32_0 : i32, i32
  }
  func.func @transform_13(%arg0: i32) -> (i32, i32, i32) {
    %c0_i32 = arith.constant 0 : i32
    %c0_i32_0 = arith.constant 0 : i32
    %c0_i32_1 = arith.constant 0 : i32
    %c0_i32_2 = arith.constant 0 : i32
    return %c0_i32, %c0_i32_0, %c0_i32_1 : i32, i32, i32
  }
  func.func @transform_14(%arg0: i32) -> (i32, i32) {
    %c0_i32 = arith.constant 0 : i32
    %c0_i32_0 = arith.constant 0 : i32
    %c0_i32_1 = arith.constant 0 : i32
    return %c0_i32, %c0_i32_0 : i32, i32
  }
  func.func @transform_15(%arg0: i32) -> (i32, i32) {
    %c0_i32 = arith.constant 0 : i32
    %c0_i32_0 = arith.constant 0 : i32
    %c0_i32_1 = arith.constant 0 : i32
    return %c0_i32, %c0_i32_0 : i32, i32
  }
  func.func @transform_16(%arg0: i32) -> (i32, i32) {
    %c0_i32 = arith.constant 0 : i32
    %c0_i32_0 = arith.constant 0 : i32
    %c0_i32_1 = arith.constant 0 : i32
    return %c0_i32, %c0_i32_0 : i32, i32
  }
  func.func @transform_17(%arg0: i32) -> (i32, i32) {
    %c0_i32 = arith.constant 0 : i32
    %c0_i32_0 = arith.constant 0 : i32
    %c0_i32_1 = arith.constant 0 : i32
    return %c0_i32, %c0_i32_0 : i32, i32
  }
  func.func @transform_18(%arg0: i32) -> (i32, i32, i32) {
    %c0_i32 = arith.constant 0 : i32
    %c0_i32_0 = arith.constant 0 : i32
    %c0_i32_1 = arith.constant 0 : i32
    %c0_i32_2 = arith.constant 0 : i32
    return %c0_i32, %c0_i32_0, %c0_i32_1 : i32, i32, i32
  }
  func.func @transform_19(%arg0: i32) -> (i32, i32) {
    %c0_i32 = arith.constant 0 : i32
    %c0_i32_0 = arith.constant 0 : i32
    %c0_i32_1 = arith.constant 0 : i32
    return %c0_i32, %c0_i32_0 : i32, i32
  }
  func.func @transform_20(%arg0: i32) -> (i32, i32) {
    %c0_i32 = arith.constant 0 : i32
    %c0_i32_0 = arith.constant 0 : i32
    %c0_i32_1 = arith.constant 0 : i32
    return %c0_i32, %c0_i32_0 : i32, i32
  }
}

</mosaic_0001>

<bundles_post_ra>
// kernel: discriminator_forward.1
= control target key start
LH: loop header
LB: loop body
LE: loop exit
PB: predicated region body
PF: predicated region fallthrough
CT: control target
= control target key end

     0   :  { %s11840_s0 = inlined_call_operand.vmem [shape: f32[68,102], index: 0, kind: input, shape index: {}]   ;;  %s11841_s1 = inlined_call_operand.vmem [shape: bf16[4,102,128], index: 1, kind: input, shape index: {}]   ;;  %s11842_s2 = inlined_call_operand.vmem [shape: f32[1,128], index: 2, kind: input, shape index: {}]   ;;  %s11843_s3 = inlined_call_operand.vmem [shape: bf16[4,144,128], index: 3, kind: input, shape index: {}]   ;;  %s11844_s4 = inlined_call_operand.vmem [shape: f32[1,128], index: 4, kind: input, shape index: {}]   ;;  %s11845_s5 = inlined_call_operand.vmem [shape: f32[1,128], index: 5, kind: input, shape index: {}]   ;;  %s11846_s6 = inlined_call_operand.vmem [shape: f32[16,128], index: 6, kind: input, shape index: {}]   ;;  %s11847_s7 = inlined_call_operand.vmem [shape: f32[128,16], index: 7, kind: input, shape index: {}]   ;;  %s11848_s8 = inlined_call_operand.vmem [shape: bf16[4,160,128], index: 8, kind: input, shape index: {}]   ;;  %s11849_s9 = inlined_call_operand.vmem [shape: f32[1,128], index: 9, kind: input, shape index: {}]   ;;  %s11850_s10 = inlined_call_operand.vmem [shape: f32[1,128], index: 10, kind: input, shape index: {}]   ;;  %s11851_s11 = inlined_call_operand.vmem [shape: f32[32,128], index: 11, kind: input, shape index: {}]   ;;  %s11852_s12 = inlined_call_operand.vmem [shape: f32[128,32], index: 12, kind: input, shape index: {}]   ;;  %s11853_s13 = inlined_call_operand.vmem [shape: bf16[4,192,192], index: 13, kind: input, shape index: {}]   ;;  %s11854_s14 = inlined_call_operand.vmem [shape: f32[1,192], index: 14, kind: input, shape index: {}]   ;;  %s11855_s15 = inlined_call_operand.vmem [shape: f32[1,192], index: 15, kind: input, shape index: {}]   ;;  %s11856_s16 = inlined_call_operand.vmem [shape: f32[64,192], index: 16, kind: input, shape index: {}]   ;;  %s11857_s17 = inlined_call_operand.vmem [shape: f32[192,64], index: 17, kind: input, shape index: {}]   ;;  %s11858_s18 = inlined_call_operand.vmem [shape: bf16[4,320,2], index: 18, kind: input, shape index: {}]   ;;  %s11859_s19 = inlined_call_operand.vmem [shape: f32[1,2], index: 19, kind: input, shape index: {}]   ;;  %s11860_s20 = inlined_call_operand.hbm [shape: f32[4,2], index: 20, kind: output, shape index: {}]  }
   0x1   :  { %11864 = sst [smem:[#allocation9_spill]] %s11840_s0 }
   0x2   :  { %11865 = sst [smem:[#allocation10_spill]] %s11841_s1 }
   0x3   :  { %11866 = sst [smem:[#allocation11_spill]] %s11842_s2 }
   0x4   :  { %11867 = sst [smem:[#allocation12_spill]] %s11843_s3 }
   0x5   :  { %11868 = sst [smem:[#allocation13_spill]] %s11844_s4 }
   0x6   :  { %s11869_s23 = sld [smem:[#allocation9_spill]]  ;;  %v116_v3 = vlaneseq  ;;  %v9409_v4 = vmov 0.0   ;;  %vm9410_vm0 = vmmov 0   ;;  %vm166_vm1 = vcmask 1040384   ;;  %s11870_s27 = sld [smem:[#allocation10_spill]] }
   0x7   :  { %8243 = vmatprep.subr.bf16.mxu0 %v9409_v4  ;;  %67 = vst [vmem:[#allocation2] sm:$0xff] %v9409_v4  ;;  %70 = vst [vmem:[#allocation2 + $0x10] sm:$0xff] %v9409_v4  ;;  %8249 = vmatprep.mubr.msk.bf16.mxu0 %vm9410_vm0, %v9409_v4  ;;  %vm162_vm6 = vcmask 277504   ;;  %vm359_vm7 = vcmask 1042432  }
   0x8   :  { %72 = vst [vmem:[#allocation2 + $0x20] sm:$0xff] %v9409_v4  ;;  %74 = vst [vmem:[#allocation2 + $0x30] sm:$0xff] %v9409_v4  ;;  %v9560_v9 = vshrl.u32 %v116_v3, 7  ;;  %v9562_v10 = vand.u32 127, %v116_v3  ;;  %8253 = vmatprep.subr.bf16.mxu1 %v9409_v4  ;;  %8259 = vmatprep.mubr.msk.bf16.mxu1 %vm9410_vm0, %v9409_v4 }
   0x9   :  { %76 = vst [vmem:[#allocation2 + $0x40] sm:$0xf] %v9409_v4  ;;  %79 = vst [vmem:[#allocation3] sm:$0xff] %v9409_v4 }
   0xa   :  { %82 = vst [vmem:[#allocation3 + $0x10] sm:$0xff] %v9409_v4  ;;  %84 = vst [vmem:[#allocation3 + $0x20] sm:$0xf] %v9409_v4  ;;  %v118_v17 = vadd.s32 8, %v9560_v9  ;;  %v9584_v18 = vmul.u32 2, %v9560_v9 }
   0xb   :  { %87 = vst [vmem:[#allocation4] sm:$0xff] %v9409_v4  ;;  %90 = vst [vmem:[#allocation4 + $0x10] sm:$0xf] %v9409_v4 }
   0xc   :  { %v100_v0 = vld [vmem:[%s11869_s23] sm:$0xff]  ;;  %v101_v1 = vld [vmem:[%s11869_s23 + $0x8] sm:$0xff]  ;;  %v102_v2 = vld [vmem:[%s11869_s23 + $0x10] sm:$0xff]  ;;  %93 = vst [vmem:[#allocation5] sm:$0xff] %v9409_v4  ;;  %v9592_v21 = vmul.u32 2, %v118_v17  ;;  %vm123_vm2 = vcmp.eq.s32.totalorder %v9562_v10, %v9584_v18  ;;  %v128_v22 = vadd.s32 1, %v9584_v18 }
   0xd   :  { %94 = vst [vmem:[#allocation5 + $0x8] sm:$0xff] %v9409_v4  ;;  %96 = vst [vmem:[#allocation5 + $0x18] sm:$0x3] %v9409_v4  ;;  %v9547_v5 = vpack.c.bf16 %v101_v1, %v100_v0  ;;  %v103_v6 = vld [vmem:[%s11869_s23 + $0x18] sm:$0xff]  ;;  %v104_v7 = vld [vmem:[%s11869_s23 + $0x20] sm:$0x3] }
   0xe   :  { %97 = vst [vmem:[#allocation5 + $0x20] sm:$0x3] %v9409_v4  ;;  %v108_v8 = vld [vmem:[%s11869_s23 + $0x22] sm:$0xff]  ;;  %v109_v11 = vld [vmem:[%s11869_s23 + $0x2a] sm:$0xff]  ;;  %v110_v12 = vld [vmem:[%s11869_s23 + $0x32] sm:$0xff]  ;;  %v9577_v14 = vpack.c.bf16 %v103_v6, %v102_v2  ;;  %v107_v16 = vpack.c.bf16 %v104_v7, %v104_v7  ;;  %v9600_v24 = vsel %vm123_vm2, 1.0, %v9409_v4  ;;  %vm124_vm3 = vcmp.eq.s32.totalorder %v9562_v10, %v9592_v21 }
   0xf   :  { %v111_v13 = vld [vmem:[%s11869_s23 + $0x3a] sm:$0xff]  ;;  %8244 = vmatpush3.bf16.msra.mxu0 %v9547_v5  ;;  %v9579_v15 = vpack.c.bf16 %v109_v11, %v108_v8  ;;  %v112_v19 = vld [vmem:[%s11869_s23 + $0x42] sm:$0x3]  ;;  %v129_v26 = vadd.s32 1, %v9592_v21  ;;  %v126_v27 = vsel %vm124_vm3, 1.0, %v9409_v4  ;;  %vm130_vm4 = vcmp.eq.s32.totalorder %v9562_v10, %v128_v22  ;;  %v9647_v34 = vld [vmem:[%s11870_s27 + $0x44] sm:$0xff]  }
  0x10   :  { %8245 = vmatprep.subr.bf16.mxu0 %v9409_v4  ;;  %v9590_v20 = vpack.c.bf16 %v111_v13, %v110_v12  ;;  %v115_v23 = vpack.c.bf16 %v112_v19, %v112_v19  ;;  %v9604_v25 = vsel %vm166_vm1, %v107_v16, 0  ;;  %v127_v28 = vpack.c.bf16 %v126_v27, %v9600_v24  ;;  %v9041_v30 = vld [vmem:[%s11870_s27 + $0x34] sm:$0xff]   ;;  %v9636_v33 = vld [vmem:[%s11870_s27 + $0x3c] sm:$0xff]   ;;  %v9665_v37 = vld [vmem:[%s11870_s27 + $0x8] sm:$0xff]  }
  0x11   :  { %8254 = vmatpush3.bf16.msra.mxu1 %v9579_v15  ;;  %vm131_vm5 = vcmp.eq.s32.totalorder %v9562_v10, %v129_v26  ;;  %v9624_v31 = vsel %vm130_vm4, 1.0, %v9409_v4  ;;  %v9653_v35 = vld [vmem:[%s11870_s27] sm:$0xff]   ;;  %v9678_v38 = vld [vmem:[%s11870_s27 + $0x10] sm:$0xff]   ;;  %v9685_v39 = vld [vmem:[%s11870_s27 + $0x18] sm:$0xff]  }
  0x12   :  { %8255 = vmatprep.subr.bf16.mxu1 %v9409_v4  ;;  %v9616_v29 = vsel %vm166_vm1, %v115_v23, 0  ;;  %v133_v32 = vsel %vm131_vm5, 1.0, %v9409_v4  ;;  %v9692_v40 = vld [vmem:[%s11870_s27 + $0x20] sm:$0xff]   ;;  %v9699_v41 = vld [vmem:[%s11870_s27 + $0x28] sm:$0xff]   ;;  %v9049_v45 = vld [vmem:[%s11870_s27 + $0x54] sm:$0xff]  }
  0x13   :  { %8246 = vmatpush3.bf16.msra.mxu0 %v9577_v14  ;;  %v9657_v36 = vpack.c.bf16 %v133_v32, %v9624_v31  ;;  %v9047_v42 = vld [vmem:[%s11870_s27 + $0x4c] sm:$0xff]   ;;  %v9050_v46 = vld [vmem:[%s11870_s27 + $0x5c] sm:$0xff]   ;;  %v9051_v47 = vld [vmem:[%s11870_s27 + $0x64] ss:$0 sps:$4 sm:$0x77]  }
  0x14   :  { %8247 = vmatprep.subr.bf16.mxu0 %v9409_v4  ;;  %v9048_v43 = vld [vmem:[%s11870_s27 + $0x30] ss:$0 sps:$4 sm:$0x77]   ;;  %v361_v48 = vsel %vm359_vm7, %v9051_v47, 0 }
  0x15   :  { %8256 = vmatpush3.bf16.msra.mxu1 %v9590_v20  ;;  %v9712_v44 = vsel %vm359_vm7, %v9048_v43, 0 }
  0x16   :  { %8257 = vmatprep.subr.bf16.mxu1 %v9409_v4 }
  0x17   :  { %8248 = vmatpush3.bf16.msra.mxu0 %v9604_v25 }
  0x18   :  { %8263 = vmatprep.subr.bf16.mxu0 %v9409_v4 }
  0x19   :  { %8258 = vmatpush3.bf16.msra.mxu1 %v9616_v29 }
  0x1a   :  { %8250 = vmatmul.mubr.msk.bf16.vlgmr.msra.gmra.mrb[0].mxu0 %vm162_vm6, %v127_v28  ;;  %8273 = vmatprep.subr.bf16.mxu1 %v9409_v4 }
  0x1b   :  { %8264 = vmatpush3.bf16.msra.mxu0 %v9547_v5  ;;  %8269 = vmatprep.mubr.msk.bf16.mxu0 %vm9410_vm0, %v9409_v4 }
  0x1c   :  { %8265 = vmatprep.subr.bf16.mxu0 %v9409_v4  ;;  %8260 = vmatmul.mubr.msk.bf16.vlgmr.msra.gmra.mrb[0].mxu1 %vm162_vm6, %v127_v28 }
  0x1d   :  { %8274 = vmatpush3.bf16.msra.mxu1 %v9041_v30  ;;  %8287 = vmatprep.mubr.msk.bf16.mxu1 %vm9410_vm0, %v9409_v4 }
  0x1e   :  { %8275 = vmatprep.subr.bf16.mxu1 %v9409_v4 }
  0x1f   :  { %8266 = vmatpush3.bf16.msra.mxu0 %v9577_v14 }
  0x20   :  { %8267 = vmatprep.subr.bf16.mxu0 %v9409_v4 }
  0x21   :  { %8276 = vmatpush3.bf16.msra.mxu1 %v9636_v33 }
  0x22   :  { %8277 = vmatprep.subr.bf16.mxu1 %v9409_v4 }
  0x23   :  { %8268 = vmatpush3.bf16.msra.mxu0 %v9604_v25 }
  0x24   :  { %8291 = vmatprep.subr.bf16.mxu0 %v9409_v4 }
  0x25   :  { %8278 = vmatpush3.bf16.msra.mxu1 %v9647_v34 }
  0x26   :  { %8270 = vmatmul.mubr.msk.bf16.vlgmr.msra.gmra.mrb[4].mxu0 %vm162_vm6, %v9657_v36  ;;  %8279 = vmatprep.subr.bf16.mxu1 %v9409_v4 }
  0x27   :  { %8292 = vmatpush3.bf16.msra.mxu0 %v9653_v35  ;;  %8305 = vmatprep.mubr.msk.bf16.mxu0 %vm9410_vm0, %v9409_v4 }
  0x28   :  { %8293 = vmatprep.subr.bf16.mxu0 %v9409_v4 }
  0x29   :  { %8280 = vmatpush3.bf16.msra.mxu1 %v9047_v42 }
  0x2a   :  { %8281 = vmatprep.subr.bf16.mxu1 %v9409_v4 }
  0x2b   :  { %8294 = vmatpush3.bf16.msra.mxu0 %v9665_v37 }
  0x2c   :  { %8295 = vmatprep.subr.bf16.mxu0 %v9409_v4 }
  0x2d   :  { %8282 = vmatpush3.bf16.msra.mxu1 %v9049_v45 }
  0x2e   :  { %8283 = vmatprep.subr.bf16.mxu1 %v9409_v4 }
  0x2f   :  { %8296 = vmatpush3.bf16.msra.mxu0 %v9678_v38 }
  0x30   :  { %8297 = vmatprep.subr.bf16.mxu0 %v9409_v4 }
  0x31   :  { %8284 = vmatpush3.bf16.msra.mxu1 %v9050_v46 }
  0x32   :  { %8285 = vmatprep.subr.bf16.mxu1 %v9409_v4 }
  0x33   :  { %8298 = vmatpush3.bf16.msra.mxu0 %v9685_v39 }
  0x34   :  { %8299 = vmatprep.subr.bf16.mxu0 %v9409_v4 }
  0x35   :  { %8286 = vmatpush3.bf16.msra.mxu1 %v361_v48 }
  0x36   :  { %8309 = vmatprep.subr.bf16.mxu1 %v9409_v4 }
  0x37   :  { %8300 = vmatpush3.bf16.msra.mxu0 %v9692_v40 }
  0x38   :  { %8301 = vmatprep.subr.bf16.mxu0 %v9409_v4 }
  0x3b   :  { %8302 = vmatpush3.bf16.msra.mxu0 %v9699_v41 }
  0x3c   :  { %8303 = vmatprep.subr.bf16.mxu0 %v9409_v4 }
  0x3f   :  { %8304 = vmatpush3.bf16.msra.mxu0 %v9712_v44 }
  0x40   :  { %8319 = vmatprep.subr.bf16.mxu0 %v9409_v4 }
  0x41   :  { %25 = vsyncpa [#allocation7], 0  ;;  %vm355_vm8 = vcmask 834560   ;;  %v9380_v59 = vld [vmem:[%s11870_s27 + $0x34] sm:$0xff]   ;;  %v9734_v60 = vld [vmem:[#allocation2] sm:$0xff]  ;;  %v135_v32 = vadd.s32 2, %v9584_v18 }
  0x42   :  { %v9052_v2 = vld [vmem:[%s11870_s27 + $0x68] sm:$0xff]   ;;  %v9053_v3 = vld [vmem:[%s11870_s27 + $0x70] sm:$0xff]   ;;  %v9054_v4 = vld [vmem:[%s11870_s27 + $0x78] sm:$0xff]   ;;  %vm68_vm13 = vcmask 130048   ;;  %s11871_s4 = sld [smem:[#allocation11_spill]]  ;;  %s9411_s29 = smov 8  }
  0x43   :  { %vm137_vm9 = vcmp.eq.s32.totalorder %v9562_v10, %v135_v32  ;;  %v9057_v43 = vld [vmem:[%s11870_s27 + $0x90] sm:$0xff]   ;;  %69 = vst.msk [vmem:[#allocation2 + $0x8] sm:$0xff] %vm68_vm13, %v9734_v60  ;;  %71 = vst.msk [vmem:[#allocation2 + $0x18] sm:$0xff] %vm68_vm13, %v9734_v60  ;;  %vm77_vm2 = vcmask 125952   ;;  %s11872_s21 = sld [smem:[#allocation12_spill]]  ;;  %vm1127_vm5 = vcmask 1047617  }
  0x44   :  { %73 = vst.msk [vmem:[#allocation2 + $0x28] sm:$0xff] %vm68_vm13, %v9734_v60  ;;  %75 = vst.msk [vmem:[#allocation2 + $0x38] sm:$0xff] %vm68_vm13, %v9734_v60  ;;  %s11873_s3 = sld [smem:[#allocation13_spill]]  ;;  %s9415_s23 = smov 32  }
  0x45   :  { %78 = vst.msk [vmem:[#allocation2 + $0x48] sm:$0xf] %vm77_vm2, %v9734_v60  ;;  %vm1161_vm2 = vcmask 59392  }
  0xed   :  { %v204_v49 = vpop.f32.mrb[0].mxu0 }
  0xee   :  { %v8251_v50 = vpop.f32.mrb[1].mxu0 }
  0xef   :  { %v207_v51 = vpop.f32.mrb[2].mxu0  ;;  %v249_v52 = vpop.f32.mrb[0].mxu1 }
  0xf0   :  { %v211_v53 = vpack.c.bf16 %v207_v51, %v204_v49  ;;  %v8252_v54 = vpop.f32.mrb[3].mxu0  ;;  %v8261_v55 = vpop.f32.mrb[1].mxu1 }
  0xf1   :  { %v252_v56 = vpop.f32.mrb[2].mxu1 }
  0xf2   :  { %8306 = vmatmul.mubr.msk.bf16.vlgmr.msra.gmra.mrb[8].mxu0 %vm355_vm8, %v211_v53  ;;  %v256_v57 = vpack.c.bf16 %v252_v56, %v249_v52  ;;  %v8262_v58 = vpop.f32.mrb[3].mxu1 }
  0xf3   :  { %8320 = vmatpush3.bf16.msra.mxu0 %v9380_v59  ;;  %8333 = vmatprep.mubr.msk.bf16.mxu0 %vm9410_vm0, %v9734_v60  ;;  %v143_v58 = vadd.s32 3, %v9592_v21 }
  0xf4   :  { %8321 = vmatprep.subr.bf16.mxu0 %v9734_v60 }
  0xf5   :  { %vm145_vm12 = vcmp.eq.s32.totalorder %v9562_v10, %v143_v58 }
  0xf7   :  { %8322 = vmatpush3.bf16.msra.mxu0 %v9636_v33  ;;  %v136_v33 = vadd.s32 2, %v9592_v21 }
  0xf8   :  { %8323 = vmatprep.subr.bf16.mxu0 %v9734_v60 }
  0xf9   :  { %v308_v61 = vpop.f32.mrb[4].mxu0  ;;  %vm138_vm10 = vcmp.eq.s32.totalorder %v9562_v10, %v136_v33 }
  0xfa   :  { %v8271_v62 = vpop.f32.mrb[5].mxu0 }
  0xfb   :  { %v311_v63 = vpop.f32.mrb[6].mxu0  ;;  %8324 = vmatpush3.bf16.msra.mxu0 %v9647_v34  ;;  %v9804_v34 = vsel %vm137_vm9, 1.0, %v9734_v60  ;;  %vm1137_vm9 = vcmask 57344  }
  0xfc   :  { %v315_v0 = vpack.c.bf16 %v311_v63, %v308_v61  ;;  %v8272_v1 = vpop.f32.mrb[7].mxu0  ;;  %8325 = vmatprep.subr.bf16.mxu0 %v9734_v60 }
  0xfd   :  { %v9065_v1 = vld [vmem:[%s11870_s27 + $0xcc] ss:$0 sps:$4 sm:$0x77]  }
  0xfe   :  { %8288 = vmatmul.mubr.msk.bf16.vlgmr.msra.gmra.mrb[4].mxu1 %vm355_vm8, %v315_v0 }
  0xff   :  { %8310 = vmatpush3.bf16.msra.mxu1 %v9579_v15  ;;  %8315 = vmatprep.mubr.msk.bf16.mxu1 %vm9410_vm0, %v9734_v60 }
 0x100   :  { %8311 = vmatprep.subr.bf16.mxu1 %v9734_v60  ;;  %8326 = vmatpush3.bf16.msra.mxu0 %v9047_v42  ;;  %v9056_v42 = vld [vmem:[%s11870_s27 + $0x88] sm:$0xff]  }
 0x101   :  { %8327 = vmatprep.subr.bf16.mxu0 %v9734_v60 }
 0x103   :  { %8312 = vmatpush3.bf16.msra.mxu1 %v9590_v20 }
 0x104   :  { %8313 = vmatprep.subr.bf16.mxu1 %v9734_v60  ;;  %8328 = vmatpush3.bf16.msra.mxu0 %v9049_v45 }
 0x105   :  { %8329 = vmatprep.subr.bf16.mxu0 %v9734_v60 }
 0x107   :  { %8314 = vmatpush3.bf16.msra.mxu1 %v9616_v29 }
 0x108   :  { %8337 = vmatprep.subr.bf16.mxu1 %v9734_v60  ;;  %8330 = vmatpush3.bf16.msra.mxu0 %v9050_v46 }
 0x109   :  { %8331 = vmatprep.subr.bf16.mxu0 %v9734_v60 }
 0x10a   :  { %8316 = vmatmul.mubr.msk.bf16.vlgmr.msra.gmra.mrb[8].mxu1 %vm162_vm6, %v9657_v36 }
 0x10b   :  { %8338 = vmatpush3.bf16.msra.mxu1 %v9653_v35  ;;  %8351 = vmatprep.mubr.msk.bf16.mxu1 %vm9410_vm0, %v9734_v60  ;;  %v140_v35 = vsel %vm138_vm10, 1.0, %v9734_v60  ;;  %vm1131_vm10 = vcmask 1047616  }
 0x10c   :  { %8339 = vmatprep.subr.bf16.mxu1 %v9734_v60  ;;  %8332 = vmatpush3.bf16.msra.mxu0 %v361_v48  ;;  %v141_v36 = vpack.c.bf16 %v140_v35, %v9804_v34 }
 0x10d   :  { %8355 = vmatprep.subr.bf16.mxu0 %v9734_v60 }
 0x10f   :  { %8340 = vmatpush3.bf16.msra.mxu1 %v9665_v37 }
 0x110   :  { %8341 = vmatprep.subr.bf16.mxu1 %v9734_v60 }
 0x113   :  { %8342 = vmatpush3.bf16.msra.mxu1 %v9678_v38 }
 0x114   :  { %8343 = vmatprep.subr.bf16.mxu1 %v9734_v60 }
 0x117   :  { %8344 = vmatpush3.bf16.msra.mxu1 %v9685_v39 }
 0x118   :  { %8345 = vmatprep.subr.bf16.mxu1 %v9734_v60 }
 0x11b   :  { %8346 = vmatpush3.bf16.msra.mxu1 %v9692_v40 }
 0x11c   :  { %8347 = vmatprep.subr.bf16.mxu1 %v9734_v60 }
 0x11f   :  { %8348 = vmatpush3.bf16.msra.mxu1 %v9699_v41  ;;  %v9055_v41 = vld [vmem:[%s11870_s27 + $0x80] sm:$0xff]  }
 0x120   :  { %8349 = vmatprep.subr.bf16.mxu1 %v9734_v60 }
 0x123   :  { %8350 = vmatpush3.bf16.msra.mxu1 %v9712_v44  ;;  %v9058_v44 = vld [vmem:[%s11870_s27 + $0x98] ss:$0 sps:$4 sm:$0x77]  }
 0x124   :  { %8365 = vmatprep.subr.bf16.mxu1 %v9734_v60  ;;  %v722_v45 = vsel %vm359_vm7, %v9058_v44, 0 }
 0x126   :  { %8352 = vmatmul.mubr.msk.bf16.vlgmr.msra.gmra.mrb[12].mxu1 %vm355_vm8, %v256_v57  ;;  %v142_v57 = vadd.s32 3, %v9584_v18  ;;  %v147_v18 = vsel %vm145_vm12, 1.0, %v9734_v60  ;;  %vm1153_vm12 = vcmask 1047619  }
 0x127   :  { %8379 = vmatprep.mubr.msk.bf16.mxu1 %vm9410_vm0, %v9734_v60  ;;  %8366 = vmatpush3.bf16.msra.mxu1 %v9052_v2 }
 0x128   :  { %8367 = vmatprep.subr.bf16.mxu1 %v9734_v60  ;;  %vm144_vm11 = vcmp.eq.s32.totalorder %v9562_v10, %v142_v57  ;;  %v9059_v10 = vld [vmem:[%s11870_s27 + $0x9c] sm:$0xff]  }
 0x129   :  { %v9862_v59 = vsel %vm144_vm11, 1.0, %v9734_v60  ;;  %vm1133_vm11 = vcmask 64512  }
 0x12a   :  { %v148_v61 = vpack.c.bf16 %v147_v18, %v9862_v59 }
 0x12b   :  { %8368 = vmatpush3.bf16.msra.mxu1 %v9053_v3 }
 0x12c   :  { %8369 = vmatprep.subr.bf16.mxu1 %v9734_v60 }
 0x12f   :  { %8370 = vmatpush3.bf16.msra.mxu1 %v9054_v4 }
 0x130   :  { %8371 = vmatprep.subr.bf16.mxu1 %v9734_v60 }
 0x133   :  { %8372 = vmatpush3.bf16.msra.mxu1 %v9055_v41 }
 0x134   :  { %8373 = vmatprep.subr.bf16.mxu1 %v9734_v60 }
 0x137   :  { %8374 = vmatpush3.bf16.msra.mxu1 %v9056_v42 }
 0x138   :  { %8375 = vmatprep.subr.bf16.mxu1 %v9734_v60 }
 0x13b   :  { %8376 = vmatpush3.bf16.msra.mxu1 %v9057_v43 }
 0x13c   :  { %8377 = vmatprep.subr.bf16.mxu1 %v9734_v60 }
 0x13f   :  { %8378 = vmatpush3.bf16.msra.mxu1 %v722_v45 }
 0x140   :  { %8411 = vmatprep.subr.bf16.mxu1 %v9734_v60 }
 0x1c5   :  { %v483_v6 = vpop.f32.mrb[8].mxu0 }
 0x1c6   :  { %v8307_v7 = vpop.f32.mrb[9].mxu0 }
 0x1c7   :  { %v486_v8 = vpop.f32.mrb[10].mxu0 }
 0x1c8   :  { %v8308_v11 = vpop.f32.mrb[11].mxu0 }
 0x1d1   :  { %v397_v12 = vpop.f32.mrb[4].mxu1 }
 0x1d2   :  { %v9789_v13 = vadd.f32 %v483_v6, %v397_v12  ;;  %v8289_v16 = vpop.f32.mrb[5].mxu1 }
 0x1d3   :  { %v400_v17 = vpop.f32.mrb[6].mxu1 }
 0x1d4   :  { %v9791_v19 = vadd.f32 %v486_v8, %v400_v17  ;;  %v8290_v22 = vpop.f32.mrb[7].mxu1 }
 0x1dd   :  { %v524_v23 = vpop.f32.mrb[8].mxu1 }
 0x1de   :  { %v8317_v26 = vpop.f32.mrb[9].mxu1 }
 0x1df   :  { %v527_v27 = vpop.f32.mrb[10].mxu1 }
 0x1e0   :  { %v531_v28 = vpack.c.bf16 %v527_v27, %v524_v23  ;;  %v8318_v30 = vpop.f32.mrb[11].mxu1 }
 0x1e2   :  { %8334 = vmatmul.mubr.msk.bf16.vlgmr.msra.gmra.mrb[12].mxu0 %vm355_vm8, %v531_v28 }
 0x1e3   :  { %8356 = vmatpush3.bf16.msra.mxu0 %v9547_v5  ;;  %8361 = vmatprep.mubr.msk.bf16.mxu0 %vm9410_vm0, %v9734_v60 }
 0x1e4   :  { %8357 = vmatprep.subr.bf16.mxu0 %v9734_v60 }
 0x1e7   :  { %8358 = vmatpush3.bf16.msra.mxu0 %v9577_v14 }
 0x1e8   :  { %8359 = vmatprep.subr.bf16.mxu0 %v9734_v60 }
 0x1eb   :  { %8360 = vmatpush3.bf16.msra.mxu0 %v9604_v25 }
 0x1ec   :  { %8383 = vmatprep.subr.bf16.mxu0 %v9734_v60 }
 0x1ee   :  { %8362 = vmatmul.mubr.msk.bf16.vlgmr.msra.gmra.mrb[16].mxu0 %vm162_vm6, %v141_v36 }
 0x1ef   :  { %8384 = vmatpush3.bf16.msra.mxu0 %v9579_v15  ;;  %8389 = vmatprep.mubr.msk.bf16.mxu0 %vm9410_vm0, %v9734_v60 }
 0x1f0   :  { %8385 = vmatprep.subr.bf16.mxu0 %v9734_v60 }
 0x1f3   :  { %8386 = vmatpush3.bf16.msra.mxu0 %v9590_v20 }
 0x1f4   :  { %8387 = vmatprep.subr.bf16.mxu0 %v9734_v60 }
 0x1f7   :  { %8388 = vmatpush3.bf16.msra.mxu0 %v9616_v29 }
 0x1f8   :  { %8393 = vmatprep.subr.bf16.mxu0 %v9734_v60 }
 0x1f9   :  { %v613_v37 = vpop.f32.mrb[12].mxu1 }
 0x1fa   :  { %8390 = vmatmul.mubr.msk.bf16.vlgmr.msra.gmra.mrb[20].mxu0 %vm162_vm6, %v141_v36  ;;  %v8353_v38 = vpop.f32.mrb[13].mxu1 }
 0x1fb   :  { %v616_v39 = vpop.f32.mrb[14].mxu1  ;;  %8394 = vmatpush3.bf16.msra.mxu0 %v9052_v2  ;;  %8407 = vmatprep.mubr.msk.bf16.mxu0 %vm9410_vm0, %v9734_v60  ;;  %v957_v2 = vsel %vm359_vm7, %v9065_v1, 0 }
 0x1fc   :  { %v8354_v40 = vpop.f32.mrb[15].mxu1  ;;  %8395 = vmatprep.subr.bf16.mxu0 %v9734_v60 }
 0x1ff   :  { %8396 = vmatpush3.bf16.msra.mxu0 %v9053_v3 }
 0x200   :  { %8397 = vmatprep.subr.bf16.mxu0 %v9734_v60 }
 0x203   :  { %8398 = vmatpush3.bf16.msra.mxu0 %v9054_v4 }
 0x204   :  { %8399 = vmatprep.subr.bf16.mxu0 %v9734_v60 }
 0x207   :  { %8400 = vmatpush3.bf16.msra.mxu0 %v9055_v41 }
 0x208   :  { %8401 = vmatprep.subr.bf16.mxu0 %v9734_v60 }
 0x20b   :  { %8402 = vmatpush3.bf16.msra.mxu0 %v9056_v42 }
 0x20c   :  { %8403 = vmatprep.subr.bf16.mxu0 %v9734_v60 }
 0x20f   :  { %8404 = vmatpush3.bf16.msra.mxu0 %v9057_v43 }
 0x210   :  { %8405 = vmatprep.subr.bf16.mxu0 %v9734_v60 }
 0x213   :  { %8406 = vmatpush3.bf16.msra.mxu0 %v722_v45 }
 0x214   :  { %8439 = vmatprep.subr.bf16.mxu0 %v9734_v60 }
 0x2b5   :  { %v569_v46 = vpop.f32.mrb[12].mxu0 }
 0x2b6   :  { %v9847_v47 = vadd.f32 %v613_v37, %v569_v46  ;;  %v8335_v48 = vpop.f32.mrb[13].mxu0 }
 0x2b7   :  { %v572_v49 = vpop.f32.mrb[14].mxu0 }
 0x2b8   :  { %v9849_v50 = vadd.f32 %v616_v39, %v572_v49  ;;  %v8336_v51 = vpop.f32.mrb[15].mxu0  ;;  %v7211_v39 = vld [vmem:[%s11871_s4] ss:$0 sm:$0xff] }
 0x2c1   :  { %v671_v52 = vpop.f32.mrb[16].mxu0 }
 0x2c2   :  { %v8363_v53 = vpop.f32.mrb[17].mxu0 }
 0x2c3   :  { %v674_v54 = vpop.f32.mrb[18].mxu0 }
 0x2c4   :  { %v678_v55 = vpack.c.bf16 %v674_v54, %v671_v52  ;;  %v8364_v56 = vpop.f32.mrb[19].mxu0 }
 0x2c6   :  { %8380 = vmatmul.mubr.msk.bf16.vlgmr.msra.gmra.mrb[16].mxu1 %vm355_vm8, %v678_v55 }
 0x2c7   :  { %8412 = vmatpush3.bf16.msra.mxu1 %v9547_v5  ;;  %8417 = vmatprep.mubr.msk.bf16.mxu1 %vm9410_vm0, %v9734_v60 }
 0x2c8   :  { %8413 = vmatprep.subr.bf16.mxu1 %v9734_v60 }
 0x2cb   :  { %8414 = vmatpush3.bf16.msra.mxu1 %v9577_v14  ;;  %v9060_v14 = vld [vmem:[%s11870_s27 + $0xa4] sm:$0xff]  }
 0x2cc   :  { %8415 = vmatprep.subr.bf16.mxu1 %v9734_v60 }
 0x2cd   :  { %v801_v21 = vpop.f32.mrb[20].mxu0 }
 0x2ce   :  { %v8391_v5 = vpop.f32.mrb[21].mxu0 }
 0x2cf   :  { %8416 = vmatpush3.bf16.msra.mxu1 %v9604_v25  ;;  %v804_v62 = vpop.f32.mrb[22].mxu0  ;;  %v9063_v25 = vld [vmem:[%s11870_s27 + $0xbc] sm:$0xff]  }
 0x2d0   :  { %v808_v63 = vpack.c.bf16 %v804_v62, %v801_v21  ;;  %v8392_v0 = vpop.f32.mrb[23].mxu0  ;;  %8421 = vmatprep.subr.bf16.mxu1 %v9734_v60  ;;  %v9412_v62 = vmov 0  }
 0x2d2   :  { %8418 = vmatmul.mubr.msk.bf16.vlgmr.msra.gmra.mrb[20].mxu1 %vm162_vm6, %v148_v61  ;;  %8408 = vmatmul.mubr.msk.bf16.vlgmr.msra.gmra.mrb[24].mxu0 %vm355_vm8, %v808_v63 }
 0x2d3   :  { %8440 = vmatpush3.bf16.msra.mxu0 %v9579_v15  ;;  %8445 = vmatprep.mubr.msk.bf16.mxu0 %vm9410_vm0, %v9734_v60  ;;  %v9061_v15 = vld [vmem:[%s11870_s27 + $0xac] sm:$0xff]  }
 0x2d4   :  { %8441 = vmatprep.subr.bf16.mxu0 %v9734_v60  ;;  %8422 = vmatpush3.bf16.msra.mxu1 %v9059_v10 }
 0x2d5   :  { %8423 = vmatprep.subr.bf16.mxu1 %v9734_v60  ;;  %8435 = vmatprep.mubr.msk.bf16.mxu1 %vm9410_vm0, %v9734_v60 }
 0x2d7   :  { %8442 = vmatpush3.bf16.msra.mxu0 %v9590_v20  ;;  %v9062_v20 = vld [vmem:[%s11870_s27 + $0xb4] sm:$0xff]  }
 0x2d8   :  { %8443 = vmatprep.subr.bf16.mxu0 %v9734_v60  ;;  %8424 = vmatpush3.bf16.msra.mxu1 %v9060_v14 }
 0x2d9   :  { %8425 = vmatprep.subr.bf16.mxu1 %v9734_v60 }
 0x2db   :  { %8444 = vmatpush3.bf16.msra.mxu0 %v9616_v29  ;;  %v9064_v29 = vld [vmem:[%s11870_s27 + $0xc4] sm:$0xff]   ;;  %s9414_s27 = smov 16  }
 0x2dc   :  { %8426 = vmatpush3.bf16.msra.mxu1 %v9061_v15  ;;  %8449 = vmatprep.subr.bf16.mxu0 %v9734_v60 }
 0x2dd   :  { %8427 = vmatprep.subr.bf16.mxu1 %v9734_v60 }
 0x2de   :  { %8446 = vmatmul.mubr.msk.bf16.vlgmr.msra.gmra.mrb[28].mxu0 %vm162_vm6, %v148_v61  ;;  %vm1129_vm6 = vcmask 64513  }
 0x2df   :  { %8450 = vmatpush3.bf16.msra.mxu0 %v9059_v10  ;;  %8463 = vmatprep.mubr.msk.bf16.mxu0 %vm9410_vm0, %v9734_v60 }
 0x2e0   :  { %8451 = vmatprep.subr.bf16.mxu0 %v9734_v60  ;;  %8428 = vmatpush3.bf16.msra.mxu1 %v9062_v20 }
 0x2e1   :  { %8429 = vmatprep.subr.bf16.mxu1 %v9734_v60 }
 0x2e3   :  { %8452 = vmatpush3.bf16.msra.mxu0 %v9060_v14 }
 0x2e4   :  { %8453 = vmatprep.subr.bf16.mxu0 %v9734_v60  ;;  %8430 = vmatpush3.bf16.msra.mxu1 %v9063_v25 }
 0x2e5   :  { %8431 = vmatprep.subr.bf16.mxu1 %v9734_v60 }
 0x2e7   :  { %8454 = vmatpush3.bf16.msra.mxu0 %v9061_v15 }
 0x2e8   :  { %8455 = vmatprep.subr.bf16.mxu0 %v9734_v60  ;;  %8432 = vmatpush3.bf16.msra.mxu1 %v9064_v29 }
 0x2e9   :  { %8433 = vmatprep.subr.bf16.mxu1 %v9734_v60 }
 0x2eb   :  { %8456 = vmatpush3.bf16.msra.mxu0 %v9062_v20  ;;  %v9943_v20 = vld [vmem:[%s11872_s21 + $0x48] sm:$0xff]  }
 0x2ec   :  { %8457 = vmatprep.subr.bf16.mxu0 %v9734_v60  ;;  %8434 = vmatpush3.bf16.msra.mxu1 %v957_v2 }
 0x2ef   :  { %8458 = vmatpush3.bf16.msra.mxu0 %v9063_v25  ;;  %v9949_v25 = vld [vmem:[%s11872_s21 + $0x50] sm:$0xff]  }
 0x2f0   :  { %8459 = vmatprep.subr.bf16.mxu0 %v9734_v60 }
 0x2f3   :  { %8460 = vmatpush3.bf16.msra.mxu0 %v9064_v29  ;;  %v9956_v29 = vld [vmem:[%s11872_s21 + $0x58] sm:$0xff]  }
 0x2f4   :  { %8461 = vmatprep.subr.bf16.mxu0 %v9734_v60 }
 0x2f7   :  { %8462 = vmatpush3.bf16.msra.mxu0 %v957_v2 }
 0x2f8   :  { %1442 = vmatprep.subr.bf16.mxu0 %v9412_v62 }
 0x399   :  { %v758_v3 = vpop.f32.mrb[16].mxu1 }
 0x39a   :  { %v765_v4 = vadd.f32 %v758_v3, %v9789_v13  ;;  %v8381_v6 = vpop.f32.mrb[17].mxu1 }
 0x39b   :  { %v761_v7 = vpop.f32.mrb[18].mxu1 }
 0x39c   :  { %v766_v8 = vadd.f32 %v761_v7, %v9791_v19  ;;  %v8382_v11 = vpop.f32.mrb[19].mxu1 }
 0x3a5   :  { %v906_v12 = vpop.f32.mrb[20].mxu1  ;;  %v846_v16 = vpop.f32.mrb[24].mxu0 }
 0x3a6   :  { %v853_v17 = vadd.f32 %v846_v16, %v9847_v47  ;;  %v8419_v22 = vpop.f32.mrb[21].mxu1  ;;  %v8409_v23 = vpop.f32.mrb[25].mxu0 }
 0x3a7   :  { %v909_v26 = vpop.f32.mrb[22].mxu1  ;;  %v849_v27 = vpop.f32.mrb[26].mxu0 }
 0x3a8   :  { %v913_v28 = vpack.c.bf16 %v909_v26, %v906_v12  ;;  %v854_v30 = vadd.f32 %v849_v27, %v9849_v50  ;;  %v8410_v32 = vpop.f32.mrb[27].mxu0  ;;  %v8420_v33 = vpop.f32.mrb[23].mxu1 }
 0x3aa   :  { %8436 = vmatmul.mubr.msk.bf16.vlgmr.msra.gmra.mrb[24].mxu1 %vm355_vm8, %v913_v28 }
 0x3ab   :  { %1247 = vmatprep.mubr.bf16.mxu1 %v9412_v62 }
 0x3b1   :  { %v1036_v13 = vpop.f32.mrb[28].mxu0 }
 0x3b2   :  { %v8447_v35 = vpop.f32.mrb[29].mxu0 }
 0x3b3   :  { %v1039_v36 = vpop.f32.mrb[30].mxu0 }
 0x3b4   :  { %v1043_v19 = vpack.c.bf16 %v1039_v36, %v1036_v13  ;;  %v8448_v37 = vpop.f32.mrb[31].mxu0 }
 0x3b6   :  { %8464 = vmatmul.mubr.msk.bf16.vlgmr.msra.gmra.mrb[32].mxu0 %vm355_vm8, %v1043_v19  ;;  %vm1135_vm8 = vcmask 1040448  }
 0x3b7   :  { %1443 = vmatpush1.bf16.msra.mxu0 %v9943_v20 }
 0x3b8   :  { %1444 = vmatprep.subr.bf16.mxu0 %v9412_v62 }
 0x3bb   :  { %1445 = vmatpush1.bf16.msra.mxu0 %v9949_v25 }
 0x3bc   :  { %1446 = vmatprep.subr.bf16.mxu0 %v9412_v62 }
 0x3bf   :  { %1447 = vmatpush1.bf16.msra.mxu0 %v9956_v29 }
 0x3c0   :  { %1448 = vmatprep.subr.bf16.mxu0 %v9412_v62 }
 0x47d   :  { %v993_v38 = vpop.f32.mrb[24].mxu1 }
 0x47e   :  { %v1000_v40 = vadd.f32 %v993_v38, %v765_v4  ;;  %v8437_v41 = vpop.f32.mrb[25].mxu1 }
 0x47f   :  { %v996_v42 = vpop.f32.mrb[26].mxu1 }
 0x480   :  { %v1097_v43 = vadd.f32 %v7211_v39, %v1000_v40  ;;  %v1001_v44 = vadd.f32 %v996_v42, %v766_v8  ;;  %v8438_v45 = vpop.f32.mrb[27].mxu1 }
 0x482   :  { %v1098_v46 = vadd.f32 %v7211_v39, %v1001_v44  ;;  %vm1099_vm14 = vcmp.ge.f32.partialorder %v1097_v43, 0.0  ;;  %v1101_v47 = vmul.f32 0.2, %v1097_v43 }
 0x484   :  { %v1103_v48 = vsel %vm1099_vm14, %v1097_v43, %v1101_v47  ;;  %vm1100_vm15 = vcmp.ge.f32.partialorder %v1098_v46, 0.0  ;;  %v1102_v49 = vmul.f32 0.2, %v1098_v46  ;;  %vm1155_vm14 = vcmask 64515  }
 0x485   :  { %v1115_v50 = vrot.slane %v1103_v48, 7  ;;  %v10010_v48 = vpack.c.bf16 %v9624_v31, %v9624_v31  ;;  %v9069_v31 = vld [vmem:[%s11872_s21 + $0x60] sm:$0xff]  }
 0x486   :  { %v1104_v51 = vsel %vm1100_vm15, %v1098_v46, %v1102_v49  ;;  %vm1159_vm15 = vcmask 1042496   ;;  %1449 = vmatpush1.bf16.msra.mxu0 %v9069_v31  ;;  %v9070_v49 = vld [vmem:[%s11872_s21 + $0x68] sm:$0xff]  }
 0x487   :  { %1118 = vrot.lane.b32.xlu0 %v1115_v50, %s9411_s29  ;;  %v1116_v52 = vrot.slane %v1104_v51, 7  ;;  %1450 = vmatprep.subr.bf16.mxu0 %v9412_v62  ;;  %v9072_v51 = vld [vmem:[%s11872_s21 + $0x78] sm:$0xff]  }
 0x489   :  { %1122 = vrot.lane.b32.xlu1 %v1116_v52, %s9411_s29  ;;  %v1081_v53 = vpop.f32.mrb[32].mxu0  ;;  %v1117_v54 = vsel %vm166_vm1, %v1115_v50, %v1116_v52  ;;  %v9071_v50 = vld [vmem:[%s11872_s21 + $0x70] sm:$0xff]   ;;  %v9073_v52 = vld [vmem:[%s11872_s21 + $0x80] sm:$0xff]  }
 0x48a   :  { %v1088_v55 = vadd.f32 %v1081_v53, %v853_v17  ;;  %v8465_v56 = vpop.f32.mrb[33].mxu0  ;;  %1451 = vmatpush1.bf16.msra.mxu0 %v9070_v49  ;;  %v9074_v53 = vld [vmem:[%s11872_s21 + $0x88] sm:$0xff]  }
 0x48b   :  { %1120 = vrot.lane.b32.xlu0 %v1117_v54, %s9411_s29  ;;  %v1084_v57 = vpop.f32.mrb[34].mxu0  ;;  %1452 = vmatprep.subr.bf16.mxu0 %v9412_v62 }
 0x48c   :  { %v1105_v58 = vadd.f32 %v7211_v39, %v1088_v55  ;;  %v1089_v18 = vadd.f32 %v1084_v57, %v854_v30  ;;  %v8466_v21 = vpop.f32.mrb[35].mxu0  ;;  %v9977_v30 = vpack.c.bf16 %v9600_v24, %v9600_v24 }
 0x48e   :  { %v1109_v5 = vmul.f32 0.2, %v1105_v58  ;;  %v1106_v61 = vadd.f32 %v7211_v39, %v1089_v18  ;;  %vm1107_vm3 = vcmp.ge.f32.partialorder %v1105_v58, 0.0  ;;  %1453 = vmatpush1.bf16.msra.mxu0 %v9071_v50 }
 0x48f   :  { %1454 = vmatprep.subr.bf16.mxu0 %v9412_v62 }
 0x490   :  { %vm1108_vm4 = vcmp.ge.f32.partialorder %v1106_v61, 0.0  ;;  %v1110_v63 = vmul.f32 0.2, %v1106_v61  ;;  %v1111_v0 = vsel %vm1107_vm3, %v1105_v58, %v1109_v5  ;;  %vm1205_vm3 = vcmask 146432  }
 0x491   :  { %v1141_v10 = vrot.slane %v1111_v0, 5 }
 0x492   :  { %v1112_v60 = vsel %vm1108_vm4, %v1106_v61, %v1110_v63  ;;  %vm1262_vm4 = vcmask 1046528   ;;  %1455 = vmatpush1.bf16.msra.mxu0 %v9072_v51 }
 0x493   :  { %1144 = vrot.lane.b32.xlu1 %v1141_v10, %s9411_s29  ;;  %v1142_v14 = vrot.slane %v1112_v60, 5  ;;  %1456 = vmatprep.subr.bf16.mxu0 %v9412_v62  ;;  %v9075_v60 = vld [vmem:[%s11872_s21] sm:$0xff]  }
 0x495   :  { %v1143_v15 = vsel %vm359_vm7, %v1141_v10, %v1142_v14 }
 0x496   :  { %1146 = vrot.lane.b32.xlu0 %v1143_v15, %s9411_s29  ;;  %1457 = vmatpush1.bf16.msra.mxu0 %v9073_v52 }
 0x497   :  { %1148 = vrot.lane.b32.xlu1 %v1142_v14, %s9411_s29  ;;  %1458 = vmatprep.subr.bf16.mxu0 %v9412_v62  ;;  %s9416_s29 = smov 64  }
 0x49a   :  { %1459 = vmatpush1.bf16.msra.mxu0 %v9074_v53 }
 0x49b   :  { %1539 = vmatprep.subr.bf16.mxu0 %v9412_v62 }
 0x4f9   :  { %v1119_v1 = vpop.permute.xlu0 %1118 }
 0x4fa   :  { %1128 = vst.msk [vmem:[#allocation2] sm:$0xfe] %vm1127_vm5, %v1119_v1  ;;  %vm85_vm5 = vcmask 257024  }
 0x4fb   :  { %1130 = vst.msk [vmem:[#allocation2 + $0x8] sm:$0xfe] %vm1129_vm6, %v1119_v1  ;;  %v1123_v2 = vpop.permute.xlu1 %1122 }
 0x4fc   :  { %1136 = vst.msk [vmem:[#allocation2 + $0x20] sm:$0x1] %vm1135_vm8, %v1123_v2  ;;  %vm2598_vm8 = vcmask 1047683  }
 0x4fd   :  { %1138 = vst.msk [vmem:[#allocation2 + $0x28] sm:$0x1] %vm1137_vm9, %v1123_v2  ;;  %v1121_v3 = vpop.permute.xlu0 %1120  ;;  %vm2600_vm9 = vcmask 130051  }
 0x4fe   :  { %1132 = vst.msk [vmem:[#allocation2 + $0x10] sm:$0xff] %vm1131_vm10, %v1121_v3 }
 0x4ff   :  { %1134 = vst.msk [vmem:[#allocation2 + $0x18] sm:$0xff] %vm1133_vm11, %v1121_v3 }
 0x501   :  { %v1163_v6 = vld [vmem:[#allocation2] sm:$0xff] }
 0x502   :  { %v1164_v4 = vld [vmem:[#allocation2 + $0x8] sm:$0xff] }
 0x503   :  { %v1167_v16 = vld [vmem:[#allocation2 + $0x20] sm:$0x3] }
 0x504   :  { %v1168_v7 = vld [vmem:[#allocation2 + $0x28] sm:$0x3]  ;;  %v1171_v27 = vpack.c.bf16 %v1167_v16, %v1167_v16 }
 0x505   :  { %v1145_v8 = vpop.permute.xlu1 %1144  ;;  %v1165_v12 = vld [vmem:[#allocation2 + $0x10] sm:$0xff]  ;;  %v9968_v26 = vpack.c.bf16 %v1168_v7, %v1168_v7  ;;  %v9080_v16 = vld [vmem:[%s11872_s21 + $0x28] sm:$0xff]  }
 0x506   :  { %v1166_v11 = vld [vmem:[#allocation2 + $0x18] sm:$0xff]  ;;  %1154 = vst.msk [vmem:[#allocation2 + $0x20] sm:$0xf8] %vm1153_vm12, %v1145_v8  ;;  %v9965_v22 = vpack.c.bf16 %v1165_v12, %v1163_v6  ;;  %v9980_v32 = vsel %vm166_vm1, %v1171_v27, 0  ;;  %v9079_v12 = vld [vmem:[%s11872_s21 + $0x20] sm:$0xff]   ;;  %vm2585_vm12 = vcmask 1047681  }
 0x507   :  { %1156 = vst.msk [vmem:[#allocation2 + $0x28] sm:$0xf8] %vm1155_vm14, %v1145_v8  ;;  %v9963_v17 = vpack.c.bf16 %v1166_v11, %v1164_v4  ;;  %v9077_v4 = vld [vmem:[%s11872_s21 + $0x10] sm:$0xff]   ;;  %v9078_v11 = vld [vmem:[%s11872_s21 + $0x18] sm:$0xff]   ;;  %vm2587_vm14 = vcmask 130049  }
 0x508   :  { %v1147_v23 = vpop.permute.xlu0 %1146  ;;  %v9082_v27 = vld [vmem:[%s11872_s21 + $0x38] sm:$0xff]  }
 0x509   :  { %1215 = vmatprep.subr.bf16.mxu1 %v9963_v17  ;;  %1157 = vst.msk [vmem:[#allocation2 + $0x30] sm:$0xff] %vm1131_vm10, %v1147_v23  ;;  %v1149_v28 = vpop.permute.xlu1 %1148  ;;  %vm2602_vm10 = vcmask 1042560  }
 0x50a   :  { %1158 = vst.msk [vmem:[#allocation2 + $0x38] sm:$0xff] %vm1133_vm11, %v1147_v23  ;;  %1216 = vmatpush1.bf16.msra.mxu1 %v9965_v22  ;;  %v9081_v23 = vld [vmem:[%s11872_s21 + $0x30] sm:$0xff]   ;;  %vm2604_vm11 = vcmask 124928  }
 0x50b   :  { %1160 = vst.msk [vmem:[#allocation2 + $0x40] sm:$0x7] %vm1159_vm15, %v1149_v28  ;;  %7212 = vmatprep.subr.msk.bf16.mxu1 %vm166_vm1, %v9968_v26  ;;  %vm2589_vm15 = vcmask 1040512  }
 0x50c   :  { %1162 = vst.msk [vmem:[#allocation2 + $0x48] sm:$0x7] %vm1161_vm2, %v1149_v28  ;;  %v9083_v28 = vld [vmem:[%s11872_s21 + $0x40] sm:$0xff]   ;;  %vm2591_vm2 = vcmask 122880  }
 0x50d   :  { %v1173_v35 = vld [vmem:[#allocation2 + $0x20] sm:$0xfc] }
 0x50e   :  { %1218 = vmatpush1.bf16.msra.mxu1 %v9980_v32  ;;  %v1174_v33 = vld [vmem:[#allocation2 + $0x28] sm:$0xfc] }
 0x510   :  { %v1175_v36 = vld [vmem:[#allocation2 + $0x30] sm:$0xff] }
 0x511   :  { %7213 = vmatmul.mubr.msk.bf16.vlgmr.msra.gmra.mrb[28].mxu1 %vm1205_vm3, %v9977_v30  ;;  %v1176_v13 = vld [vmem:[#allocation2 + $0x38] sm:$0xff]  ;;  %v1179_v39 = vpack.c.bf16 %v1175_v36, %v1173_v35  ;;  %v9084_v35 = vld [vmem:[%s11872_s21 + $0x90] sm:$0xff]  }
 0x512   :  { %v1180_v37 = vpack.c.bf16 %v1176_v13, %v1174_v33  ;;  %v1177_v38 = vld [vmem:[#allocation2 + $0x40] sm:$0xf]  ;;  %1309 = vmatprep.mubr.bf16.mxu1 %v9412_v62  ;;  %v10120_v13 = vpack.c.bf16 %v9804_v34, %v9804_v34  ;;  %v9085_v34 = vld [vmem:[%s11872_s21 + $0x98] sm:$0xff]  }
 0x513   :  { %v1178_v19 = vld [vmem:[#allocation2 + $0x48] sm:$0xf]  ;;  %v1181_v40 = vpack.c.bf16 %v1177_v38, %v1177_v38  ;;  %v1263_v42 = vrot.slane %v1179_v39, 1  ;;  %v9088_v38 = vld [vmem:[%s11872_s21 + $0xb0] sm:$0xff]   ;;  %v9089_v39 = vld [vmem:[%s11872_s21 + $0xb8] sm:$0xff]  }
 0x514   :  { %v1182_v24 = vpack.c.bf16 %v1178_v19, %v1178_v19  ;;  %v1266_v41 = vrot.slane %v1180_v37, 1  ;;  %v9086_v19 = vld [vmem:[%s11872_s21 + $0xa0] sm:$0xff]   ;;  %v9087_v37 = vld [vmem:[%s11872_s21 + $0xa8] sm:$0xff]  }
 0x515   :  { %v1264_v44 = vrot.slane %v1181_v40, 1  ;;  %v9091_v40 = vld [vmem:[%s11872_s21 + $0xc8] sm:$0xff]  }
 0x516   :  { %v9986_v43 = vrot.slane %v1182_v24, 1  ;;  %v9090_v24 = vld [vmem:[%s11872_s21 + $0xc0] sm:$0xff]  }
 0x517   :  { %v9991_v46 = vsel %vm1262_vm4, %v1263_v42, %v1264_v44  ;;  %v9998_v47 = vsel %vm166_vm1, %v1264_v44, 0 }
 0x518   :  { %v9989_v45 = vsel %vm1262_vm4, %v1266_v41, %v9986_v43  ;;  %v9092_v41 = vld [vmem:[%s11872_s21 + $0xd0] sm:$0xff]   ;;  %vm2638_vm4 = vcmask 80896  }
 0x519   :  { %1277 = vmatprep.subr.bf16.mxu1 %v9989_v45 }
 0x51a   :  { %1278 = vmatpush1.bf16.msra.mxu1 %v9991_v46 }
 0x51b   :  { %7214 = vmatprep.subr.msk.bf16.mxu1 %vm166_vm1, %v9986_v43 }
 0x51e   :  { %1280 = vmatpush1.bf16.msra.mxu1 %v9998_v47 }
 0x51f   :  { %1342 = vmatprep.subr.bf16.mxu1 %v9963_v17 }
 0x521   :  { %7215 = vmatmul.mubr.msk.bf16.vlgmr.msra.gmra.mrb[32].mxu1 %vm1205_vm3, %v9977_v30 }
 0x522   :  { %1343 = vmatpush1.bf16.msra.mxu1 %v9965_v22  ;;  %1374 = vmatprep.mubr.bf16.mxu1 %v9412_v62 }
 0x523   :  { %7234 = vmatprep.subr.msk.bf16.mxu1 %vm166_vm1, %v9968_v26 }
 0x526   :  { %1345 = vmatpush1.bf16.msra.mxu1 %v9980_v32 }
 0x527   :  { %1579 = vmatprep.subr.bf16.mxu1 %v9989_v45 }
 0x529   :  { %7235 = vmatmul.mubr.msk.bf16.vlgmr.msra.gmra.mrb[36].mxu1 %vm1205_vm3, %v10010_v48 }
 0x52a   :  { %1580 = vmatpush1.bf16.msra.mxu1 %v9991_v46  ;;  %1611 = vmatprep.mubr.bf16.mxu1 %v9412_v62 }
 0x52b   :  { %7256 = vmatprep.subr.msk.bf16.mxu1 %vm166_vm1, %v9986_v43 }
 0x52e   :  { %1582 = vmatpush1.bf16.msra.mxu1 %v9998_v47 }
 0x52f   :  { %1625 = vmatprep.subr.bf16.mxu1 %v9412_v62 }
 0x531   :  { %7257 = vmatmul.mubr.msk.bf16.vlgmr.msra.gmra.mrb[40].mxu1 %vm1205_vm3, %v10010_v48 }
 0x532   :  { %1626 = vmatpush1.bf16.msra.mxu1 %v9943_v20 }
 0x533   :  { %1627 = vmatprep.subr.bf16.mxu1 %v9412_v62 }
 0x536   :  { %1628 = vmatpush1.bf16.msra.mxu1 %v9949_v25  ;;  %v9076_v25 = vld [vmem:[%s11872_s21 + $0x8] sm:$0xff]  }
 0x537   :  { %1629 = vmatprep.subr.bf16.mxu1 %v9412_v62 }
 0x53a   :  { %1630 = vmatpush1.bf16.msra.mxu1 %v9956_v29 }
 0x53b   :  { %1631 = vmatprep.subr.bf16.mxu1 %v9412_v62 }
 0x53e   :  { %1632 = vmatpush1.bf16.msra.mxu1 %v9069_v31 }
 0x53f   :  { %1633 = vmatprep.subr.bf16.mxu1 %v9412_v62 }
 0x542   :  { %1634 = vmatpush1.bf16.msra.mxu1 %v9070_v49 }
 0x543   :  { %1635 = vmatprep.subr.bf16.mxu1 %v9412_v62 }
 0x546   :  { %1636 = vmatpush1.bf16.msra.mxu1 %v9071_v50 }
 0x547   :  { %1637 = vmatprep.subr.bf16.mxu1 %v9412_v62 }
 0x54a   :  { %1638 = vmatpush1.bf16.msra.mxu1 %v9072_v51 }
 0x54b   :  { %1639 = vmatprep.subr.bf16.mxu1 %v9412_v62 }
 0x54e   :  { %1640 = vmatpush1.bf16.msra.mxu1 %v9073_v52 }
 0x54f   :  { %1641 = vmatprep.subr.bf16.mxu1 %v9412_v62 }
 0x552   :  { %1642 = vmatpush1.bf16.msra.mxu1 %v9074_v53 }
 0x553   :  { %1668 = vmatprep.subr.bf16.mxu1 %v9412_v62 }
 0x5e4   :  { %v10060_v54 = vpop.f32.mrb[28].mxu1 }
 0x5e5   :  { %v1251_v55 = vpop.f32.mrb[29].mxu1  ;;  %v1256_v33 = vpack.c.bf16 %v10060_v54, %v10060_v54 }
 0x5e6   :  { %v1253_v56 = vpop.f32.mrb[30].mxu1  ;;  %v1257_v20 = vpack.c.bf16 %v1251_v55, %v1251_v55 }
 0x5e7   :  { %v1254_v57 = vpop.f32.mrb[31].mxu1 }
 0x5e8   :  { %v9100_v57 = vld [vmem:[%s11872_s21 + $0x110] sm:$0xff]  }
 0x5f4   :  { %v10062_v58 = vpop.f32.mrb[32].mxu1 }
 0x5f5   :  { %v1313_v18 = vpop.f32.mrb[33].mxu1  ;;  %v1318_v36 = vpack.c.bf16 %v10062_v58, %v10062_v58  ;;  %v9101_v58 = vld [vmem:[%s11872_s21 + $0x118] sm:$0xff]  }
 0x5f6   :  { %v1315_v21 = vpop.f32.mrb[34].mxu1  ;;  %v1319_v8 = vpack.c.bf16 %v1313_v18, %v1313_v18  ;;  %v9413_v18 = vmov 0.0|0.0  }
 0x5f7   :  { %v1316_v5 = vpop.f32.mrb[35].mxu1  ;;  %v2221_v21 = vld [vmem:[%s11847_s7] sm:$0xff] }
 0x5f8   :  { %v2222_v5 = vld [vmem:[%s11847_s7 + $0x8] sm:$0xff] }
 0x5fc   :  { %v1376_v61 = vpop.f32.mrb[36].mxu1 }
 0x5fd   :  { %v1378_v63 = vpop.f32.mrb[37].mxu1  ;;  %v1383_v14 = vpack.c.bf16 %v1376_v61, %v1376_v61 }
 0x5fe   :  { %v1384_v0 = vpack.c.bf16 %v1378_v63, %v1378_v63  ;;  %v1380_v10 = vpop.f32.mrb[38].mxu1 }
 0x5ff   :  { %v1381_v15 = vpop.f32.mrb[39].mxu1 }
 0x600   :  { %7245 = vmatprep.mubr.msk.bf16.mxu0 %vm68_vm13, %v1384_v0 }
 0x601   :  { %1475 = vmatmul.mubr.bf16.vlgmr.msra.gmra.mrb[36].mxu0 %v1383_v14  ;;  %v8740_v14 = vpack.c.bf16 %v2222_v5, %v2221_v21  ;;  %v2308_v5 = vld [vmem:[%s11846_s6] sm:$0xff] }
 0x602   :  { %1540 = vmatpush1.bf16.msra.mxu0 %v9075_v60  ;;  %7255 = vmatprep.mubr.msk.bf16.mxu0 %vm68_vm13, %v1257_v20  ;;  %v2223_v20 = vld [vmem:[%s11847_s7 + $0x10] sm:$0xff] }
 0x603   :  { %1541 = vmatprep.subr.bf16.mxu0 %v9412_v62 }
 0x604   :  { %v1613_v29 = vpop.f32.mrb[40].mxu1 }
 0x605   :  { %v1615_v1 = vpop.f32.mrb[41].mxu1  ;;  %v1620_v6 = vpack.c.bf16 %v1613_v29, %v1613_v29 }
 0x606   :  { %1542 = vmatpush1.bf16.msra.mxu0 %v9076_v25  ;;  %v1621_v2 = vpack.c.bf16 %v1615_v1, %v1615_v1  ;;  %v1617_v3 = vpop.f32.mrb[42].mxu1  ;;  %v10262_v1 = vld [vmem:[#allocation3] sm:$0xff] }
 0x607   :  { %v1618_v7 = vpop.f32.mrb[43].mxu1  ;;  %1543 = vmatprep.subr.bf16.mxu0 %v9412_v62  ;;  %86 = vst.msk [vmem:[#allocation3 + $0x28] sm:$0xf] %vm85_vm5, %v10262_v1  ;;  %vm3659_vm5 = vcmask 1043456  }
 0x608   :  { %7258 = vmatprep.mubr.msk.bf16.mxu1 %vm68_vm13, %v1621_v2 }
 0x609   :  { %1658 = vmatmul.mubr.bf16.vlgmr.msra.gmra.mrb[44].mxu1 %v1620_v6 }
 0x60a   :  { %1544 = vmatpush1.bf16.msra.mxu0 %v9077_v4  ;;  %1669 = vmatpush1.bf16.msra.mxu1 %v9075_v60 }
 0x60b   :  { %7259 = vmatprep.mubr.msk.bf16.mxu1 %vm68_vm13, %v1319_v8  ;;  %1545 = vmatprep.subr.bf16.mxu0 %v9412_v62 }
 0x60c   :  { %1670 = vmatprep.subr.bf16.mxu1 %v9412_v62 }
 0x60e   :  { %1546 = vmatpush1.bf16.msra.mxu0 %v9078_v11  ;;  %1671 = vmatpush1.bf16.msra.mxu1 %v9076_v25  ;;  %v2224_v25 = vld [vmem:[%s11847_s7 + $0x18] sm:$0xff] }
 0x60f   :  { %1547 = vmatprep.subr.bf16.mxu0 %v9412_v62  ;;  %1672 = vmatprep.subr.bf16.mxu1 %v9412_v62  ;;  %v8743_v29 = vpack.c.bf16 %v2224_v25, %v2223_v20 }
 0x612   :  { %1548 = vmatpush1.bf16.msra.mxu0 %v9079_v12  ;;  %1673 = vmatpush1.bf16.msra.mxu1 %v9077_v4 }
 0x613   :  { %1549 = vmatprep.subr.bf16.mxu0 %v9412_v62  ;;  %1674 = vmatprep.subr.bf16.mxu1 %v9412_v62 }
 0x616   :  { %1550 = vmatpush1.bf16.msra.mxu0 %v9080_v16  ;;  %1675 = vmatpush1.bf16.msra.mxu1 %v9078_v11  ;;  %v2225_v11 = vld [vmem:[%s11847_s7 + $0x20] sm:$0xff] }
 0x617   :  { %1551 = vmatprep.subr.bf16.mxu0 %v9412_v62  ;;  %1676 = vmatprep.subr.bf16.mxu1 %v9412_v62 }
 0x61a   :  { %1552 = vmatpush1.bf16.msra.mxu0 %v9081_v23  ;;  %1677 = vmatpush1.bf16.msra.mxu1 %v9079_v12  ;;  %v2226_v12 = vld [vmem:[%s11847_s7 + $0x28] sm:$0xff] }
 0x61b   :  { %1553 = vmatprep.subr.bf16.mxu0 %v9412_v62  ;;  %1678 = vmatprep.subr.bf16.mxu1 %v9412_v62 }
 0x61e   :  { %1554 = vmatpush1.bf16.msra.mxu0 %v9082_v27  ;;  %1679 = vmatpush1.bf16.msra.mxu1 %v9080_v16  ;;  %v8746_v16 = vpack.c.bf16 %v2226_v12, %v2225_v11 }
 0x61f   :  { %1555 = vmatprep.subr.bf16.mxu0 %v9412_v62  ;;  %1680 = vmatprep.subr.bf16.mxu1 %v9412_v62 }
 0x622   :  { %1556 = vmatpush1.bf16.msra.mxu0 %v9083_v28  ;;  %1681 = vmatpush1.bf16.msra.mxu1 %v9081_v23  ;;  %v2227_v23 = vld [vmem:[%s11847_s7 + $0x30] sm:$0xff] }
 0x623   :  { %1730 = vmatprep.subr.bf16.mxu0 %v9963_v17  ;;  %1682 = vmatprep.subr.bf16.mxu1 %v9412_v62 }
 0x625   :  { %1572 = vmatmul.mubr.bf16.vlgmr.msra.gmra.mrb[36].mxu0 %v1256_v33  ;;  %v2229_v33 = vld [vmem:[%s11847_s7 + $0x40] sm:$0xff] }
 0x626   :  { %1683 = vmatpush1.bf16.msra.mxu1 %v9082_v27  ;;  %1731 = vmatpush1.bf16.msra.mxu0 %v9965_v22  ;;  %v2228_v27 = vld [vmem:[%s11847_s7 + $0x38] sm:$0xff] }
 0x627   :  { %7278 = vmatprep.subr.msk.bf16.mxu0 %vm166_vm1, %v9968_v26  ;;  %1684 = vmatprep.subr.bf16.mxu1 %v9412_v62 }
 0x628   :  { %1762 = vmatprep.mubr.bf16.mxu0 %v9412_v62 }
 0x62a   :  { %1685 = vmatpush1.bf16.msra.mxu1 %v9083_v28  ;;  %1733 = vmatpush1.bf16.msra.mxu0 %v9980_v32  ;;  %v8749_v28 = vpack.c.bf16 %v2228_v27, %v2227_v23 }
 0x62b   :  { %1871 = vmatprep.subr.bf16.mxu1 %v9989_v45  ;;  %1830 = vmatprep.subr.bf16.mxu0 %v9412_v62 }
 0x62d   :  { %1701 = vmatmul.mubr.bf16.vlgmr.msra.gmra.mrb[44].mxu1 %v1318_v36  ;;  %7279 = vmatmul.mubr.msk.bf16.vlgmr.msra.gmra.mrb[40].mxu0 %vm1205_vm3, %v10120_v13 }
 0x62e   :  { %1831 = vmatpush1.bf16.msra.mxu0 %v9084_v35  ;;  %1872 = vmatpush1.bf16.msra.mxu1 %v9991_v46 }
 0x62f   :  { %7290 = vmatprep.subr.msk.bf16.mxu1 %vm166_vm1, %v9986_v43  ;;  %1832 = vmatprep.subr.bf16.mxu0 %v9412_v62 }
 0x630   :  { %1903 = vmatprep.mubr.bf16.mxu1 %v9412_v62 }
 0x632   :  { %1833 = vmatpush1.bf16.msra.mxu0 %v9085_v34  ;;  %1874 = vmatpush1.bf16.msra.mxu1 %v9998_v47 }
 0x633   :  { %1834 = vmatprep.subr.bf16.mxu0 %v9412_v62  ;;  %1917 = vmatprep.subr.bf16.mxu1 %v9412_v62 }
 0x635   :  { %7291 = vmatmul.mubr.msk.bf16.vlgmr.msra.gmra.mrb[48].mxu1 %vm1205_vm3, %v10120_v13 }
 0x636   :  { %1835 = vmatpush1.bf16.msra.mxu0 %v9086_v19  ;;  %1918 = vmatpush1.bf16.msra.mxu1 %v9084_v35  ;;  %v2230_v35 = vld [vmem:[%s11847_s7 + $0x48] sm:$0xff] }
 0x637   :  { %1836 = vmatprep.subr.bf16.mxu0 %v9412_v62  ;;  %1919 = vmatprep.subr.bf16.mxu1 %v9412_v62  ;;  %v8752_v36 = vpack.c.bf16 %v2230_v35, %v2229_v33 }
 0x63a   :  { %1837 = vmatpush1.bf16.msra.mxu0 %v9087_v37  ;;  %1920 = vmatpush1.bf16.msra.mxu1 %v9085_v34  ;;  %v2231_v34 = vld [vmem:[%s11847_s7 + $0x50] sm:$0xff] }
 0x63b   :  { %1838 = vmatprep.subr.bf16.mxu0 %v9412_v62  ;;  %1921 = vmatprep.subr.bf16.mxu1 %v9412_v62 }
 0x63e   :  { %1839 = vmatpush1.bf16.msra.mxu0 %v9088_v38  ;;  %1922 = vmatpush1.bf16.msra.mxu1 %v9086_v19  ;;  %v2232_v19 = vld [vmem:[%s11847_s7 + $0x58] sm:$0xff] }
 0x63f   :  { %1840 = vmatprep.subr.bf16.mxu0 %v9412_v62  ;;  %1923 = vmatprep.subr.bf16.mxu1 %v9412_v62 }
 0x642   :  { %1841 = vmatpush1.bf16.msra.mxu0 %v9089_v39  ;;  %1924 = vmatpush1.bf16.msra.mxu1 %v9087_v37  ;;  %v8755_v37 = vpack.c.bf16 %v2232_v19, %v2231_v34 }
 0x643   :  { %1842 = vmatprep.subr.bf16.mxu0 %v9412_v62  ;;  %1925 = vmatprep.subr.bf16.mxu1 %v9412_v62 }
 0x646   :  { %1843 = vmatpush1.bf16.msra.mxu0 %v9090_v24  ;;  %1926 = vmatpush1.bf16.msra.mxu1 %v9088_v38  ;;  %v2233_v38 = vld [vmem:[%s11847_s7 + $0x60] sm:$0xff] }
 0x647   :  { %1844 = vmatprep.subr.bf16.mxu0 %v9412_v62  ;;  %1927 = vmatprep.subr.bf16.mxu1 %v9412_v62 }
 0x64a   :  { %1845 = vmatpush1.bf16.msra.mxu0 %v9091_v40  ;;  %1928 = vmatpush1.bf16.msra.mxu1 %v9089_v39  ;;  %v2234_v39 = vld [vmem:[%s11847_s7 + $0x68] sm:$0xff] }
 0x64b   :  { %1846 = vmatprep.subr.bf16.mxu0 %v9412_v62  ;;  %1929 = vmatprep.subr.bf16.mxu1 %v9412_v62 }
 0x64e   :  { %1847 = vmatpush1.bf16.msra.mxu0 %v9092_v41  ;;  %1930 = vmatpush1.bf16.msra.mxu1 %v9090_v24  ;;  %v8758_v24 = vpack.c.bf16 %v2234_v39, %v2233_v38 }
 0x64f   :  { %1980 = vmatprep.subr.bf16.mxu0 %v9963_v17  ;;  %1931 = vmatprep.subr.bf16.mxu1 %v9412_v62 }
 0x652   :  { %1932 = vmatpush1.bf16.msra.mxu1 %v9091_v40  ;;  %v2235_v40 = vld [vmem:[%s11847_s7 + $0x70] sm:$0xff] }
 0x653   :  { %1933 = vmatprep.subr.bf16.mxu1 %v9412_v62 }
 0x656   :  { %1934 = vmatpush1.bf16.msra.mxu1 %v9092_v41  ;;  %v2236_v41 = vld [vmem:[%s11847_s7 + $0x78] sm:$0xff] }
 0x657   :  { %2121 = vmatprep.subr.bf16.mxu1 %v9989_v45  ;;  %v10189_v45 = vpack.c.bf16 %v9862_v59, %v9862_v59  ;;  %v9094_v59 = vld [vmem:[%s11872_s21 + $0xe0] sm:$0xff]  }
 0x700   :  { %v1764_v42 = vpop.f32.mrb[40].mxu0 }
 0x701   :  { %v1771_v44 = vpack.c.bf16 %v1764_v42, %v1764_v42  ;;  %v1766_v31 = vpop.f32.mrb[41].mxu0  ;;  %v8761_v42 = vpack.c.bf16 %v2236_v41, %v2235_v40 }
 0x702   :  { %v1772_v49 = vpack.c.bf16 %v1766_v31, %v1766_v31  ;;  %v1768_v50 = vpop.f32.mrb[42].mxu0 }
 0x703   :  { %v1769_v51 = vpop.f32.mrb[43].mxu0 }
 0x704   :  { %7289 = vmatprep.mubr.msk.bf16.mxu0 %vm68_vm13, %v1772_v49 }
 0x705   :  { %1863 = vmatmul.mubr.bf16.vlgmr.msra.gmra.mrb[36].mxu0 %v1771_v44 }
 0x706   :  { %1981 = vmatpush1.bf16.msra.mxu0 %v9965_v22  ;;  %2012 = vmatprep.mubr.bf16.mxu0 %v9412_v62  ;;  %v9093_v22 = vld [vmem:[%s11872_s21 + $0xd8] sm:$0xff]  }
 0x707   :  { %7311 = vmatprep.subr.msk.bf16.mxu0 %vm166_vm1, %v9968_v26  ;;  %v9095_v26 = vld [vmem:[%s11872_s21 + $0xe8] sm:$0xff]  }
 0x708   :  { %v1905_v17 = vpop.f32.mrb[48].mxu1 }
 0x709   :  { %v1907_v52 = vpop.f32.mrb[49].mxu1  ;;  %v1912_v55 = vpack.c.bf16 %v1905_v17, %v1905_v17 }
 0x70a   :  { %v1913_v53 = vpack.c.bf16 %v1907_v52, %v1907_v52  ;;  %1983 = vmatpush1.bf16.msra.mxu0 %v9980_v32  ;;  %v1909_v54 = vpop.f32.mrb[50].mxu1  ;;  %v9096_v32 = vld [vmem:[%s11872_s21 + $0xf0] sm:$0xff]  }
 0x70b   :  { %v1910_v56 = vpop.f32.mrb[51].mxu1  ;;  %2080 = vmatprep.subr.bf16.mxu0 %v9412_v62 }
 0x70c   :  { %7292 = vmatprep.mubr.msk.bf16.mxu1 %vm68_vm13, %v1913_v53 }
 0x70d   :  { %1950 = vmatmul.mubr.bf16.vlgmr.msra.gmra.mrb[44].mxu1 %v1912_v55  ;;  %7312 = vmatmul.mubr.msk.bf16.vlgmr.msra.gmra.mrb[44].mxu0 %vm1205_vm3, %v10189_v45 }
 0x70e   :  { %2122 = vmatpush1.bf16.msra.mxu1 %v9991_v46  ;;  %2153 = vmatprep.mubr.bf16.mxu1 %v9412_v62  ;;  %v9098_v46 = vld [vmem:[%s11872_s21 + $0x100] sm:$0xff]  }
 0x70f   :  { %7323 = vmatprep.subr.msk.bf16.mxu1 %vm166_vm1, %v9986_v43  ;;  %2081 = vmatpush1.bf16.msra.mxu0 %v9093_v22  ;;  %v9097_v43 = vld [vmem:[%s11872_s21 + $0xf8] sm:$0xff]   ;;  %vm80_vm1 = vcmask 261120  }
 0x710   :  { %2082 = vmatprep.subr.bf16.mxu0 %v9412_v62  ;;  %83 = vst.msk [vmem:[#allocation3 + $0x18] sm:$0xff] %vm80_vm1, %v10262_v1  ;;  %81 = vst.msk [vmem:[#allocation3 + $0x8] sm:$0xff] %vm80_vm1, %v10262_v1 }
 0x712   :  { %2124 = vmatpush1.bf16.msra.mxu1 %v9998_v47  ;;  %v9099_v47 = vld [vmem:[%s11872_s21 + $0x108] sm:$0xff]  }
 0x713   :  { %2083 = vmatpush1.bf16.msra.mxu0 %v9094_v59  ;;  %2167 = vmatprep.subr.bf16.mxu1 %v9412_v62 }
 0x714   :  { %2084 = vmatprep.subr.bf16.mxu0 %v9412_v62 }
 0x715   :  { %7324 = vmatmul.mubr.msk.bf16.vlgmr.msra.gmra.mrb[52].mxu1 %vm1205_vm3, %v10189_v45  ;;  %vm2641_vm3 = vcmask 1044480  }
 0x716   :  { %2168 = vmatpush1.bf16.msra.mxu1 %v9093_v22 }
 0x717   :  { %2085 = vmatpush1.bf16.msra.mxu0 %v9095_v26  ;;  %2169 = vmatprep.subr.bf16.mxu1 %v9412_v62 }
 0x718   :  { %2086 = vmatprep.subr.bf16.mxu0 %v9412_v62 }
 0x71a   :  { %2170 = vmatpush1.bf16.msra.mxu1 %v9094_v59 }
 0x71b   :  { %2087 = vmatpush1.bf16.msra.mxu0 %v9096_v32  ;;  %2171 = vmatprep.subr.bf16.mxu1 %v9412_v62 }
 0x71c   :  { %2088 = vmatprep.subr.bf16.mxu0 %v9412_v62 }
 0x71e   :  { %2172 = vmatpush1.bf16.msra.mxu1 %v9095_v26 }
 0x71f   :  { %2089 = vmatpush1.bf16.msra.mxu0 %v9097_v43  ;;  %2173 = vmatprep.subr.bf16.mxu1 %v9412_v62 }
 0x720   :  { %2090 = vmatprep.subr.bf16.mxu0 %v9412_v62 }
 0x722   :  { %2174 = vmatpush1.bf16.msra.mxu1 %v9096_v32 }
 0x723   :  { %2091 = vmatpush1.bf16.msra.mxu0 %v9098_v46  ;;  %2175 = vmatprep.subr.bf16.mxu1 %v9412_v62 }
 0x724   :  { %2092 = vmatprep.subr.bf16.mxu0 %v9412_v62 }
 0x726   :  { %2176 = vmatpush1.bf16.msra.mxu1 %v9097_v43 }
 0x727   :  { %2093 = vmatpush1.bf16.msra.mxu0 %v9099_v47  ;;  %2177 = vmatprep.subr.bf16.mxu1 %v9412_v62 }
 0x728   :  { %2094 = vmatprep.subr.bf16.mxu0 %v9412_v62 }
 0x72a   :  { %2178 = vmatpush1.bf16.msra.mxu1 %v9098_v46 }
 0x72b   :  { %2095 = vmatpush1.bf16.msra.mxu0 %v9100_v57  ;;  %2179 = vmatprep.subr.bf16.mxu1 %v9412_v62 }
 0x72c   :  { %2096 = vmatprep.subr.bf16.mxu0 %v9412_v62 }
 0x72e   :  { %2180 = vmatpush1.bf16.msra.mxu1 %v9099_v47 }
 0x72f   :  { %2181 = vmatprep.subr.bf16.mxu1 %v9412_v62  ;;  %2097 = vmatpush1.bf16.msra.mxu0 %v9101_v58 }
 0x730   :  { %8739 = vmatprep.subr.bf16.mxu0 %v9413_v18 }
 0x732   :  { %2182 = vmatpush1.bf16.msra.mxu1 %v9100_v57 }
 0x733   :  { %2183 = vmatprep.subr.bf16.mxu1 %v9412_v62 }
 0x736   :  { %2184 = vmatpush1.bf16.msra.mxu1 %v9101_v58 }
 0x737   :  { %8766 = vmatprep.subr.bf16.mxu1 %v9413_v18 }
 0x7e0   :  { %v2014_v61 = vpop.f32.mrb[44].mxu0 }
 0x7e1   :  { %v2021_v63 = vpack.c.bf16 %v2014_v61, %v2014_v61  ;;  %v2016_v0 = vpop.f32.mrb[45].mxu0  ;;  %v2309_v61 = vld [vmem:[%s11846_s6 + $0x8] sm:$0xff] }
 0x7e2   :  { %v2022_v10 = vpack.c.bf16 %v2016_v0, %v2016_v0  ;;  %v2018_v60 = vpop.f32.mrb[46].mxu0 }
 0x7e3   :  { %v2019_v15 = vpop.f32.mrb[47].mxu0 }
 0x7e4   :  { %7322 = vmatprep.mubr.msk.bf16.mxu0 %vm68_vm13, %v2022_v10 }
 0x7e5   :  { %2113 = vmatmul.mubr.bf16.vlgmr.msra.gmra.mrb[36].mxu0 %v2021_v63  ;;  %v8764_v63 = vpack.c.bf16 %v2309_v61, %v2308_v5 }
 0x7e6   :  { %8741 = vmatpush3.bf16.msra.mxu0 %v8740_v14  ;;  %8499 = vmatprep.mubr.msk.f32.mxu0 %vm9410_vm0, %v10262_v1 }
 0x7e7   :  { %8742 = vmatprep.subr.bf16.mxu0 %v9413_v18 }
 0x7e8   :  { %v2155_v2 = vpop.f32.mrb[52].mxu1 }
 0x7e9   :  { %v2157_v3 = vpop.f32.mrb[53].mxu1  ;;  %v2162_v7 = vpack.c.bf16 %v2155_v2, %v2155_v2 }
 0x7ea   :  { %v2163_v4 = vpack.c.bf16 %v2157_v3, %v2157_v3  ;;  %v2159_v6 = vpop.f32.mrb[54].mxu1  ;;  %8744 = vmatpush3.bf16.msra.mxu0 %v8743_v29 }
 0x7eb   :  { %v2160_v8 = vpop.f32.mrb[55].mxu1  ;;  %8745 = vmatprep.subr.bf16.mxu0 %v9413_v18 }
 0x7ec   :  { %7325 = vmatprep.mubr.msk.bf16.mxu1 %vm68_vm13, %v2163_v4 }
 0x7ed   :  { %2200 = vmatmul.mubr.bf16.vlgmr.msra.gmra.mrb[44].mxu1 %v2162_v7 }
 0x7ee   :  { %8768 = vmatpush3.bf16.msra.mxu1 %v8740_v14  ;;  %8541 = vmatprep.mubr.msk.f32.mxu1 %vm9410_vm0, %v10262_v1  ;;  %v10333_v14 = vsub.s32 0, %v9560_v9 }
 0x7ef   :  { %8769 = vmatprep.subr.bf16.mxu1 %v9413_v18  ;;  %8747 = vmatpush3.bf16.msra.mxu0 %v8746_v16 }
 0x7f0   :  { %8748 = vmatprep.subr.bf16.mxu0 %v9413_v18 }
 0x7f2   :  { %8771 = vmatpush3.bf16.msra.mxu1 %v8743_v29 }
 0x7f3   :  { %8772 = vmatprep.subr.bf16.mxu1 %v9413_v18  ;;  %8750 = vmatpush3.bf16.msra.mxu0 %v8749_v28 }
 0x7f4   :  { %8751 = vmatprep.subr.bf16.mxu0 %v9413_v18 }
 0x7f6   :  { %8774 = vmatpush3.bf16.msra.mxu1 %v8746_v16 }
 0x7f7   :  { %8775 = vmatprep.subr.bf16.mxu1 %v9413_v18  ;;  %8753 = vmatpush3.bf16.msra.mxu0 %v8752_v36 }
 0x7f8   :  { %8754 = vmatprep.subr.bf16.mxu0 %v9413_v18 }
 0x7fa   :  { %8777 = vmatpush3.bf16.msra.mxu1 %v8749_v28 }
 0x7fb   :  { %8778 = vmatprep.subr.bf16.mxu1 %v9413_v18  ;;  %8756 = vmatpush3.bf16.msra.mxu0 %v8755_v37 }
 0x7fc   :  { %8757 = vmatprep.subr.bf16.mxu0 %v9413_v18 }
 0x7fe   :  { %8780 = vmatpush3.bf16.msra.mxu1 %v8752_v36 }
 0x7ff   :  { %8781 = vmatprep.subr.bf16.mxu1 %v9413_v18  ;;  %8759 = vmatpush3.bf16.msra.mxu0 %v8758_v24 }
 0x800   :  { %8760 = vmatprep.subr.bf16.mxu0 %v9413_v18 }
 0x802   :  { %8783 = vmatpush3.bf16.msra.mxu1 %v8755_v37 }
 0x803   :  { %8784 = vmatprep.subr.bf16.mxu1 %v9413_v18  ;;  %8762 = vmatpush3.bf16.msra.mxu0 %v8761_v42 }
 0x804   :  { %8763 = vmatprep.subr.bf16.mxu0 %v9413_v18 }
 0x806   :  { %8786 = vmatpush3.bf16.msra.mxu1 %v8758_v24 }
 0x807   :  { %8787 = vmatprep.subr.bf16.mxu1 %v9413_v18 }
 0x80a   :  { %8789 = vmatpush3.bf16.msra.mxu1 %v8761_v42 }
 0x8b8   :  { %v2114_v44 = vpop.f32.mrb[36].mxu0 }
 0x8b9   :  { %v2208_v31 = vrot.slane %v2114_v44, 4  ;;  %v2116_v49 = vpop.f32.mrb[37].mxu0 }
 0x8ba   :  { %v2117_v50 = vpop.f32.mrb[38].mxu0 }
 0x8bb   :  { %v2209_v51 = vadd.f32 %v2208_v31, %v2114_v44  ;;  %v2118_v17 = vpop.f32.mrb[39].mxu0  ;;  %v7329_v50 = vld [vmem:[%s11845_s5] ss:$0 sm:$0xff] }
 0x8bd   :  { %v2210_v52 = vrot.slane %v2209_v51, 2 }
 0x8bf   :  { %v2211_v22 = vadd.f32 %v2210_v52, %v2209_v51 }
 0x8c0   :  { %v2201_v53 = vpop.f32.mrb[44].mxu1 }
 0x8c1   :  { %v2214_v54 = vrot.slane %v2201_v53, 4  ;;  %v2203_v55 = vpop.f32.mrb[45].mxu1  ;;  %v2212_v43 = vrot.slane %v2211_v22, 1 }
 0x8c2   :  { %v2204_v56 = vpop.f32.mrb[46].mxu1 }
 0x8c3   :  { %v2215_v59 = vadd.f32 %v2214_v54, %v2201_v53  ;;  %v2205_v26 = vpop.f32.mrb[47].mxu1  ;;  %v2213_v57 = vadd.f32 %v2212_v43, %v2211_v22 }
 0x8c5   :  { %v2216_v32 = vrot.slane %v2215_v59, 2 }
 0x8c7   :  { %v2217_v46 = vadd.f32 %v2216_v32, %v2215_v59 }
 0x8c9   :  { %v2218_v47 = vrot.slane %v2217_v46, 1 }
 0x8cb   :  { %v2219_v58 = vadd.f32 %v2218_v47, %v2217_v46 }
 0x8cd   :  { %v2220_v21 = vadd.f32 %v2219_v58, %v2213_v57 }
 0x8cf   :  { %8500 = vmatmul.mubr.f32.vlgmr.msra.gmra.mrb[48].mxu0 %v2220_v21 }
 0x8d0   :  { %8506 = vmatprep.mubr.msk.f32.mxu0 %vm9410_vm0, %v10262_v1  ;;  %8765 = vmatpush3.bf16.msra.mxu0 %v8764_v63 }
 0x8d1   :  { %8790 = vmatprep.subr.bf16.mxu0 %v9413_v18 }
 0x9a2   :  { %v2303_v0 = vpop.f32.mrb[48].mxu0 }
 0x9a3   :  { %v2307_v10 = vmul.f32 0.0078125, %v2303_v0  ;;  %v8501_v60 = vpop.f32.mrb[49].mxu0 }
 0x9a5   :  { %8507 = vmatmul.mubr.msk.f32.vlgmr.msra.gmra.mrb[50].mxu0 %vm68_vm13, %v2307_v10 }
 0x9a6   :  { %8792 = vmatpush3.bf16.msra.mxu0 %v8764_v63  ;;  %8548 = vmatprep.mubr.msk.f32.mxu0 %vm9410_vm0, %v10262_v1 }
 0xa78   :  { %v2379_v15 = vpop.f32.mrb[50].mxu0 }
 0xa79   :  { %v2386_v20 = vrot.slane %v2379_v15, %v10333_v14  ;;  %v8508_v25 = vpop.f32.mrb[51].mxu0 }
 0xa7b   :  { %v2387_v29 = vsub.f32 %v2114_v44, %v2386_v20  ;;  %v2395_v2 = vsub.f32 %v2201_v53, %v2386_v20  ;;  %v7328_v44 = vld [vmem:[%s11873_s3] ss:$0 sm:$0xff] }
 0xa7d   :  { %v2388_v3 = vmul.f32 %v2387_v29, %v2387_v29  ;;  %v2396_v4 = vmul.f32 %v2395_v2, %v2395_v2 }
 0xa7f   :  { %v2389_v6 = vrot.slane %v2388_v3, 4  ;;  %v2397_v7 = vrot.slane %v2396_v4, 4 }
 0xa81   :  { %v2390_v8 = vadd.f32 %v2389_v6, %v2388_v3  ;;  %v2398_v11 = vadd.f32 %v2397_v7, %v2396_v4  ;;  %v9102_v3 = vld [vmem:[%s11848_s8 + $0x50] sm:$0xff]   ;;  %v9103_v4 = vld [vmem:[%s11848_s8 + $0x58] sm:$0xff]   ;;  %v9104_v6 = vld [vmem:[%s11848_s8 + $0x60] sm:$0xff]  }
 0xa82   :  { %v9107_v7 = vld [vmem:[%s11848_s8 + $0x78] sm:$0xff]  }
 0xa83   :  { %v2391_v12 = vrot.slane %v2390_v8, 2  ;;  %v2399_v16 = vrot.slane %v2398_v11, 2 }
 0xa85   :  { %v2392_v23 = vadd.f32 %v2391_v12, %v2390_v8  ;;  %v2400_v27 = vadd.f32 %v2399_v16, %v2398_v11  ;;  %v9108_v8 = vld [vmem:[%s11848_s8 + $0x80] sm:$0xff]   ;;  %v9109_v11 = vld [vmem:[%s11848_s8 + $0x88] sm:$0xff]   ;;  %v9110_v12 = vld [vmem:[%s11848_s8 + $0x90] sm:$0xff]  }
 0xa86   :  { %v9111_v16 = vld [vmem:[%s11848_s8 + $0x98] sm:$0xff]  }
 0xa87   :  { %v2393_v28 = vrot.slane %v2392_v23, 1  ;;  %v2401_v33 = vrot.slane %v2400_v27, 1 }
 0xa89   :  { %v2394_v35 = vadd.f32 %v2393_v28, %v2392_v23  ;;  %v2402_v36 = vadd.f32 %v2401_v33, %v2400_v27 }
 0xa8b   :  { %v2403_v34 = vadd.f32 %v2402_v36, %v2394_v35 }
 0xa8d   :  { %8542 = vmatmul.mubr.f32.vlgmr.msra.gmra.mrb[56].mxu1 %v2403_v34  ;;  %v9112_v34 = vld [vmem:[%s11848_s8] sm:$0xff]  }
 0xa8e   :  { %2799 = vmatprep.mubr.bf16.mxu1 %v9412_v62 }
 0xb60   :  { %v2470_v19 = vpop.f32.mrb[56].mxu1 }
 0xb61   :  { %v2474_v37 = vmul.f32 0.0078125, %v2470_v19  ;;  %v8543_v38 = vpop.f32.mrb[57].mxu1 }
 0xb63   :  { %v2475_v39 = vadd.f32 1e-05, %v2474_v37 }
 0xb65   :  { %9366 = vrsqrt.f32 %v2475_v39 }
 0xb6f   :  { %v9367_v24 = vpop.eup %9366 }
 0xb70   :  { %8549 = vmatmul.mubr.msk.f32.vlgmr.msra.gmra.mrb[52].mxu0 %vm68_vm13, %v9367_v24 }
 0xb71   :  { %2680 = vmatprep.mubr.bf16.mxu0 %v9412_v62 }
 0xc43   :  { %v2546_v40 = vpop.f32.mrb[52].mxu0 }
 0xc44   :  { %v2553_v41 = vrot.slane %v2546_v40, %v10333_v14  ;;  %v8550_v42 = vpop.f32.mrb[53].mxu0  ;;  %v9113_v40 = vld [vmem:[%s11848_s8 + $0x8] sm:$0xff]  }
 0xc46   :  { %v2554_v31 = vmul.f32 %v2553_v41, %v2387_v29  ;;  %v2574_v49 = vmul.f32 %v2553_v41, %v2395_v2 }
 0xc48   :  { %v2562_v51 = vmul.f32 %v7328_v44, %v2554_v31  ;;  %v2575_v17 = vmul.f32 %v7328_v44, %v2574_v49 }
 0xc4a   :  { %v2570_v52 = vadd.f32 %v7329_v50, %v2562_v51  ;;  %v2576_v53 = vadd.f32 %v7329_v50, %v2575_v17  ;;  %v9114_v51 = vld [vmem:[%s11848_s8 + $0x10] sm:$0xff]  }
 0xc4c   :  { %vm2577_vm13 = vcmp.ge.f32.partialorder %v2576_v53, 0.0  ;;  %v2578_v54 = vmul.f32 0.2, %v2576_v53  ;;  %vm2571_vm6 = vcmp.ge.f32.partialorder %v2570_v52, 0.0  ;;  %v2572_v55 = vmul.f32 0.2, %v2570_v52 }
 0xc4e   :  { %v2579_v56 = vsel %vm2577_vm13, %v2576_v53, %v2578_v54  ;;  %v2573_v22 = vsel %vm2571_vm6, %v2570_v52, %v2572_v55  ;;  %vm91_vm13 = vcmask 519168  }
 0xc4f   :  { %v2594_v59 = vrot.slane %v2579_v56, 5  ;;  %v2581_v26 = vrot.slane %v2573_v22, 7  ;;  %v9115_v56 = vld [vmem:[%s11848_s8 + $0x18] sm:$0xff]   ;;  %v9116_v22 = vld [vmem:[%s11848_s8 + $0x20] sm:$0xff]  }
 0xc51   :  { %2595 = vrot.lane.b32.xlu1 %v2594_v59, %s9414_s27  ;;  %2582 = vrot.lane.b32.xlu0 %v2581_v26, %s9414_s27  ;;  %v9117_v59 = vld [vmem:[%s11848_s8 + $0x28] sm:$0xff]   ;;  %v9118_v26 = vld [vmem:[%s11848_s8 + $0x30] sm:$0xff]  }
 0xcc3   :  { %v2596_v32 = vpop.permute.xlu1 %2595  ;;  %v2583_v43 = vpop.permute.xlu0 %2582 }
 0xcc4   :  { %2599 = vst.msk [vmem:[#allocation3 + $0x10] sm:$0xf8] %vm2598_vm8, %v2596_v32 }
 0xcc5   :  { %2601 = vst.msk [vmem:[#allocation3 + $0x18] sm:$0xf8] %vm2600_vm9, %v2596_v32  ;;  %vm4052_vm9 = vcmask 1047815  }
 0xcc6   :  { %2603 = vst.msk [vmem:[#allocation3 + $0x20] sm:$0x7] %vm2602_vm10, %v2596_v32  ;;  %vm4054_vm10 = vcmask 261127  }
 0xcc7   :  { %2605 = vst.msk [vmem:[#allocation3 + $0x28] sm:$0x7] %vm2604_vm11, %v2596_v32  ;;  %v9119_v32 = vld [vmem:[%s11848_s8 + $0x38] sm:$0xff]   ;;  %vm4056_vm11 = vcmask 1042688  }
 0xcc8   :  { %2586 = vst.msk [vmem:[#allocation3] sm:$0xfe] %vm2585_vm12, %v2583_v43  ;;  %vm4058_vm12 = vcmask 256000  }
 0xcc9   :  { %2588 = vst.msk [vmem:[#allocation3 + $0x8] sm:$0xfe] %vm2587_vm14, %v2583_v43  ;;  %vm4043_vm14 = vcmask 1044737  }
 0xcca   :  { %2590 = vst.msk [vmem:[#allocation3 + $0x10] sm:$0x1] %vm2589_vm15, %v2583_v43  ;;  %vm4045_vm15 = vcmask 258049  }
 0xccb   :  { %2592 = vst.msk [vmem:[#allocation3 + $0x18] sm:$0x1] %vm2591_vm2, %v2583_v43  ;;  %v2612_v10 = vld [vmem:[#allocation3 + $0x10] sm:$0xfc]  ;;  %vm5116_vm2 = vcmask 518144  }
 0xccc   :  { %v2613_v5 = vld [vmem:[#allocation3 + $0x18] sm:$0xfc]  ;;  %v9120_v43 = vld [vmem:[%s11848_s8 + $0x40] sm:$0xff]  }
 0xccd   :  { %v2614_v60 = vld [vmem:[#allocation3 + $0x20] sm:$0xf] }
 0xcce   :  { %v2615_v61 = vld [vmem:[#allocation3 + $0x28] sm:$0xf]  ;;  %v2616_v15 = vpack.c.bf16 %v2614_v60, %v2612_v10  ;;  %v9128_v10 = vld [vmem:[%s11848_s8 + $0xd0] sm:$0xff]  }
 0xccf   :  { %v2606_v57 = vld [vmem:[#allocation3] sm:$0xff]  ;;  %v2617_v0 = vpack.c.bf16 %v2615_v61, %v2613_v5  ;;  %v9123_v5 = vld [vmem:[%s11848_s8 + $0xa8] sm:$0xff]   ;;  %v9129_v60 = vld [vmem:[%s11848_s8 + $0xd8] sm:$0xff]  }
 0xcd0   :  { %v2607_v46 = vld [vmem:[#allocation3 + $0x8] sm:$0xff]  ;;  %v2693_v29 = vrot.slane %v2616_v15, 1  ;;  %v9124_v61 = vld [vmem:[%s11848_s8 + $0xb0] sm:$0xff]   ;;  %v9130_v15 = vld [vmem:[%s11848_s8 + $0xe0] sm:$0xff]  }
 0xcd1   :  { %v2608_v21 = vld [vmem:[#allocation3 + $0x10] sm:$0x3]  ;;  %v10360_v25 = vrot.slane %v2617_v0, 1 }
 0xcd2   :  { %v2609_v47 = vld [vmem:[#allocation3 + $0x18] sm:$0x3]  ;;  %v2610_v63 = vpack.c.bf16 %v2608_v21, %v2606_v57  ;;  %v10373_v2 = vsel %vm2641_vm3, %v2693_v29, 0  ;;  %v9122_v57 = vld [vmem:[%s11848_s8 + $0xa0] sm:$0xff]  }
 0xcd3   :  { %v10351_v58 = vpack.c.bf16 %v2609_v47, %v2607_v46  ;;  %v9121_v46 = vld [vmem:[%s11848_s8 + $0x48] sm:$0xff]   ;;  %v9126_v0 = vld [vmem:[%s11848_s8 + $0xc0] sm:$0xff]  }
 0xcd4   :  { %v10358_v20 = vsel %vm2641_vm3, %v2610_v63, 0  ;;  %v9125_v63 = vld [vmem:[%s11848_s8 + $0xb8] sm:$0xff]   ;;  %v9131_v29 = vld [vmem:[%s11848_s8 + $0xe8] sm:$0xff]  }
 0xcd5   :  { %7330 = vmatprep.subr.msk.bf16.mxu0 %vm2641_vm3, %v10351_v58  ;;  %7354 = vmatprep.subr.msk.bf16.mxu1 %vm2641_vm3, %v10351_v58 }
 0xcd6   :  { %2649 = vmatpush1.bf16.msra.mxu0 %v10358_v20  ;;  %2768 = vmatpush1.bf16.msra.mxu1 %v10358_v20 }
 0xcd7   :  { %7332 = vmatprep.subr.msk.bf16.mxu0 %vm2641_vm3, %v10360_v25  ;;  %7378 = vmatprep.subr.msk.bf16.mxu1 %vm2641_vm3, %v10360_v25 }
 0xcd9   :  { %7355 = vmatmul.mubr.msk.bf16.vlgmr.msra.gmra.mrb[60].mxu1 %vm2638_vm4, %v10010_v48  ;;  %7331 = vmatmul.mubr.msk.bf16.vlgmr.msra.gmra.mrb[56].mxu0 %vm2638_vm4, %v9977_v30 }
 0xcda   :  { %2702 = vmatpush1.bf16.msra.mxu0 %v10373_v2  ;;  %3017 = vmatpush1.bf16.msra.mxu1 %v10373_v2 }
 0xcdb   :  { %3048 = vmatprep.mubr.bf16.mxu1 %v9412_v62  ;;  %2733 = vmatprep.mubr.bf16.mxu0 %v9412_v62 }
 0xcdc   :  { %2873 = vmatprep.subr.bf16.mxu0 %v9412_v62  ;;  %3062 = vmatprep.subr.bf16.mxu1 %v9412_v62 }
 0xce1   :  { %7379 = vmatmul.mubr.msk.bf16.vlgmr.msra.gmra.mrb[64].mxu1 %vm2638_vm4, %v10010_v48  ;;  %7333 = vmatmul.mubr.msk.bf16.vlgmr.msra.gmra.mrb[60].mxu0 %vm2638_vm4, %v9977_v30  ;;  %v9105_v30 = vld [vmem:[%s11848_s8 + $0x68] sm:$0xff]   ;;  %v9106_v48 = vld [vmem:[%s11848_s8 + $0x70] sm:$0xff]  }
 0xce2   :  { %2874 = vmatpush1.bf16.msra.mxu0 %v9102_v3  ;;  %3063 = vmatpush1.bf16.msra.mxu1 %v9102_v3 }
 0xce3   :  { %2875 = vmatprep.subr.bf16.mxu0 %v9412_v62  ;;  %3064 = vmatprep.subr.bf16.mxu1 %v9412_v62 }
 0xce6   :  { %2876 = vmatpush1.bf16.msra.mxu0 %v9103_v4  ;;  %3065 = vmatpush1.bf16.msra.mxu1 %v9103_v4 }
 0xce7   :  { %2877 = vmatprep.subr.bf16.mxu0 %v9412_v62  ;;  %3066 = vmatprep.subr.bf16.mxu1 %v9412_v62 }
 0xcea   :  { %2878 = vmatpush1.bf16.msra.mxu0 %v9104_v6  ;;  %3067 = vmatpush1.bf16.msra.mxu1 %v9104_v6 }
 0xceb   :  { %2879 = vmatprep.subr.bf16.mxu0 %v9412_v62  ;;  %3068 = vmatprep.subr.bf16.mxu1 %v9412_v62 }
 0xcee   :  { %2880 = vmatpush1.bf16.msra.mxu0 %v9105_v30  ;;  %3069 = vmatpush1.bf16.msra.mxu1 %v9105_v30 }
 0xcef   :  { %2881 = vmatprep.subr.bf16.mxu0 %v9412_v62  ;;  %3070 = vmatprep.subr.bf16.mxu1 %v9412_v62 }
 0xcf2   :  { %2882 = vmatpush1.bf16.msra.mxu0 %v9106_v48  ;;  %3071 = vmatpush1.bf16.msra.mxu1 %v9106_v48 }
 0xcf3   :  { %2883 = vmatprep.subr.bf16.mxu0 %v9412_v62  ;;  %3072 = vmatprep.subr.bf16.mxu1 %v9412_v62 }
 0xcf6   :  { %2884 = vmatpush1.bf16.msra.mxu0 %v9107_v7  ;;  %3073 = vmatpush1.bf16.msra.mxu1 %v9107_v7 }
 0xcf7   :  { %2885 = vmatprep.subr.bf16.mxu0 %v9412_v62  ;;  %3074 = vmatprep.subr.bf16.mxu1 %v9412_v62 }
 0xcfa   :  { %2886 = vmatpush1.bf16.msra.mxu0 %v9108_v8  ;;  %3075 = vmatpush1.bf16.msra.mxu1 %v9108_v8 }
 0xcfb   :  { %2887 = vmatprep.subr.bf16.mxu0 %v9412_v62  ;;  %3076 = vmatprep.subr.bf16.mxu1 %v9412_v62 }
 0xcfe   :  { %2888 = vmatpush1.bf16.msra.mxu0 %v9109_v11  ;;  %3077 = vmatpush1.bf16.msra.mxu1 %v9109_v11 }
 0xcff   :  { %2889 = vmatprep.subr.bf16.mxu0 %v9412_v62  ;;  %3078 = vmatprep.subr.bf16.mxu1 %v9412_v62 }
 0xd02   :  { %2890 = vmatpush1.bf16.msra.mxu0 %v9110_v12  ;;  %3079 = vmatpush1.bf16.msra.mxu1 %v9110_v12 }
 0xd03   :  { %2891 = vmatprep.subr.bf16.mxu0 %v9412_v62  ;;  %3080 = vmatprep.subr.bf16.mxu1 %v9412_v62 }
 0xd06   :  { %2892 = vmatpush1.bf16.msra.mxu0 %v9111_v16  ;;  %3081 = vmatpush1.bf16.msra.mxu1 %v9111_v16 }
 0xd07   :  { %2976 = vmatprep.subr.bf16.mxu0 %v9412_v62  ;;  %3105 = vmatprep.subr.bf16.mxu1 %v9412_v62 }
 0xdac   :  { %v2801_v23 = vpop.f32.mrb[60].mxu1  ;;  %v10435_v27 = vpop.f32.mrb[56].mxu0 }
 0xdad   :  { %v2803_v28 = vpop.f32.mrb[61].mxu1  ;;  %v2684_v33 = vpop.f32.mrb[57].mxu0  ;;  %v2808_v38 = vpack.c.bf16 %v2801_v23, %v2801_v23  ;;  %v2689_v47 = vpack.c.bf16 %v10435_v27, %v10435_v27  ;;  %v9132_v23 = vld [vmem:[%s11848_s8 + $0xf0] sm:$0xff]   ;;  %v9134_v27 = vld [vmem:[%s11848_s8 + $0x100] sm:$0xff]  }
 0xdae   :  { %v2809_v35 = vpack.c.bf16 %v2803_v28, %v2803_v28  ;;  %v2805_v36 = vpop.f32.mrb[62].mxu1  ;;  %v2690_v19 = vpack.c.bf16 %v2684_v33, %v2684_v33  ;;  %v2686_v37 = vpop.f32.mrb[58].mxu0  ;;  %v9136_v28 = vld [vmem:[%s11848_s8 + $0x110] sm:$0xff]   ;;  %v9138_v33 = vld [vmem:[%s11848_s8 + $0x120] sm:$0xff]  }
 0xdaf   :  { %v2806_v39 = vpop.f32.mrb[63].mxu1  ;;  %v2687_v24 = vpop.f32.mrb[59].mxu0  ;;  %v9140_v36 = vld [vmem:[%s11848_s8 + $0x130] sm:$0xff]   ;;  %v3676_v37 = vld [vmem:[%s11852_s12 + $0x8] sm:$0xff] }
 0xdb0   :  { %7366 = vmatprep.mubr.msk.bf16.mxu0 %vm80_vm1, %v2809_v35  ;;  %v9139_v35 = vld [vmem:[%s11848_s8 + $0x128] sm:$0xff]  }
 0xdb1   :  { %2906 = vmatmul.mubr.bf16.vlgmr.msra.gmra.mrb[64].mxu0 %v2808_v38 }
 0xdb2   :  { %2977 = vmatpush1.bf16.msra.mxu0 %v9112_v34  ;;  %7377 = vmatprep.mubr.msk.bf16.mxu0 %vm80_vm1, %v2690_v19  ;;  %v3675_v19 = vld [vmem:[%s11852_s12] sm:$0xff] }
 0xdb3   :  { %2978 = vmatprep.subr.bf16.mxu0 %v9412_v62 }
 0xdb4   :  { %v3050_v41 = vpop.f32.mrb[64].mxu1  ;;  %v10446_v42 = vpop.f32.mrb[60].mxu0 }
 0xdb5   :  { %v3052_v44 = vpop.f32.mrb[65].mxu1  ;;  %v2737_v31 = vpop.f32.mrb[61].mxu0  ;;  %v3057_v52 = vpack.c.bf16 %v3050_v41, %v3050_v41  ;;  %v2742_v21 = vpack.c.bf16 %v10446_v42, %v10446_v42  ;;  %v10629_v41 = vpack.c.bf16 %v3676_v37, %v3675_v19  ;;  %v10715_v37 = vld [vmem:[#allocation4] sm:$0xff] }
 0xdb6   :  { %2979 = vmatpush1.bf16.msra.mxu0 %v9113_v40  ;;  %v3058_v49 = vpack.c.bf16 %v3052_v44, %v3052_v44  ;;  %v3054_v50 = vpop.f32.mrb[66].mxu1  ;;  %v2739_v17 = vpop.f32.mrb[62].mxu0  ;;  %v2743_v55 = vpack.c.bf16 %v2737_v31, %v2737_v31  ;;  %v3677_v44 = vld [vmem:[%s11852_s12 + $0x10] sm:$0xff]  ;;  %v3678_v31 = vld [vmem:[%s11852_s12 + $0x18] sm:$0xff]  ;;  %92 = vst.msk [vmem:[#allocation4 + $0x18] sm:$0xf] %vm91_vm13, %v10715_v37 }
 0xdb7   :  { %v3055_v53 = vpop.f32.mrb[67].mxu1  ;;  %2980 = vmatprep.subr.bf16.mxu0 %v9412_v62  ;;  %v2740_v54 = vpop.f32.mrb[63].mxu0  ;;  %vm5591_vm13 = vcmask 1043969  }
 0xdb8   :  { %7380 = vmatprep.mubr.msk.bf16.mxu1 %vm80_vm1, %v3058_v49  ;;  %v10639_v49 = vpack.c.bf16 %v3678_v31, %v3677_v44 }
 0xdb9   :  { %3095 = vmatmul.mubr.bf16.vlgmr.msra.gmra.mrb[68].mxu1 %v3057_v52 }
 0xdba   :  { %2981 = vmatpush1.bf16.msra.mxu0 %v9114_v51  ;;  %3106 = vmatpush1.bf16.msra.mxu1 %v9112_v34  ;;  %v9141_v34 = vld [vmem:[%s11848_s8 + $0x138] sm:$0xff]  }
 0xdbb   :  { %2982 = vmatprep.subr.bf16.mxu0 %v9412_v62  ;;  %3107 = vmatprep.subr.bf16.mxu1 %v9412_v62 }
 0xdbc   :  { %7381 = vmatprep.mubr.msk.bf16.mxu1 %vm80_vm1, %v2743_v55  ;;  %v3679_v55 = vld [vmem:[%s11852_s12 + $0x20] sm:$0xff] }
 0xdbe   :  { %2983 = vmatpush1.bf16.msra.mxu0 %v9115_v56  ;;  %3108 = vmatpush1.bf16.msra.mxu1 %v9113_v40 }
 0xdbf   :  { %2984 = vmatprep.subr.bf16.mxu0 %v9412_v62  ;;  %3109 = vmatprep.subr.bf16.mxu1 %v9412_v62 }
 0xdc2   :  { %2985 = vmatpush1.bf16.msra.mxu0 %v9116_v22  ;;  %3110 = vmatpush1.bf16.msra.mxu1 %v9114_v51 }
 0xdc3   :  { %2986 = vmatprep.subr.bf16.mxu0 %v9412_v62  ;;  %3111 = vmatprep.subr.bf16.mxu1 %v9412_v62 }
 0xdc6   :  { %2987 = vmatpush1.bf16.msra.mxu0 %v9117_v59  ;;  %3112 = vmatpush1.bf16.msra.mxu1 %v9115_v56  ;;  %v3680_v56 = vld [vmem:[%s11852_s12 + $0x28] sm:$0xff] }
 0xdc7   :  { %2988 = vmatprep.subr.bf16.mxu0 %v9412_v62  ;;  %3113 = vmatprep.subr.bf16.mxu1 %v9412_v62 }
 0xdca   :  { %2989 = vmatpush1.bf16.msra.mxu0 %v9118_v26  ;;  %3114 = vmatpush1.bf16.msra.mxu1 %v9116_v22  ;;  %v10655_v22 = vpack.c.bf16 %v3680_v56, %v3679_v55 }
 0xdcb   :  { %2990 = vmatprep.subr.bf16.mxu0 %v9412_v62  ;;  %3115 = vmatprep.subr.bf16.mxu1 %v9412_v62 }
 0xdce   :  { %2991 = vmatpush1.bf16.msra.mxu0 %v9119_v32  ;;  %3116 = vmatpush1.bf16.msra.mxu1 %v9117_v59  ;;  %v3681_v59 = vld [vmem:[%s11852_s12 + $0x30] sm:$0xff] }
 0xdcf   :  { %2992 = vmatprep.subr.bf16.mxu0 %v9412_v62  ;;  %3117 = vmatprep.subr.bf16.mxu1 %v9412_v62 }
 0xdd2   :  { %2993 = vmatpush1.bf16.msra.mxu0 %v9120_v43  ;;  %3118 = vmatpush1.bf16.msra.mxu1 %v9118_v26 }
 0xdd3   :  { %2994 = vmatprep.subr.bf16.mxu0 %v9412_v62  ;;  %3119 = vmatprep.subr.bf16.mxu1 %v9412_v62 }
 0xdd6   :  { %2995 = vmatpush1.bf16.msra.mxu0 %v9121_v46  ;;  %3120 = vmatpush1.bf16.msra.mxu1 %v9119_v32  ;;  %v3683_v32 = vld [vmem:[%s11852_s12 + $0x40] sm:$0xff] }
 0xdd7   :  { %7402 = vmatprep.subr.msk.bf16.mxu0 %vm2641_vm3, %v10351_v58  ;;  %3121 = vmatprep.subr.bf16.mxu1 %v9412_v62 }
 0xdd9   :  { %3009 = vmatmul.mubr.bf16.vlgmr.msra.gmra.mrb[64].mxu0 %v2689_v47  ;;  %v3685_v47 = vld [vmem:[%s11852_s12 + $0x50] sm:$0xff] }
 0xdda   :  { %3122 = vmatpush1.bf16.msra.mxu1 %v9120_v43  ;;  %3169 = vmatpush1.bf16.msra.mxu0 %v10358_v20  ;;  %v3684_v43 = vld [vmem:[%s11852_s12 + $0x48] sm:$0xff] }
 0xddb   :  { %3123 = vmatprep.subr.bf16.mxu1 %v9412_v62  ;;  %3200 = vmatprep.mubr.bf16.mxu0 %v9412_v62 }
 0xddc   :  { %3274 = vmatprep.subr.bf16.mxu0 %v9412_v62 }
 0xdde   :  { %3124 = vmatpush1.bf16.msra.mxu1 %v9121_v46  ;;  %v10675_v46 = vpack.c.bf16 %v3684_v43, %v3683_v32 }
 0xddf   :  { %7415 = vmatprep.subr.msk.bf16.mxu1 %vm2641_vm3, %v10360_v25 }
 0xde1   :  { %3138 = vmatmul.mubr.bf16.vlgmr.msra.gmra.mrb[68].mxu1 %v2742_v21  ;;  %7403 = vmatmul.mubr.msk.bf16.vlgmr.msra.gmra.mrb[68].mxu0 %vm2638_vm4, %v10120_v13 }
 0xde2   :  { %3275 = vmatpush1.bf16.msra.mxu0 %v9122_v57  ;;  %3316 = vmatpush1.bf16.msra.mxu1 %v10373_v2 }
 0xde3   :  { %3276 = vmatprep.subr.bf16.mxu0 %v9412_v62  ;;  %3347 = vmatprep.mubr.bf16.mxu1 %v9412_v62 }
 0xde4   :  { %3361 = vmatprep.subr.bf16.mxu1 %v9412_v62 }
 0xde6   :  { %3277 = vmatpush1.bf16.msra.mxu0 %v9123_v5 }
 0xde7   :  { %3278 = vmatprep.subr.bf16.mxu0 %v9412_v62 }
 0xde9   :  { %7416 = vmatmul.mubr.msk.bf16.vlgmr.msra.gmra.mrb[72].mxu1 %vm2638_vm4, %v10120_v13  ;;  %v9127_v13 = vld [vmem:[%s11848_s8 + $0xc8] sm:$0xff]  }
 0xdea   :  { %3279 = vmatpush1.bf16.msra.mxu0 %v9124_v61  ;;  %3362 = vmatpush1.bf16.msra.mxu1 %v9122_v57  ;;  %v3686_v57 = vld [vmem:[%s11852_s12 + $0x58] sm:$0xff] }
 0xdeb   :  { %3280 = vmatprep.subr.bf16.mxu0 %v9412_v62  ;;  %3363 = vmatprep.subr.bf16.mxu1 %v9412_v62  ;;  %v10685_v21 = vpack.c.bf16 %v3686_v57, %v3685_v47 }
 0xdee   :  { %3281 = vmatpush1.bf16.msra.mxu0 %v9125_v63  ;;  %3364 = vmatpush1.bf16.msra.mxu1 %v9123_v5  ;;  %v3687_v5 = vld [vmem:[%s11852_s12 + $0x60] sm:$0xff] }
 0xdef   :  { %3282 = vmatprep.subr.bf16.mxu0 %v9412_v62  ;;  %3365 = vmatprep.subr.bf16.mxu1 %v9412_v62 }
 0xdf2   :  { %3283 = vmatpush1.bf16.msra.mxu0 %v9126_v0  ;;  %3366 = vmatpush1.bf16.msra.mxu1 %v9124_v61  ;;  %v3688_v61 = vld [vmem:[%s11852_s12 + $0x68] sm:$0xff] }
 0xdf3   :  { %3284 = vmatprep.subr.bf16.mxu0 %v9412_v62  ;;  %3367 = vmatprep.subr.bf16.mxu1 %v9412_v62 }
 0xdf6   :  { %3285 = vmatpush1.bf16.msra.mxu0 %v9127_v13  ;;  %3368 = vmatpush1.bf16.msra.mxu1 %v9125_v63  ;;  %v10695_v63 = vpack.c.bf16 %v3688_v61, %v3687_v5 }
 0xdf7   :  { %3286 = vmatprep.subr.bf16.mxu0 %v9412_v62  ;;  %3369 = vmatprep.subr.bf16.mxu1 %v9412_v62 }
 0xdfa   :  { %3287 = vmatpush1.bf16.msra.mxu0 %v9128_v10  ;;  %3370 = vmatpush1.bf16.msra.mxu1 %v9126_v0  ;;  %v3689_v0 = vld [vmem:[%s11852_s12 + $0x70] sm:$0xff] }
 0xdfb   :  { %3288 = vmatprep.subr.bf16.mxu0 %v9412_v62  ;;  %3371 = vmatprep.subr.bf16.mxu1 %v9412_v62 }
 0xdfe   :  { %3289 = vmatpush1.bf16.msra.mxu0 %v9129_v60  ;;  %3372 = vmatpush1.bf16.msra.mxu1 %v9127_v13  ;;  %v3690_v13 = vld [vmem:[%s11852_s12 + $0x78] sm:$0xff] }
 0xdff   :  { %3290 = vmatprep.subr.bf16.mxu0 %v9412_v62  ;;  %3373 = vmatprep.subr.bf16.mxu1 %v9412_v62 }
 0xe02   :  { %3291 = vmatpush1.bf16.msra.mxu0 %v9130_v15  ;;  %3374 = vmatpush1.bf16.msra.mxu1 %v9128_v10  ;;  %v8815_v10 = vpack.c.bf16 %v3690_v13, %v3689_v0 }
 0xe03   :  { %3292 = vmatprep.subr.bf16.mxu0 %v9412_v62  ;;  %3375 = vmatprep.subr.bf16.mxu1 %v9412_v62 }
 0xe06   :  { %3293 = vmatpush1.bf16.msra.mxu0 %v9131_v29  ;;  %3376 = vmatpush1.bf16.msra.mxu1 %v9129_v60  ;;  %v3762_v60 = vld [vmem:[%s11851_s11] sm:$0xff] }
 0xe07   :  { %7438 = vmatprep.subr.msk.bf16.mxu0 %vm2641_vm3, %v10351_v58  ;;  %3377 = vmatprep.subr.bf16.mxu1 %v9412_v62 }
 0xe0a   :  { %3378 = vmatpush1.bf16.msra.mxu1 %v9130_v15  ;;  %v3763_v15 = vld [vmem:[%s11851_s11 + $0x8] sm:$0xff] }
 0xe0b   :  { %3379 = vmatprep.subr.bf16.mxu1 %v9412_v62 }
 0xe0e   :  { %3380 = vmatpush1.bf16.msra.mxu1 %v9131_v29  ;;  %v8818_v29 = vpack.c.bf16 %v3763_v15, %v3762_v60  ;;  %v9144_v60 = vld [vmem:[%s11853_s13 + $0xc4] ss:$8 sps:$4 sm:$0xff]   ;;  %v9147_v15 = vld [vmem:[%s11853_s13 + $0xd4] ss:$8 sps:$4 sm:$0xff]  }
 0xe0f   :  { %7451 = vmatprep.subr.msk.bf16.mxu1 %vm2641_vm3, %v10360_v25 }
 0xeb4   :  { %v3202_v3 = vpop.f32.mrb[68].mxu0 }
 0xeb5   :  { %v3209_v4 = vpack.c.bf16 %v3202_v3, %v3202_v3  ;;  %v3204_v6 = vpop.f32.mrb[69].mxu0 }
 0xeb6   :  { %v3210_v30 = vpack.c.bf16 %v3204_v6, %v3204_v6  ;;  %v3206_v48 = vpop.f32.mrb[70].mxu0 }
 0xeb7   :  { %v3207_v7 = vpop.f32.mrb[71].mxu0 }
 0xeb8   :  { %7414 = vmatprep.mubr.msk.bf16.mxu0 %vm80_vm1, %v3210_v30 }
 0xeb9   :  { %3307 = vmatmul.mubr.bf16.vlgmr.msra.gmra.mrb[64].mxu0 %v3209_v4 }
 0xeba   :  { %3426 = vmatpush1.bf16.msra.mxu0 %v10358_v20  ;;  %3457 = vmatprep.mubr.bf16.mxu0 %v9412_v62  ;;  %v9133_v20 = vld [vmem:[%s11848_s8 + $0xf8] sm:$0xff]  }
 0xebb   :  { %3531 = vmatprep.subr.bf16.mxu0 %v9412_v62 }
 0xebc   :  { %v3349_v58 = vpop.f32.mrb[72].mxu1 }
 0xebd   :  { %v3351_v8 = vpop.f32.mrb[73].mxu1  ;;  %v3356_v25 = vpack.c.bf16 %v3349_v58, %v3349_v58 }
 0xebe   :  { %v3357_v11 = vpack.c.bf16 %v3351_v8, %v3351_v8  ;;  %v3353_v12 = vpop.f32.mrb[74].mxu1 }
 0xebf   :  { %v3354_v16 = vpop.f32.mrb[75].mxu1 }
 0xec0   :  { %7417 = vmatprep.mubr.msk.bf16.mxu1 %vm80_vm1, %v3357_v11 }
 0xec1   :  { %3394 = vmatmul.mubr.bf16.vlgmr.msra.gmra.mrb[68].mxu1 %v3356_v25  ;;  %7439 = vmatmul.mubr.msk.bf16.vlgmr.msra.gmra.mrb[72].mxu0 %vm2638_vm4, %v10189_v45 }
 0xec2   :  { %3573 = vmatpush1.bf16.msra.mxu1 %v10373_v2  ;;  %3604 = vmatprep.mubr.bf16.mxu1 %v9412_v62  ;;  %v9135_v2 = vld [vmem:[%s11848_s8 + $0x108] sm:$0xff]  }
 0xec3   :  { %3532 = vmatpush1.bf16.msra.mxu0 %v9132_v23  ;;  %3618 = vmatprep.subr.bf16.mxu1 %v9412_v62 }
 0xec4   :  { %3533 = vmatprep.subr.bf16.mxu0 %v9412_v62 }
 0xec7   :  { %3534 = vmatpush1.bf16.msra.mxu0 %v9133_v20 }
 0xec8   :  { %3535 = vmatprep.subr.bf16.mxu0 %v9412_v62 }
 0xec9   :  { %7452 = vmatmul.mubr.msk.bf16.vlgmr.msra.gmra.mrb[76].mxu1 %vm2638_vm4, %v10189_v45  ;;  %v9137_v45 = vld [vmem:[%s11848_s8 + $0x118] sm:$0xff]  }
 0xeca   :  { %3619 = vmatpush1.bf16.msra.mxu1 %v9132_v23 }
 0xecb   :  { %3536 = vmatpush1.bf16.msra.mxu0 %v9134_v27  ;;  %3620 = vmatprep.subr.bf16.mxu1 %v9412_v62 }
 0xecc   :  { %3537 = vmatprep.subr.bf16.mxu0 %v9412_v62 }
 0xece   :  { %3621 = vmatpush1.bf16.msra.mxu1 %v9133_v20 }
 0xecf   :  { %3538 = vmatpush1.bf16.msra.mxu0 %v9135_v2  ;;  %3622 = vmatprep.subr.bf16.mxu1 %v9412_v62 }
 0xed0   :  { %3539 = vmatprep.subr.bf16.mxu0 %v9412_v62 }
 0xed2   :  { %3623 = vmatpush1.bf16.msra.mxu1 %v9134_v27 }
 0xed3   :  { %3540 = vmatpush1.bf16.msra.mxu0 %v9136_v28  ;;  %3624 = vmatprep.subr.bf16.mxu1 %v9412_v62 }
 0xed4   :  { %3541 = vmatprep.subr.bf16.mxu0 %v9412_v62 }
 0xed6   :  { %3625 = vmatpush1.bf16.msra.mxu1 %v9135_v2 }
 0xed7   :  { %3542 = vmatpush1.bf16.msra.mxu0 %v9137_v45  ;;  %3626 = vmatprep.subr.bf16.mxu1 %v9412_v62 }
 0xed8   :  { %3543 = vmatprep.subr.bf16.mxu0 %v9412_v62 }
 0xeda   :  { %3627 = vmatpush1.bf16.msra.mxu1 %v9136_v28 }
 0xedb   :  { %3544 = vmatpush1.bf16.msra.mxu0 %v9138_v33  ;;  %3628 = vmatprep.subr.bf16.mxu1 %v9412_v62 }
 0xedc   :  { %3545 = vmatprep.subr.bf16.mxu0 %v9412_v62 }
 0xede   :  { %3629 = vmatpush1.bf16.msra.mxu1 %v9137_v45 }
 0xedf   :  { %3546 = vmatpush1.bf16.msra.mxu0 %v9139_v35  ;;  %3630 = vmatprep.subr.bf16.mxu1 %v9412_v62 }
 0xee0   :  { %3547 = vmatprep.subr.bf16.mxu0 %v9412_v62 }
 0xee2   :  { %3631 = vmatpush1.bf16.msra.mxu1 %v9138_v33 }
 0xee3   :  { %3548 = vmatpush1.bf16.msra.mxu0 %v9140_v36  ;;  %3632 = vmatprep.subr.bf16.mxu1 %v9412_v62 }
 0xee4   :  { %3549 = vmatprep.subr.bf16.mxu0 %v9412_v62 }
 0xee6   :  { %3633 = vmatpush1.bf16.msra.mxu1 %v9139_v35 }
 0xee7   :  { %3634 = vmatprep.subr.bf16.mxu1 %v9412_v62  ;;  %3550 = vmatpush1.bf16.msra.mxu0 %v9141_v34 }
 0xee8   :  { %8793 = vmatprep.subr.bf16.mxu0 %v9413_v18 }
 0xeea   :  { %3635 = vmatpush1.bf16.msra.mxu1 %v9140_v36 }
 0xeeb   :  { %3636 = vmatprep.subr.bf16.mxu1 %v9412_v62 }
 0xeee   :  { %3637 = vmatpush1.bf16.msra.mxu1 %v9141_v34 }
 0xeef   :  { %8817 = vmatprep.subr.bf16.mxu1 %v9413_v18 }
 0xf94   :  { %v3459_v38 = vpop.f32.mrb[72].mxu0 }
 0xf95   :  { %v3466_v62 = vpack.c.bf16 %v3459_v38, %v3459_v38  ;;  %v3461_v39 = vpop.f32.mrb[73].mxu0  ;;  %v3764_v38 = vld [vmem:[%s11851_s11 + $0x10] sm:$0xff] }
 0xf96   :  { %v3467_v24 = vpack.c.bf16 %v3461_v39, %v3461_v39  ;;  %v3463_v40 = vpop.f32.mrb[74].mxu0 }
 0xf97   :  { %v3464_v42 = vpop.f32.mrb[75].mxu0 }
 0xf98   :  { %7450 = vmatprep.mubr.msk.bf16.mxu0 %vm80_vm1, %v3467_v24 }
 0xf99   :  { %3564 = vmatmul.mubr.bf16.vlgmr.msra.gmra.mrb[64].mxu0 %v3466_v62  ;;  %v3765_v62 = vld [vmem:[%s11851_s11 + $0x18] sm:$0xff] }
 0xf9a   :  { %8795 = vmatpush3.bf16.msra.mxu0 %v10629_v41  ;;  %8583 = vmatprep.mubr.msk.f32.mxu0 %vm9410_vm0, %v10262_v1  ;;  %v8821_v39 = vpack.c.bf16 %v3765_v62, %v3764_v38  ;;  %v9174_v38 = vld [vmem:[%s11853_s13 + $0x164] ss:$8 sps:$4 sm:$0xff]  }
 0xf9b   :  { %8796 = vmatprep.subr.bf16.mxu0 %v9413_v18 }
 0xf9c   :  { %v3606_v50 = vpop.f32.mrb[76].mxu1 }
 0xf9d   :  { %v3608_v51 = vpop.f32.mrb[77].mxu1  ;;  %v3613_v53 = vpack.c.bf16 %v3606_v50, %v3606_v50 }
 0xf9e   :  { %v3614_v17 = vpack.c.bf16 %v3608_v51, %v3608_v51  ;;  %v3610_v52 = vpop.f32.mrb[78].mxu1  ;;  %8798 = vmatpush3.bf16.msra.mxu0 %v10639_v49 }
 0xf9f   :  { %v3611_v54 = vpop.f32.mrb[79].mxu1  ;;  %8799 = vmatprep.subr.bf16.mxu0 %v9413_v18 }
 0xfa0   :  { %7453 = vmatprep.mubr.msk.bf16.mxu1 %vm80_vm1, %v3614_v17 }
 0xfa1   :  { %3651 = vmatmul.mubr.bf16.vlgmr.msra.gmra.mrb[68].mxu1 %v3613_v53 }
 0xfa2   :  { %8594 = vmatprep.mubr.msk.f32.mxu1 %vm9410_vm0, %v10262_v1  ;;  %8801 = vmatpush3.bf16.msra.mxu0 %v10655_v22  ;;  %v3682_v1 = vld [vmem:[%s11852_s12 + $0x38] sm:$0xff] }
 0xfa3   :  { %8802 = vmatprep.subr.bf16.mxu0 %v9413_v18  ;;  %v10665_v26 = vpack.c.bf16 %v3682_v1, %v3681_v59  ;;  %8819 = vmatpush3.bf16.msra.mxu1 %v8818_v29 }
 0xfa4   :  { %8820 = vmatprep.subr.bf16.mxu1 %v9413_v18 }
 0xfa6   :  { %8804 = vmatpush3.bf16.msra.mxu0 %v10665_v26 }
 0xfa7   :  { %8805 = vmatprep.subr.bf16.mxu0 %v9413_v18  ;;  %8822 = vmatpush3.bf16.msra.mxu1 %v8821_v39 }
 0xfa8   :  { %8823 = vmatprep.subr.bf16.mxu1 %v9413_v18 }
 0xfaa   :  { %8807 = vmatpush3.bf16.msra.mxu0 %v10675_v46 }
 0xfab   :  { %8808 = vmatprep.subr.bf16.mxu0 %v9413_v18 }
 0xfae   :  { %8810 = vmatpush3.bf16.msra.mxu0 %v10685_v21 }
 0xfaf   :  { %8811 = vmatprep.subr.bf16.mxu0 %v9413_v18 }
 0xfb2   :  { %8813 = vmatpush3.bf16.msra.mxu0 %v10695_v63 }
 0xfb3   :  { %8814 = vmatprep.subr.bf16.mxu0 %v9413_v18 }
 0xfb6   :  { %8816 = vmatpush3.bf16.msra.mxu0 %v8815_v10 }
 0xfb7   :  { %8847 = vmatprep.subr.bf16.mxu0 %v9413_v18 }
0x106c   :  { %v3565_v3 = vpop.f32.mrb[64].mxu0 }
0x106d   :  { %v3660_v4 = vsel %vm3659_vm5, %v3565_v3, 0.0  ;;  %v3567_v6 = vpop.f32.mrb[65].mxu0 }
0x106e   :  { %v3661_v30 = vrot.slane %v3660_v4, 4  ;;  %v3568_v48 = vpop.f32.mrb[66].mxu0  ;;  %v9153_v6 = vld [vmem:[%s11853_s13 + $0xf4] ss:$8 sps:$4 sm:$0xff]  }
0x106f   :  { %v3569_v7 = vpop.f32.mrb[67].mxu0  ;;  %v9156_v48 = vld [vmem:[%s11853_s13 + $0x104] ss:$8 sps:$4 sm:$0xff]  }
0x1070   :  { %v3662_v58 = vadd.f32 %v3661_v30, %v3660_v4  ;;  %v9148_v4 = vld [vmem:[%s11853_s13 + $0xe0] ss:$8 sps:$4 sm:$0xff]   ;;  %v9151_v30 = vld [vmem:[%s11853_s13 + $0xf0] ss:$8 sps:$4 sm:$0xff]  }
0x1071   :  { %v9154_v7 = vld [vmem:[%s11853_s13 + $0x100] ss:$8 sps:$4 sm:$0xff]  }
0x1072   :  { %v3663_v8 = vrot.slane %v3662_v58, 2 }
0x1074   :  { %v3652_v11 = vpop.f32.mrb[68].mxu1  ;;  %v3664_v27 = vadd.f32 %v3663_v8, %v3662_v58  ;;  %v9159_v58 = vld [vmem:[%s11853_s13 + $0x114] ss:$8 sps:$4 sm:$0xff]   ;;  %v9157_v8 = vld [vmem:[%s11853_s13 + $0x110] ss:$8 sps:$4 sm:$0xff]  }
0x1075   :  { %v3667_v12 = vsel %vm3659_vm5, %v3652_v11, 0.0  ;;  %v3654_v25 = vpop.f32.mrb[69].mxu1 }
0x1076   :  { %v3668_v16 = vrot.slane %v3667_v12, 4  ;;  %v3655_v23 = vpop.f32.mrb[70].mxu1  ;;  %v3665_v45 = vrot.slane %v3664_v27, 1  ;;  %v9165_v25 = vld [vmem:[%s11853_s13 + $0x134] ss:$8 sps:$4 sm:$0xff]  }
0x1077   :  { %v3656_v20 = vpop.f32.mrb[71].mxu1 }
0x1078   :  { %v3669_v2 = vadd.f32 %v3668_v16, %v3667_v12  ;;  %v3666_v36 = vadd.f32 %v3665_v45, %v3664_v27  ;;  %v9160_v12 = vld [vmem:[%s11853_s13 + $0x120] ss:$8 sps:$4 sm:$0xff]   ;;  %v9163_v16 = vld [vmem:[%s11853_s13 + $0x130] ss:$8 sps:$4 sm:$0xff]   ;;  %v9168_v20 = vld [vmem:[%s11853_s13 + $0x144] ss:$8 sps:$4 sm:$0xff]  }
0x1079   :  { %v7456_v45 = vld [vmem:[%s11849_s9] ss:$0 sm:$0xff] }
0x107a   :  { %v3670_v28 = vrot.slane %v3669_v2, 2 }
0x107c   :  { %v3671_v33 = vadd.f32 %v3670_v28, %v3669_v2  ;;  %v9166_v28 = vld [vmem:[%s11853_s13 + $0x140] ss:$8 sps:$4 sm:$0xff]  }
0x107e   :  { %v3672_v35 = vrot.slane %v3671_v33, 1 }
0x1080   :  { %v3673_v34 = vadd.f32 %v3672_v35, %v3671_v33  ;;  %v9171_v33 = vld [vmem:[%s11853_s13 + $0x154] ss:$8 sps:$4 sm:$0xff]  }
0x1082   :  { %v3674_v19 = vadd.f32 %v3673_v34, %v3666_v36  ;;  %v9169_v34 = vld [vmem:[%s11853_s13 + $0x150] ss:$8 sps:$4 sm:$0xff]  }
0x1084   :  { %8584 = vmatmul.mubr.f32.vlgmr.msra.gmra.mrb[54].mxu0 %v3674_v19  ;;  %v7457_v19 = vld [vmem:[%s11850_s10] ss:$0 sm:$0xff] }
0x1085   :  { %8849 = vmatpush3.bf16.msra.mxu0 %v8818_v29  ;;  %8640 = vmatprep.mubr.msk.f32.mxu0 %vm9410_vm0, %v10715_v37  ;;  %v9145_v29 = vld [vmem:[%s11853_s13 + $0xd0] ss:$8 sps:$4 sm:$0xff]  }
0x1086   :  { %8850 = vmatprep.subr.bf16.mxu0 %v9413_v18 }
0x1089   :  { %8852 = vmatpush3.bf16.msra.mxu0 %v8821_v39 }
0x108a   :  { %4261 = vmatprep.subr.bf16.mxu0 %v9144_v60 }
0x1157   :  { %v3757_v24 = vpop.f32.mrb[54].mxu0 }
0x1158   :  { %v3761_v40 = vmul.f32 0.03125, %v3757_v24  ;;  %v8585_v42 = vpop.f32.mrb[55].mxu0 }
0x1159   :  { %v9172_v42 = vld [vmem:[%s11853_s13 + $0x160] ss:$8 sps:$4 sm:$0xff]  }
0x115a   :  { %8595 = vmatmul.mubr.msk.f32.vlgmr.msra.gmra.mrb[58].mxu1 %vm80_vm1, %v3761_v40 }
0x115b   :  { %8825 = vmatpush3.bf16.msra.mxu1 %v10629_v41  ;;  %8629 = vmatprep.mubr.msk.f32.mxu1 %vm9410_vm0, %v10715_v37 }
0x115c   :  { %8826 = vmatprep.subr.bf16.mxu1 %v9413_v18 }
0x115f   :  { %8828 = vmatpush3.bf16.msra.mxu1 %v10639_v49 }
0x1160   :  { %8829 = vmatprep.subr.bf16.mxu1 %v9413_v18 }
0x1163   :  { %8831 = vmatpush3.bf16.msra.mxu1 %v10655_v22 }
0x1164   :  { %8832 = vmatprep.subr.bf16.mxu1 %v9413_v18 }
0x1167   :  { %8834 = vmatpush3.bf16.msra.mxu1 %v10665_v26 }
0x1168   :  { %8835 = vmatprep.subr.bf16.mxu1 %v9413_v18 }
0x116b   :  { %8837 = vmatpush3.bf16.msra.mxu1 %v10675_v46 }
0x116c   :  { %8838 = vmatprep.subr.bf16.mxu1 %v9413_v18 }
0x116f   :  { %8840 = vmatpush3.bf16.msra.mxu1 %v10685_v21 }
0x1170   :  { %8841 = vmatprep.subr.bf16.mxu1 %v9413_v18 }
0x1173   :  { %8843 = vmatpush3.bf16.msra.mxu1 %v10695_v63 }
0x1174   :  { %8844 = vmatprep.subr.bf16.mxu1 %v9413_v18 }
0x1177   :  { %8846 = vmatpush3.bf16.msra.mxu1 %v8815_v10  ;;  %v9142_v10 = vld [vmem:[%s11853_s13 + $0xc0] ss:$8 sps:$4 sm:$0xff]  }
0x1178   :  { %4492 = vmatprep.subr.bf16.mxu1 %v9144_v60 }
0x122d   :  { %v3835_v41 = vpop.f32.mrb[58].mxu1 }
0x122e   :  { %v3842_v44 = vrot.slane %v3835_v41, %v10333_v14  ;;  %v8596_v31 = vpop.f32.mrb[59].mxu1  ;;  %v9177_v41 = vld [vmem:[%s11853_s13 + $0x174] ss:$8 sps:$4 sm:$0xff]  }
0x1230   :  { %v10745_v49 = vsub.f32 %v3565_v3, %v3842_v44  ;;  %v10747_v50 = vsub.f32 %v3652_v11, %v3842_v44  ;;  %v9150_v3 = vld [vmem:[%s11853_s13 + $0xe4] ss:$8 sps:$4 sm:$0xff]  }
0x1231   :  { %v9162_v11 = vld [vmem:[%s11853_s13 + $0x124] ss:$8 sps:$4 sm:$0xff]  }
0x1232   :  { %v3844_v51 = vmul.f32 %v10745_v49, %v10745_v49  ;;  %v3853_v17 = vmul.f32 %v10747_v50, %v10747_v50 }
0x1234   :  { %v3845_v52 = vsel %vm3659_vm5, %v3844_v51, 0.0  ;;  %v3854_v53 = vsel %vm3659_vm5, %v3853_v17, 0.0  ;;  %v9175_v51 = vld [vmem:[%s11853_s13 + $0x170] ss:$8 sps:$4 sm:$0xff]  }
0x1235   :  { %v3846_v54 = vrot.slane %v3845_v52, 4  ;;  %v3855_v55 = vrot.slane %v3854_v53, 4 }
0x1237   :  { %v3847_v56 = vadd.f32 %v3846_v54, %v3845_v52  ;;  %v3856_v22 = vadd.f32 %v3855_v55, %v3854_v53  ;;  %v9180_v53 = vld [vmem:[%s11853_s13 + $0x4] ss:$8 sps:$4 sm:$0xff]  }
0x1239   :  { %v3848_v59 = vrot.slane %v3847_v56, 2  ;;  %v3857_v1 = vrot.slane %v3856_v22, 2 }
0x123b   :  { %v3849_v26 = vadd.f32 %v3848_v59, %v3847_v56  ;;  %v3858_v32 = vadd.f32 %v3857_v1, %v3856_v22 }
0x123d   :  { %v3850_v43 = vrot.slane %v3849_v26, 1  ;;  %v3859_v46 = vrot.slane %v3858_v32, 1 }
0x123f   :  { %v3851_v47 = vadd.f32 %v3850_v43, %v3849_v26  ;;  %v3860_v57 = vadd.f32 %v3859_v46, %v3858_v32 }
0x1241   :  { %v3861_v21 = vadd.f32 %v3860_v57, %v3851_v47 }
0x1243   :  { %8630 = vmatmul.mubr.f32.vlgmr.msra.gmra.mrb[80].mxu1 %v3861_v21 }
0x1244   :  { %4493 = vmatpush1.bf16.msra.mxu1 %v9142_v10 }
0x1245   :  { %4494 = vmatprep.subr.bf16.mxu1 %v9147_v15 }
0x1248   :  { %4495 = vmatpush1.bf16.msra.mxu1 %v9145_v29 }
0x1249   :  { %4496 = vmatprep.subr.bf16.mxu1 %v9150_v3 }
0x124c   :  { %4497 = vmatpush1.bf16.msra.mxu1 %v9148_v4 }
0x124d   :  { %4498 = vmatprep.subr.bf16.mxu1 %v9153_v6 }
0x1250   :  { %4499 = vmatpush1.bf16.msra.mxu1 %v9151_v30 }
0x1251   :  { %4500 = vmatprep.subr.bf16.mxu1 %v9156_v48 }
0x1254   :  { %4501 = vmatpush1.bf16.msra.mxu1 %v9154_v7 }
0x1255   :  { %4502 = vmatprep.subr.bf16.mxu1 %v9159_v58 }
0x1258   :  { %4503 = vmatpush1.bf16.msra.mxu1 %v9157_v8 }
0x1259   :  { %4504 = vmatprep.subr.bf16.mxu1 %v9162_v11 }
0x125c   :  { %4505 = vmatpush1.bf16.msra.mxu1 %v9160_v12 }
0x125d   :  { %4506 = vmatprep.subr.bf16.mxu1 %v9165_v25 }
0x1260   :  { %4507 = vmatpush1.bf16.msra.mxu1 %v9163_v16 }
0x1261   :  { %4508 = vmatprep.subr.bf16.mxu1 %v9168_v20 }
0x1264   :  { %4509 = vmatpush1.bf16.msra.mxu1 %v9166_v28 }
0x1265   :  { %4510 = vmatprep.subr.bf16.mxu1 %v9171_v33 }
0x1268   :  { %4511 = vmatpush1.bf16.msra.mxu1 %v9169_v34 }
0x1269   :  { %4512 = vmatprep.subr.bf16.mxu1 %v9174_v38 }
0x126c   :  { %4513 = vmatpush1.bf16.msra.mxu1 %v9172_v42 }
0x126d   :  { %4514 = vmatprep.subr.bf16.mxu1 %v9177_v41 }
0x1270   :  { %4515 = vmatpush1.bf16.msra.mxu1 %v9175_v51 }
0x1271   :  { %4541 = vmatprep.subr.bf16.mxu1 %v9180_v53 }
0x1316   :  { %v3928_v5 = vpop.f32.mrb[80].mxu1 }
0x1317   :  { %v3932_v61 = vmul.f32 0.03125, %v3928_v5  ;;  %v8631_v63 = vpop.f32.mrb[81].mxu1 }
0x1319   :  { %v3933_v0 = vadd.f32 1e-05, %v3932_v61 }
0x131b   :  { %9368 = vrsqrt.f32 %v3933_v0 }
0x1325   :  { %v9369_v13 = vpop.eup %9368 }
0x1326   :  { %8641 = vmatmul.mubr.msk.f32.vlgmr.msra.gmra.mrb[76].mxu0 %vm80_vm1, %v9369_v13  ;;  %vm88_vm1 = vcmask 523264  }
0x1327   :  { %4262 = vmatpush1.bf16.msra.mxu0 %v9142_v10  ;;  %89 = vst.msk [vmem:[#allocation4 + $0x8] sm:$0xff] %vm88_vm1, %v10715_v37  ;;  %95 = vst.msk [vmem:[#allocation5 + $0x10] sm:$0xff] %vm88_vm1, %v10715_v37 }
0x1328   :  { %4263 = vmatprep.subr.bf16.mxu0 %v9147_v15 }
0x132b   :  { %4264 = vmatpush1.bf16.msra.mxu0 %v9145_v29 }
0x132c   :  { %4265 = vmatprep.subr.bf16.mxu0 %v9150_v3 }
0x132f   :  { %4266 = vmatpush1.bf16.msra.mxu0 %v9148_v4 }
0x1330   :  { %4267 = vmatprep.subr.bf16.mxu0 %v9153_v6 }
0x1333   :  { %4268 = vmatpush1.bf16.msra.mxu0 %v9151_v30 }
0x1334   :  { %4269 = vmatprep.subr.bf16.mxu0 %v9156_v48 }
0x1337   :  { %4270 = vmatpush1.bf16.msra.mxu0 %v9154_v7 }
0x1338   :  { %4271 = vmatprep.subr.bf16.mxu0 %v9159_v58 }
0x133b   :  { %4272 = vmatpush1.bf16.msra.mxu0 %v9157_v8 }
0x133c   :  { %4273 = vmatprep.subr.bf16.mxu0 %v9162_v11  ;;  %v9178_v11 = vld [vmem:[%s11853_s13] ss:$8 sps:$4 sm:$0xff]  }
0x133f   :  { %4274 = vmatpush1.bf16.msra.mxu0 %v9160_v12 }
0x1340   :  { %4275 = vmatprep.subr.bf16.mxu0 %v9165_v25 }
0x1343   :  { %4276 = vmatpush1.bf16.msra.mxu0 %v9163_v16 }
0x1344   :  { %4277 = vmatprep.subr.bf16.mxu0 %v9168_v20  ;;  %v9183_v20 = vld [vmem:[%s11853_s13 + $0x14] ss:$8 sps:$4 sm:$0xff]  }
0x1347   :  { %4278 = vmatpush1.bf16.msra.mxu0 %v9166_v28  ;;  %v9181_v28 = vld [vmem:[%s11853_s13 + $0x10] ss:$8 sps:$4 sm:$0xff]  }
0x1348   :  { %4279 = vmatprep.subr.bf16.mxu0 %v9171_v33  ;;  %v9184_v33 = vld [vmem:[%s11853_s13 + $0x20] ss:$8 sps:$4 sm:$0xff]  }
0x134b   :  { %4280 = vmatpush1.bf16.msra.mxu0 %v9169_v34  ;;  %v9192_v34 = vld [vmem:[%s11853_s13 + $0x44] ss:$8 sps:$4 sm:$0xff]  }
0x134c   :  { %4281 = vmatprep.subr.bf16.mxu0 %v9174_v38  ;;  %v9195_v38 = vld [vmem:[%s11853_s13 + $0x54] ss:$8 sps:$4 sm:$0xff]  }
0x134f   :  { %4282 = vmatpush1.bf16.msra.mxu0 %v9172_v42  ;;  %v9199_v42 = vld [vmem:[%s11853_s13 + $0x70] ss:$8 sps:$4 sm:$0xff]  }
0x1350   :  { %4283 = vmatprep.subr.bf16.mxu0 %v9177_v41  ;;  %v9204_v41 = vld [vmem:[%s11853_s13 + $0x84] ss:$8 sps:$4 sm:$0xff]  }
0x1353   :  { %4284 = vmatpush1.bf16.msra.mxu0 %v9175_v51  ;;  %v9208_v51 = vld [vmem:[%s11853_s13 + $0xa0] ss:$8 sps:$4 sm:$0xff]  }
0x1354   :  { %4425 = vmatprep.subr.bf16.mxu0 %v9180_v53 }
0x13f9   :  { %v4004_v23 = vpop.f32.mrb[76].mxu0 }
0x13fa   :  { %v4011_v27 = vrot.slane %v4004_v23, %v10333_v14  ;;  %v8642_v2 = vpop.f32.mrb[77].mxu0 }
0x13fc   :  { %v4012_v35 = vmul.f32 %v4011_v27, %v10745_v49  ;;  %v4032_v36 = vmul.f32 %v4011_v27, %v10747_v50 }
0x13fe   :  { %v4020_v62 = vmul.f32 %v7456_v45, %v4012_v35  ;;  %v4033_v39 = vmul.f32 %v7456_v45, %v4032_v36  ;;  %v9186_v45 = vld [vmem:[%s11853_s13 + $0x24] ss:$8 sps:$4 sm:$0xff]   ;;  %v9189_v35 = vld [vmem:[%s11853_s13 + $0x34] ss:$8 sps:$4 sm:$0xff]   ;;  %v9187_v36 = vld [vmem:[%s11853_s13 + $0x30] ss:$8 sps:$4 sm:$0xff]  }
0x1400   :  { %v4028_v24 = vadd.f32 %v7457_v19, %v4020_v62  ;;  %v4034_v40 = vadd.f32 %v7457_v19, %v4033_v39  ;;  %v9190_v19 = vld [vmem:[%s11853_s13 + $0x40] ss:$8 sps:$4 sm:$0xff]   ;;  %v9193_v62 = vld [vmem:[%s11853_s13 + $0x50] ss:$8 sps:$4 sm:$0xff]   ;;  %v9198_v39 = vld [vmem:[%s11853_s13 + $0x64] ss:$8 sps:$4 sm:$0xff]  }
0x1402   :  { %vm4035_vm6 = vcmp.ge.f32.partialorder %v4034_v40, 0.0  ;;  %v4036_v44 = vmul.f32 0.2, %v4034_v40  ;;  %vm4029_vm8 = vcmp.ge.f32.partialorder %v4028_v24, 0.0  ;;  %v4030_v31 = vmul.f32 0.2, %v4028_v24 }
0x1404   :  { %v4037_v49 = vsel %vm4035_vm6, %v4034_v40, %v4036_v44  ;;  %v4031_v50 = vsel %vm4029_vm8, %v4028_v24, %v4030_v31  ;;  %v9196_v24 = vld [vmem:[%s11853_s13 + $0x60] ss:$8 sps:$4 sm:$0xff]   ;;  %v9201_v40 = vld [vmem:[%s11853_s13 + $0x74] ss:$8 sps:$4 sm:$0xff]   ;;  %vm98_vm6 = vcmask 517120   ;;  %vm5605_vm8 = vcmask 1048070  }
0x1405   :  { %v4048_v17 = vrot.slane %v4037_v49, 1  ;;  %v4039_v52 = vrot.slane %v4031_v50, 7  ;;  %v9202_v44 = vld [vmem:[%s11853_s13 + $0x80] ss:$8 sps:$4 sm:$0xff]   ;;  %v9207_v31 = vld [vmem:[%s11853_s13 + $0x94] ss:$8 sps:$4 sm:$0xff]  }
0x1406   :  { %v9205_v49 = vld [vmem:[%s11853_s13 + $0x90] ss:$8 sps:$4 sm:$0xff]   ;;  %v9210_v50 = vld [vmem:[%s11853_s13 + $0xa4] ss:$8 sps:$4 sm:$0xff]  }
0x1407   :  { %4049 = vrot.lane.b32.xlu1 %v4048_v17, %s9415_s23  ;;  %4040 = vrot.lane.b32.xlu0 %v4039_v52, %s9415_s23  ;;  %v9213_v17 = vld [vmem:[%s11853_s13 + $0xb4] ss:$8 sps:$4 sm:$0xff]  }
0x1479   :  { %v4050_v54 = vpop.permute.xlu1 %4049  ;;  %v4041_v55 = vpop.permute.xlu0 %4040 }
0x147a   :  { %4053 = vst.msk [vmem:[#allocation4] sm:$0x80] %vm4052_vm9, %v4050_v54  ;;  %vm5608_vm9 = vcmask 1040896  }
0x147b   :  { %4055 = vst.msk [vmem:[#allocation4 + $0x8] sm:$0x80] %vm4054_vm10, %v4050_v54 }
0x147c   :  { %4057 = vst.msk [vmem:[#allocation4 + $0x10] sm:$0x7] %vm4056_vm11, %v4050_v54 }
0x147d   :  { %4059 = vst.msk [vmem:[#allocation4 + $0x18] sm:$0x7] %vm4058_vm12, %v4050_v54 }
0x147e   :  { %4044 = vst.msk [vmem:[#allocation4] sm:$0x1e] %vm4043_vm14, %v4041_v55 }
0x147f   :  { %4046 = vst.msk [vmem:[#allocation4 + $0x8] sm:$0x1e] %vm4045_vm15, %v4041_v55  ;;  %v9211_v55 = vld [vmem:[%s11853_s13 + $0xb0] ss:$8 sps:$4 sm:$0xff]  }
0x1481   :  { %v4466_v43 = vld [vmem:[#allocation4] sm:$0x80] }
0x1482   :  { %v4467_v22 = vld [vmem:[#allocation4 + $0x8] sm:$0x80]  ;;  %v4088_v52 = vld [vmem:[#allocation4] sm:$0xc0] }
0x1483   :  { %v4468_v46 = vld [vmem:[#allocation4 + $0x10] sm:$0x3]  ;;  %v4089_v21 = vld [vmem:[#allocation4 + $0x8] sm:$0xc0] }
0x1484   :  { %v4469_v59 = vld [vmem:[#allocation4 + $0x18] sm:$0x3]  ;;  %v4470_v57 = vpack.c.bf16 %v4468_v46, %v4466_v43  ;;  %v4090_v53 = vld [vmem:[#allocation4 + $0x10] sm:$0x1] }
0x1485   :  { %v4471_v26 = vpack.c.bf16 %v4469_v59, %v4467_v22  ;;  %v4119_v32 = vld [vmem:[#allocation4] sm:$0xe]  ;;  %v4091_v0 = vld [vmem:[#allocation4 + $0x18] sm:$0x1]  ;;  %v9216_v22 = vld [vmem:[%s11853_s13 + $0x184] ss:$8 sps:$4 sm:$0xff]  }
0x1486   :  { %v4120_v56 = vld [vmem:[#allocation4 + $0x8] sm:$0xe]  ;;  %v4121_v47 = vpack.c.bf16 %v4119_v32, %v4119_v32  ;;  %v4473_v60 = vshrl.u32 %v4470_v57, 16  ;;  %v4476_v15 = vshll.u32 %v4470_v57, 16  ;;  %v4093_v58 = vpack.c.bf16 %v4091_v0, %v4089_v21  ;;  %v4084_v59 = vld [vmem:[#allocation4] sm:$0x7] }
0x1487   :  { %v4122_v1 = vpack.c.bf16 %v4120_v56, %v4120_v56  ;;  %v4481_v61 = vshrl.u32 %v4471_v26, 16  ;;  %v4484_v63 = vshll.u32 %v4471_v26, 16  ;;  %v4085_v25 = vld [vmem:[#allocation4 + $0x8] sm:$0x7]  ;;  %v4092_v56 = vpack.c.bf16 %v4090_v53, %v4088_v52  ;;  %v4783_v32 = vld [vmem:[#allocation4 + $0x18] sm:$0x7] }
0x1488   :  { %v4126_v10 = vshll.u32 %v4121_v47, 16  ;;  %v4124_v6 = vshrl.u32 %v4121_v47, 16  ;;  %v4475_v48 = vrot.slane %v4473_v60, 3  ;;  %v4478_v7 = vrot.slane %v4476_v15, 4  ;;  %v4608_v54 = vld [vmem:[#allocation4 + $0x8] sm:$0x1c] }
0x1489   :  { %v4133_v5 = vshll.u32 %v4122_v1, 16  ;;  %v4131_v13 = vshrl.u32 %v4122_v1, 16  ;;  %v4483_v3 = vrot.slane %v4481_v61, 3  ;;  %v4486_v4 = vrot.slane %v4484_v63, 4  ;;  %v9214_v26 = vld [vmem:[%s11853_s13 + $0x180] ss:$8 sps:$4 sm:$0xff]  }
0x148a   :  { %v4128_v30 = vrot.slane %v4126_v10, 1  ;;  %v4479_v23 = vor.u32 %v4478_v7, %v4475_v48  ;;  %v4087_v27 = vpack.c.bf16 %v4085_v25, %v4085_v25  ;;  %v4536_v2 = vrot.slane %v4093_v58, 3  ;;  %v9219_v57 = vld [vmem:[%s11853_s13 + $0x194] ss:$8 sps:$4 sm:$0xff]   ;;  %v9222_v61 = vld [vmem:[%s11853_s13 + $0x1a4] ss:$8 sps:$4 sm:$0xff]  }
0x148b   :  { %v4135_v29 = vrot.slane %v4133_v5, 1  ;;  %v4487_v12 = vor.u32 %v4486_v4, %v4483_v3  ;;  %v4610_v1 = vpack.c.bf16 %v4608_v54, %v4608_v54  ;;  %v4086_v43 = vpack.c.bf16 %v4084_v59, %v4084_v59  ;;  %v9217_v5 = vld [vmem:[%s11853_s13 + $0x190] ss:$8 sps:$4 sm:$0xff]   ;;  %v9220_v63 = vld [vmem:[%s11853_s13 + $0x1a0] ss:$8 sps:$4 sm:$0xff]  }
0x148c   :  { %v4129_v16 = vor.u32 %v4128_v30, %v4124_v6  ;;  %v4535_v46 = vrot.slane %v4092_v56, 3  ;;  %v4785_v21 = vpack.c.bf16 %v4783_v32, %v4783_v32  ;;  %v9225_v0 = vld [vmem:[%s11853_s13 + $0x1b4] ss:$8 sps:$4 sm:$0xff]   ;;  %v9228_v10 = vld [vmem:[%s11853_s13 + $0x1c4] ss:$8 sps:$4 sm:$0xff]  }
0x148d   :  { %v4136_v8 = vor.u32 %v4135_v29, %v4131_v13  ;;  %7532 = vmatprep.mubr.msk.bf16.mxu1 %vm88_vm1, %v4487_v12  ;;  %v4614_v47 = vrot.slane %v4610_v1, 1  ;;  %v9223_v13 = vld [vmem:[%s11853_s13 + $0x1b0] ss:$8 sps:$4 sm:$0xff]   ;;  %v9226_v60 = vld [vmem:[%s11853_s13 + $0x1c0] ss:$8 sps:$4 sm:$0xff]  }
0x148e   :  { %4525 = vmatmul.mubr.bf16.vlgmr.msra.gmra.mrb[84].mxu1 %v4479_v23  ;;  %v9231_v15 = vld [vmem:[%s11853_s13 + $0x1d4] ss:$8 sps:$4 sm:$0xff]   ;;  %v9229_v29 = vld [vmem:[%s11853_s13 + $0x1d0] ss:$8 sps:$4 sm:$0xff]   ;;  %v9234_v3 = vld [vmem:[%s11853_s13 + $0x1e4] ss:$8 sps:$4 sm:$0xff]  }
0x148f   :  { %7506 = vmatprep.mubr.msk.bf16.mxu0 %vm88_vm1, %v4136_v8  ;;  %4542 = vmatpush1.bf16.msra.mxu1 %v9178_v11  ;;  %v9232_v4 = vld [vmem:[%s11853_s13 + $0x1e0] ss:$8 sps:$4 sm:$0xff]   ;;  %v9237_v6 = vld [vmem:[%s11853_s13 + $0x1f4] ss:$8 sps:$4 sm:$0xff]   ;;  %v9235_v30 = vld [vmem:[%s11853_s13 + $0x1f0] ss:$8 sps:$4 sm:$0xff]  }
0x1490   :  { %4294 = vmatmul.mubr.bf16.vlgmr.msra.gmra.mrb[80].mxu0 %v4129_v16  ;;  %7533 = vmatprep.mubr.msk.bf16.mxu1 %vm88_vm1, %v4536_v2  ;;  %v9240_v48 = vld [vmem:[%s11853_s13 + $0x204] ss:$8 sps:$4 sm:$0xff]   ;;  %v9238_v7 = vld [vmem:[%s11853_s13 + $0x200] ss:$8 sps:$4 sm:$0xff]   ;;  %v9243_v58 = vld [vmem:[%s11853_s13 + $0x214] ss:$8 sps:$4 sm:$0xff]  }
0x1491   :  { %4426 = vmatpush1.bf16.msra.mxu0 %v9178_v11  ;;  %7531 = vmatprep.mubr.msk.bf16.mxu0 %vm88_vm1, %v4087_v27  ;;  %v9241_v8 = vld [vmem:[%s11853_s13 + $0x210] ss:$8 sps:$4 sm:$0xff]   ;;  %v4858_v11 = vld [vmem:[#allocation4 + $0x8] sm:$0x38]  ;;  %v9249_v27 = vld [vmem:[%s11853_s13 + $0x234] ss:$8 sps:$4 sm:$0xff]  }
0x1492   :  { %4427 = vmatprep.subr.bf16.mxu0 %v9183_v20  ;;  %4543 = vmatprep.subr.bf16.mxu1 %v9183_v20  ;;  %v9246_v12 = vld [vmem:[%s11853_s13 + $0x224] ss:$8 sps:$4 sm:$0xff]   ;;  %v5045_v25 = vld [vmem:[#allocation4 + $0x18] sm:$0xe]  ;;  %v4860_v16 = vpack.c.bf16 %v4858_v11, %v4858_v11  ;;  %v9244_v23 = vld [vmem:[%s11853_s13 + $0x220] ss:$8 sps:$4 sm:$0xff]  }
0x1493   :  { %4544 = vmatpush1.bf16.msra.mxu1 %v9181_v28  ;;  %v5047_v20 = vpack.c.bf16 %v5045_v25, %v5045_v25  ;;  %v4607_v2 = vld [vmem:[#allocation4] sm:$0x1c]  ;;  %v9261_v52 = vld [vmem:[%s11853_s13 + $0x274] ss:$8 sps:$4 sm:$0xff]   ;;  %v9259_v53 = vld [vmem:[%s11853_s13 + $0x270] ss:$8 sps:$4 sm:$0xff]  }
0x1494   :  { %4545 = vmatprep.subr.bf16.mxu1 %v9186_v45  ;;  %v9264_v54 = vld [vmem:[%s11853_s13 + $0x284] ss:$8 sps:$4 sm:$0xff]   ;;  %v9267_v56 = vld [vmem:[%s11853_s13 + $0x294] ss:$8 sps:$4 sm:$0xff]   ;;  %v9268_v1 = vld [vmem:[%s11853_s13 + $0x2a0] ss:$8 sps:$4 sm:$0xff]  }
0x1495   :  { %4428 = vmatpush1.bf16.msra.mxu0 %v9181_v28  ;;  %v4870_v28 = vshrl.u32 %v4860_v16, 16  ;;  %v9270_v59 = vld [vmem:[%s11853_s13 + $0x2a4] ss:$8 sps:$4 sm:$0xff]   ;;  %v9271_v32 = vld [vmem:[%s11853_s13 + $0x2b0] ss:$8 sps:$4 sm:$0xff]  }
0x1496   :  { %4429 = vmatprep.subr.bf16.mxu0 %v9186_v45  ;;  %v4873_v45 = vshll.u32 %v4860_v16, 16  ;;  %v5143_v25 = vld [vmem:[%s11857_s17 + $0x18] sm:$0xff] }
0x1497   :  { %4546 = vmatpush1.bf16.msra.mxu1 %v9184_v33 }
0x1498   :  { %4547 = vmatprep.subr.bf16.mxu1 %v9189_v35 }
0x1499   :  { %4430 = vmatpush1.bf16.msra.mxu0 %v9184_v33  ;;  %v9247_v33 = vld [vmem:[%s11853_s13 + $0x230] ss:$8 sps:$4 sm:$0xff]  }
0x149a   :  { %4431 = vmatprep.subr.bf16.mxu0 %v9189_v35  ;;  %v5058_v35 = vshll.u32 %v5047_v20, 16 }
0x149b   :  { %4548 = vmatpush1.bf16.msra.mxu1 %v9187_v36 }
0x149c   :  { %4549 = vmatprep.subr.bf16.mxu1 %v9192_v34 }
0x149d   :  { %4432 = vmatpush1.bf16.msra.mxu0 %v9187_v36  ;;  %v4609_v36 = vpack.c.bf16 %v4607_v2, %v4607_v2 }
0x149e   :  { %4433 = vmatprep.subr.bf16.mxu0 %v9192_v34  ;;  %v9252_v34 = vld [vmem:[%s11853_s13 + $0x244] ss:$8 sps:$4 sm:$0xff]  }
0x149f   :  { %4550 = vmatpush1.bf16.msra.mxu1 %v9190_v19 }
0x14a0   :  { %4551 = vmatprep.subr.bf16.mxu1 %v9195_v38 }
0x14a1   :  { %4434 = vmatpush1.bf16.msra.mxu0 %v9190_v19  ;;  %v4782_v19 = vld [vmem:[#allocation4 + $0x10] sm:$0x7] }
0x14a2   :  { %4435 = vmatprep.subr.bf16.mxu0 %v9195_v38  ;;  %v4872_v38 = vrot.slane %v4870_v28, 1  ;;  %v5146_v28 = vld [vmem:[%s11857_s17 + $0x30] sm:$0xff] }
0x14a3   :  { %4552 = vmatpush1.bf16.msra.mxu1 %v9193_v62 }
0x14a4   :  { %4553 = vmatprep.subr.bf16.mxu1 %v9198_v39 }
0x14a5   :  { %4436 = vmatpush1.bf16.msra.mxu0 %v9193_v62  ;;  %v4875_v62 = vrot.slane %v4873_v45, 2  ;;  %v5147_v45 = vld [vmem:[%s11857_s17 + $0x38] sm:$0xff] }
0x14a6   :  { %4437 = vmatprep.subr.bf16.mxu0 %v9198_v39  ;;  %v9250_v39 = vld [vmem:[%s11853_s13 + $0x240] ss:$8 sps:$4 sm:$0xff]  }
0x14a7   :  { %4554 = vmatpush1.bf16.msra.mxu1 %v9196_v24 }
0x14a8   :  { %4555 = vmatprep.subr.bf16.mxu1 %v9201_v40 }
0x14a9   :  { %4438 = vmatpush1.bf16.msra.mxu0 %v9196_v24  ;;  %v5060_v24 = vrot.slane %v5058_v35, 1  ;;  %v5149_v35 = vld [vmem:[%s11857_s17 + $0x48] sm:$0xff] }
0x14aa   :  { %4439 = vmatprep.subr.bf16.mxu0 %v9201_v40  ;;  %v4613_v40 = vrot.slane %v4609_v36, 1 }
0x14ab   :  { %4556 = vmatpush1.bf16.msra.mxu1 %v9199_v42 }
0x14ac   :  { %4557 = vmatprep.subr.bf16.mxu1 %v9204_v41 }
0x14ad   :  { %4440 = vmatpush1.bf16.msra.mxu0 %v9199_v42  ;;  %v4784_v42 = vpack.c.bf16 %v4782_v19, %v4782_v19  ;;  %v5151_v19 = vld [vmem:[%s11857_s17 + $0x58] sm:$0xff] }
0x14ae   :  { %4441 = vmatprep.subr.bf16.mxu0 %v9204_v41  ;;  %v5056_v41 = vshrl.u32 %v5047_v20, 16  ;;  %v5144_v20 = vld [vmem:[%s11857_s17 + $0x20] sm:$0xff] }
0x14af   :  { %4558 = vmatpush1.bf16.msra.mxu1 %v9202_v44 }
0x14b0   :  { %4559 = vmatprep.subr.bf16.mxu1 %v9207_v31 }
0x14b1   :  { %4442 = vmatpush1.bf16.msra.mxu0 %v9202_v44  ;;  %v9255_v44 = vld [vmem:[%s11853_s13 + $0x254] ss:$8 sps:$4 sm:$0xff]  }
0x14b2   :  { %4443 = vmatprep.subr.bf16.mxu0 %v9207_v31  ;;  %v4876_v31 = vor.u32 %v4875_v62, %v4872_v38  ;;  %v5152_v62 = vld [vmem:[%s11857_s17 + $0x60] sm:$0xff] }
0x14b3   :  { %4560 = vmatpush1.bf16.msra.mxu1 %v9205_v49 }
0x14b4   :  { %4561 = vmatprep.subr.bf16.mxu1 %v9210_v50 }
0x14b5   :  { %4444 = vmatpush1.bf16.msra.mxu0 %v9205_v49  ;;  %v5061_v49 = vor.u32 %v5060_v24, %v5056_v41 }
0x14b6   :  { %4445 = vmatprep.subr.bf16.mxu0 %v9210_v50  ;;  %v9253_v50 = vld [vmem:[%s11853_s13 + $0x250] ss:$8 sps:$4 sm:$0xff]  }
0x14b7   :  { %4562 = vmatpush1.bf16.msra.mxu1 %v9208_v51 }
0x14b8   :  { %4563 = vmatprep.subr.bf16.mxu1 %v9213_v17 }
0x14b9   :  { %4446 = vmatpush1.bf16.msra.mxu0 %v9208_v51  ;;  %v9258_v51 = vld [vmem:[%s11853_s13 + $0x264] ss:$8 sps:$4 sm:$0xff]  }
0x14ba   :  { %4447 = vmatprep.subr.bf16.mxu0 %v9213_v17  ;;  %v9256_v17 = vld [vmem:[%s11853_s13 + $0x260] ss:$8 sps:$4 sm:$0xff]  }
0x14bb   :  { %4564 = vmatpush1.bf16.msra.mxu1 %v9211_v55 }
0x14bc   :  { %4789 = vmatprep.subr.bf16.mxu1 %v9216_v22 }
0x14bd   :  { %4448 = vmatpush1.bf16.msra.mxu0 %v9211_v55  ;;  %v9262_v55 = vld [vmem:[%s11853_s13 + $0x280] ss:$8 sps:$4 sm:$0xff]  }
0x14be   :  { %4739 = vmatprep.subr.bf16.mxu0 %v9216_v22  ;;  %4574 = vmatmul.mubr.bf16.vlgmr.msra.gmra.mrb[84].mxu1 %v4535_v46  ;;  %v9265_v22 = vld [vmem:[%s11853_s13 + $0x290] ss:$8 sps:$4 sm:$0xff]   ;;  %v9274_v46 = vld [vmem:[%s11853_s13 + $0x2c0] ss:$8 sps:$4 sm:$0xff]  }
0x14bf   :  { %4790 = vmatpush1.bf16.msra.mxu1 %v9214_v26  ;;  %7583 = vmatprep.mubr.msk.bf16.mxu1 %vm88_vm1, %v4785_v21  ;;  %v5044_v21 = vld [vmem:[#allocation4 + $0x10] sm:$0xe] }
0x14c0   :  { %4458 = vmatmul.mubr.bf16.vlgmr.msra.gmra.mrb[80].mxu0 %v4086_v43  ;;  %4791 = vmatprep.subr.bf16.mxu1 %v9219_v57  ;;  %v9276_v43 = vld [vmem:[%s11853_s13 + $0x2c4] ss:$8 sps:$4 sm:$0xff]  }
0x14c1   :  { %4740 = vmatpush1.bf16.msra.mxu0 %v9214_v26  ;;  %7582 = vmatprep.mubr.msk.bf16.mxu0 %vm88_vm1, %v4614_v47  ;;  %v9273_v26 = vld [vmem:[%s11853_s13 + $0x2b4] ss:$8 sps:$4 sm:$0xff]  }
0x14c2   :  { %4741 = vmatprep.subr.bf16.mxu0 %v9219_v57  ;;  %v9279_v47 = vld [vmem:[%s11853_s13 + $0x2d4] ss:$8 sps:$4 sm:$0xff]   ;;  %v4857_v57 = vld [vmem:[#allocation4] sm:$0x38] }
0x14c3   :  { %4792 = vmatpush1.bf16.msra.mxu1 %v9217_v5 }
0x14c4   :  { %4793 = vmatprep.subr.bf16.mxu1 %v9222_v61 }
0x14c5   :  { %4742 = vmatpush1.bf16.msra.mxu0 %v9217_v5  ;;  %v9277_v5 = vld [vmem:[%s11853_s13 + $0x2d0] ss:$8 sps:$4 sm:$0xff]  }
0x14c6   :  { %4743 = vmatprep.subr.bf16.mxu0 %v9222_v61  ;;  %v9282_v61 = vld [vmem:[%s11853_s13 + $0x2e4] ss:$8 sps:$4 sm:$0xff]  }
0x14c7   :  { %4794 = vmatpush1.bf16.msra.mxu1 %v9220_v63 }
0x14c8   :  { %4795 = vmatprep.subr.bf16.mxu1 %v9225_v0 }
0x14c9   :  { %4744 = vmatpush1.bf16.msra.mxu0 %v9220_v63  ;;  %v4859_v63 = vpack.c.bf16 %v4857_v57, %v4857_v57 }
0x14ca   :  { %4745 = vmatprep.subr.bf16.mxu0 %v9225_v0  ;;  %v5046_v0 = vpack.c.bf16 %v5044_v21, %v5044_v21  ;;  %v5242_v21 = vld [vmem:[%s11856_s16 + $0x20] sm:$0xff] }
0x14cb   :  { %4796 = vmatpush1.bf16.msra.mxu1 %v9223_v13 }
0x14cc   :  { %4797 = vmatprep.subr.bf16.mxu1 %v9228_v10 }
0x14cd   :  { %4746 = vmatpush1.bf16.msra.mxu0 %v9223_v13  ;;  %v9280_v13 = vld [vmem:[%s11853_s13 + $0x2e0] ss:$8 sps:$4 sm:$0xff]  }
0x14ce   :  { %4747 = vmatprep.subr.bf16.mxu0 %v9228_v10  ;;  %v9285_v10 = vld [vmem:[%s11853_s13 + $0x2f4] ss:$8 sps:$4 sm:$0xff]  }
0x14cf   :  { %4798 = vmatpush1.bf16.msra.mxu1 %v9226_v60 }
0x14d0   :  { %4799 = vmatprep.subr.bf16.mxu1 %v9231_v15 }
0x14d1   :  { %4748 = vmatpush1.bf16.msra.mxu0 %v9226_v60  ;;  %v4862_v60 = vshrl.u32 %v4859_v63, 16 }
0x14d2   :  { %4749 = vmatprep.subr.bf16.mxu0 %v9231_v15  ;;  %v4865_v15 = vshll.u32 %v4859_v63, 16  ;;  %v5249_v63 = vld [vmem:[%s11856_s16 + $0x58] sm:$0xff] }
0x14d3   :  { %4800 = vmatpush1.bf16.msra.mxu1 %v9229_v29 }
0x14d4   :  { %4801 = vmatprep.subr.bf16.mxu1 %v9234_v3 }
0x14d5   :  { %4750 = vmatpush1.bf16.msra.mxu0 %v9229_v29  ;;  %v5051_v29 = vshll.u32 %v5046_v0, 16 }
0x14d6   :  { %4751 = vmatprep.subr.bf16.mxu0 %v9234_v3  ;;  %v9283_v3 = vld [vmem:[%s11853_s13 + $0x2f0] ss:$8 sps:$4 sm:$0xff]  }
0x14d7   :  { %4802 = vmatpush1.bf16.msra.mxu1 %v9232_v4 }
0x14d8   :  { %4803 = vmatprep.subr.bf16.mxu1 %v9237_v6 }
0x14d9   :  { %4752 = vmatpush1.bf16.msra.mxu0 %v9232_v4  ;;  %v4864_v4 = vrot.slane %v4862_v60, 1  ;;  %v5246_v60 = vld [vmem:[%s11856_s16 + $0x40] sm:$0xff] }
0x14da   :  { %4753 = vmatprep.subr.bf16.mxu0 %v9237_v6  ;;  %v4867_v6 = vrot.slane %v4865_v15, 2  ;;  %v5248_v15 = vld [vmem:[%s11856_s16 + $0x50] sm:$0xff] }
0x14db   :  { %4804 = vmatpush1.bf16.msra.mxu1 %v9235_v30 }
0x14dc   :  { %4805 = vmatprep.subr.bf16.mxu1 %v9240_v48  ;;  %v4868_v11 = vor.u32 %v4867_v6, %v4864_v4  ;;  %v8899_v4 = vpack.c.bf16 %v5248_v15, %v5246_v60  ;;  %v5250_v60 = vld [vmem:[%s11856_s16 + $0x60] sm:$0xff]  ;;  %v5252_v15 = vld [vmem:[%s11856_s16 + $0x70] sm:$0xff] }
0x14dd   :  { %4754 = vmatpush1.bf16.msra.mxu0 %v9235_v30  ;;  %v5140_v30 = vld [vmem:[%s11857_s17] sm:$0xff] }
0x14de   :  { %4755 = vmatprep.subr.bf16.mxu0 %v9240_v48  ;;  %v5141_v48 = vld [vmem:[%s11857_s17 + $0x8] sm:$0xff] }
0x14df   :  { %4806 = vmatpush1.bf16.msra.mxu1 %v9238_v7 }
0x14e0   :  { %4807 = vmatprep.subr.bf16.mxu1 %v9243_v58 }
0x14e1   :  { %4756 = vmatpush1.bf16.msra.mxu0 %v9238_v7  ;;  %v5053_v7 = vrot.slane %v5051_v29, 1  ;;  %v5251_v29 = vld [vmem:[%s11856_s16 + $0x68] sm:$0xff] }
0x14e2   :  { %4757 = vmatprep.subr.bf16.mxu0 %v9243_v58  ;;  %v5049_v58 = vshrl.u32 %v5046_v0, 16 }
0x14e3   :  { %4808 = vmatpush1.bf16.msra.mxu1 %v9241_v8 }
0x14e4   :  { %4809 = vmatprep.subr.bf16.mxu1 %v9246_v12  ;;  %v5054_v16 = vor.u32 %v5053_v7, %v5049_v58 }
0x14e5   :  { %4758 = vmatpush1.bf16.msra.mxu0 %v9241_v8  ;;  %v11072_v8 = vpack.c.bf16 %v5141_v48, %v5140_v30 }
0x14e6   :  { %4759 = vmatprep.subr.bf16.mxu0 %v9246_v12  ;;  %v5142_v12 = vld [vmem:[%s11857_s17 + $0x10] sm:$0xff] }
0x14e7   :  { %4810 = vmatpush1.bf16.msra.mxu1 %v9244_v23 }
0x14e8   :  { %4811 = vmatprep.subr.bf16.mxu1 %v9249_v27 }
0x14e9   :  { %4760 = vmatpush1.bf16.msra.mxu0 %v9244_v23  ;;  %v11082_v23 = vpack.c.bf16 %v5143_v25, %v5142_v12 }
0x14ea   :  { %4761 = vmatprep.subr.bf16.mxu0 %v9249_v27  ;;  %v5145_v27 = vld [vmem:[%s11857_s17 + $0x28] sm:$0xff] }
0x14eb   :  { %4812 = vmatpush1.bf16.msra.mxu1 %v9247_v33  ;;  %v11093_v2 = vpack.c.bf16 %v5145_v27, %v5144_v20 }
0x14ec   :  { %5066 = vmatprep.subr.bf16.mxu1 %v9252_v34 }
0x14ed   :  { %4762 = vmatpush1.bf16.msra.mxu0 %v9247_v33  ;;  %v11103_v33 = vpack.c.bf16 %v5147_v45, %v5146_v28 }
0x14ee   :  { %5001 = vmatprep.subr.bf16.mxu0 %v9252_v34  ;;  %4822 = vmatmul.mubr.bf16.vlgmr.msra.gmra.mrb[84].mxu1 %v4784_v42  ;;  %v5150_v34 = vld [vmem:[%s11857_s17 + $0x50] sm:$0xff]  ;;  %v5155_v42 = vld [vmem:[%s11857_s17 + $0x78] sm:$0xff] }
0x14ef   :  { %5067 = vmatpush1.bf16.msra.mxu1 %v9250_v39  ;;  %7633 = vmatprep.mubr.msk.bf16.mxu1 %vm88_vm1, %v5061_v49  ;;  %v11123_v38 = vpack.c.bf16 %v5151_v19, %v5150_v34 }
0x14f0   :  { %4772 = vmatmul.mubr.bf16.vlgmr.msra.gmra.mrb[80].mxu0 %v4613_v40  ;;  %5068 = vmatprep.subr.bf16.mxu1 %v9255_v44  ;;  %v5154_v40 = vld [vmem:[%s11857_s17 + $0x70] sm:$0xff] }
0x14f1   :  { %5002 = vmatpush1.bf16.msra.mxu0 %v9250_v39  ;;  %7632 = vmatprep.mubr.msk.bf16.mxu0 %vm88_vm1, %v4876_v31  ;;  %v5153_v39 = vld [vmem:[%s11857_s17 + $0x68] sm:$0xff]  ;;  %v11143_v41 = vpack.c.bf16 %v5155_v42, %v5154_v40 }
0x14f2   :  { %5003 = vmatprep.subr.bf16.mxu0 %v9255_v44  ;;  %v11133_v24 = vpack.c.bf16 %v5153_v39, %v5152_v62  ;;  %v5156_v44 = vld [vmem:[%s11857_s17 + $0x80] sm:$0xff]  ;;  %v5157_v31 = vld [vmem:[%s11857_s17 + $0x88] sm:$0xff] }
0x14f3   :  { %5069 = vmatpush1.bf16.msra.mxu1 %v9253_v50  ;;  %v11154_v49 = vpack.c.bf16 %v5157_v31, %v5156_v44 }
0x14f4   :  { %5070 = vmatprep.subr.bf16.mxu1 %v9258_v51 }
0x14f5   :  { %5004 = vmatpush1.bf16.msra.mxu0 %v9253_v50  ;;  %v5158_v50 = vld [vmem:[%s11857_s17 + $0x90] sm:$0xff] }
0x14f6   :  { %5005 = vmatprep.subr.bf16.mxu0 %v9258_v51  ;;  %v5159_v51 = vld [vmem:[%s11857_s17 + $0x98] sm:$0xff] }
0x14f7   :  { %5071 = vmatpush1.bf16.msra.mxu1 %v9256_v17 }
0x14f8   :  { %5072 = vmatprep.subr.bf16.mxu1 %v9261_v52 }
0x14f9   :  { %5006 = vmatpush1.bf16.msra.mxu0 %v9256_v17  ;;  %v11163_v17 = vpack.c.bf16 %v5159_v51, %v5158_v50 }
0x14fa   :  { %5007 = vmatprep.subr.bf16.mxu0 %v9261_v52  ;;  %v5160_v52 = vld [vmem:[%s11857_s17 + $0xa0] sm:$0xff] }
0x14fb   :  { %5073 = vmatpush1.bf16.msra.mxu1 %v9259_v53 }
0x14fc   :  { %5074 = vmatprep.subr.bf16.mxu1 %v9264_v54 }
0x14fd   :  { %5008 = vmatpush1.bf16.msra.mxu0 %v9259_v53  ;;  %v5161_v53 = vld [vmem:[%s11857_s17 + $0xa8] sm:$0xff] }
0x14fe   :  { %5009 = vmatprep.subr.bf16.mxu0 %v9264_v54  ;;  %v5162_v54 = vld [vmem:[%s11857_s17 + $0xb0] sm:$0xff] }
0x14ff   :  { %5075 = vmatpush1.bf16.msra.mxu1 %v9262_v55 }
0x1500   :  { %5076 = vmatprep.subr.bf16.mxu1 %v9267_v56 }
0x1501   :  { %5010 = vmatpush1.bf16.msra.mxu0 %v9262_v55  ;;  %v5163_v55 = vld [vmem:[%s11857_s17 + $0xb8] sm:$0xff] }
0x1502   :  { %5011 = vmatprep.subr.bf16.mxu0 %v9267_v56  ;;  %v5239_v56 = vld [vmem:[%s11856_s16 + $0x8] sm:$0xff] }
0x1503   :  { %5077 = vmatpush1.bf16.msra.mxu1 %v9265_v22 }
0x1504   :  { %5078 = vmatprep.subr.bf16.mxu1 %v9270_v59 }
0x1505   :  { %5012 = vmatpush1.bf16.msra.mxu0 %v9265_v22  ;;  %v5241_v22 = vld [vmem:[%s11856_s16 + $0x18] sm:$0xff] }
0x1506   :  { %5013 = vmatprep.subr.bf16.mxu0 %v9270_v59  ;;  %v5238_v59 = vld [vmem:[%s11856_s16] sm:$0xff] }
0x1507   :  { %5079 = vmatpush1.bf16.msra.mxu1 %v9268_v1 }
0x1508   :  { %5080 = vmatprep.subr.bf16.mxu1 %v9273_v26 }
0x1509   :  { %5014 = vmatpush1.bf16.msra.mxu0 %v9268_v1  ;;  %v11188_v1 = vpack.c.bf16 %v5161_v53, %v5160_v52 }
0x150a   :  { %5015 = vmatprep.subr.bf16.mxu0 %v9273_v26  ;;  %v8889_v26 = vpack.c.bf16 %v5241_v22, %v5239_v56 }
0x150b   :  { %5081 = vmatpush1.bf16.msra.mxu1 %v9271_v32 }
0x150c   :  { %5082 = vmatprep.subr.bf16.mxu1 %v9276_v43 }
0x150d   :  { %5016 = vmatpush1.bf16.msra.mxu0 %v9271_v32  ;;  %v5240_v32 = vld [vmem:[%s11856_s16 + $0x10] sm:$0xff] }
0x150e   :  { %5017 = vmatprep.subr.bf16.mxu0 %v9276_v43  ;;  %v5243_v43 = vld [vmem:[%s11856_s16 + $0x28] sm:$0xff] }
0x150f   :  { %5083 = vmatpush1.bf16.msra.mxu1 %v9274_v46 }
0x1510   :  { %5084 = vmatprep.subr.bf16.mxu1 %v9279_v47 }
0x1511   :  { %5018 = vmatpush1.bf16.msra.mxu0 %v9274_v46  ;;  %v5245_v46 = vld [vmem:[%s11856_s16 + $0x38] sm:$0xff] }
0x1512   :  { %5019 = vmatprep.subr.bf16.mxu0 %v9279_v47  ;;  %v11200_v47 = vpack.c.bf16 %v5240_v32, %v5238_v59  ;;  %v11202_v57 = vpack.c.bf16 %v5245_v46, %v5243_v43 }
0x1513   :  { %5085 = vmatpush1.bf16.msra.mxu1 %v9277_v5 }
0x1514   :  { %5086 = vmatprep.subr.bf16.mxu1 %v9282_v61 }
0x1515   :  { %5020 = vmatpush1.bf16.msra.mxu0 %v9277_v5  ;;  %v5244_v5 = vld [vmem:[%s11856_s16 + $0x30] sm:$0xff] }
0x1516   :  { %5021 = vmatprep.subr.bf16.mxu0 %v9282_v61  ;;  %v5247_v61 = vld [vmem:[%s11856_s16 + $0x48] sm:$0xff]  ;;  %v8895_v0 = vpack.c.bf16 %v5244_v5, %v5242_v21 }
0x1517   :  { %5087 = vmatpush1.bf16.msra.mxu1 %v9280_v13 }
0x1518   :  { %5088 = vmatprep.subr.bf16.mxu1 %v9285_v10 }
0x1519   :  { %5022 = vmatpush1.bf16.msra.mxu0 %v9280_v13  ;;  %v11218_v13 = vpack.c.bf16 %v5163_v55, %v5162_v54 }
0x151a   :  { %5023 = vmatprep.subr.bf16.mxu0 %v9285_v10  ;;  %v8897_v10 = vpack.c.bf16 %v5249_v63, %v5247_v61  ;;  %v11253_v63 = vld [vmem:[#allocation5] sm:$0xff] }
0x151b   :  { %5089 = vmatpush1.bf16.msra.mxu1 %v9283_v3  ;;  %99 = vst.msk [vmem:[#allocation5 + $0x28] sm:$0x3] %vm98_vm6, %v11253_v63 }
0x151c   :  { %8890 = vmatprep.subr.bf16.mxu1 %v8889_v26 }
0x151d   :  { %5024 = vmatpush1.bf16.msra.mxu0 %v9283_v3  ;;  %v5253_v3 = vld [vmem:[%s11856_s16 + $0x78] sm:$0xff] }
0x151e   :  { %8853 = vmatprep.subr.bf16.mxu0 %v9413_v18  ;;  %5099 = vmatmul.mubr.bf16.vlgmr.msra.gmra.mrb[84].mxu1 %v5054_v16  ;;  %v8901_v6 = vpack.c.bf16 %v5253_v3, %v5251_v29  ;;  %v8903_v29 = vpack.c.bf16 %v5252_v15, %v5250_v60  ;;  %v11351_v60 = vld [vmem:[%s11858_s18 + $0x130] sm:$0xff]   ;;  %v11357_v15 = vld [vmem:[%s11858_s18 + $0xa8] sm:$0xff]  }
0x151f   :  { %5321 = vmatprep.mubr.f32.mxu1 %v10715_v37  ;;  %v5148_v37 = vld [vmem:[%s11857_s17 + $0x40] sm:$0xff]  ;;  %8892 = vmatpush1.bf16.msra.mxu1 %v11200_v47 }
0x1520   :  { %5034 = vmatmul.mubr.bf16.vlgmr.msra.gmra.mrb[80].mxu0 %v4868_v11  ;;  %v11113_v36 = vpack.c.bf16 %v5149_v35, %v5148_v37  ;;  %8894 = vmatprep.subr.bf16.mxu1 %v11202_v57 }
0x1521   :  { %8855 = vmatpush1.bf16.msra.mxu0 %v11072_v8 }
0x1522   :  { %8856 = vmatprep.subr.bf16.mxu0 %v9413_v18 }
0x1523   :  { %8896 = vmatpush1.bf16.msra.mxu1 %v8895_v0 }
0x1524   :  { %8898 = vmatprep.subr.bf16.mxu1 %v8897_v10 }
0x1525   :  { %8858 = vmatpush1.bf16.msra.mxu0 %v11082_v23 }
0x1526   :  { %8859 = vmatprep.subr.bf16.mxu0 %v9413_v18 }
0x1527   :  { %8900 = vmatpush1.bf16.msra.mxu1 %v8899_v4 }
0x1528   :  { %8902 = vmatprep.subr.bf16.mxu1 %v8901_v6 }
0x1529   :  { %8861 = vmatpush1.bf16.msra.mxu0 %v11093_v2 }
0x152a   :  { %8862 = vmatprep.subr.bf16.mxu0 %v9413_v18 }
0x152b   :  { %8904 = vmatpush1.bf16.msra.mxu1 %v8903_v29 }
0x152c   :  { %8905 = vmatprep.subr.bf16.mxu1 %v9413_v18 }
0x152d   :  { %8864 = vmatpush1.bf16.msra.mxu0 %v11103_v33 }
0x152e   :  { %8865 = vmatprep.subr.bf16.mxu0 %v9413_v18 }
0x1531   :  { %8867 = vmatpush1.bf16.msra.mxu0 %v11113_v36 }
0x1532   :  { %8868 = vmatprep.subr.bf16.mxu0 %v9413_v18 }
0x1535   :  { %8870 = vmatpush1.bf16.msra.mxu0 %v11123_v38 }
0x1536   :  { %8871 = vmatprep.subr.bf16.mxu0 %v9413_v18 }
0x1539   :  { %8873 = vmatpush1.bf16.msra.mxu0 %v11133_v24 }
0x153a   :  { %8874 = vmatprep.subr.bf16.mxu0 %v9413_v18 }
0x153d   :  { %8876 = vmatpush1.bf16.msra.mxu0 %v11143_v41 }
0x153e   :  { %8877 = vmatprep.subr.bf16.mxu0 %v9413_v18 }
0x1541   :  { %8879 = vmatpush1.bf16.msra.mxu0 %v11154_v49 }
0x1542   :  { %8880 = vmatprep.subr.bf16.mxu0 %v9413_v18 }
0x1545   :  { %8882 = vmatpush1.bf16.msra.mxu0 %v11163_v17 }
0x1546   :  { %8883 = vmatprep.subr.bf16.mxu0 %v9413_v18 }
0x1549   :  { %8885 = vmatpush1.bf16.msra.mxu0 %v11188_v1 }
0x154a   :  { %8886 = vmatprep.subr.bf16.mxu0 %v9413_v18 }
0x154d   :  { %8888 = vmatpush1.bf16.msra.mxu0 %v11218_v13 }
0x154e   :  { %8942 = vmatprep.subr.bf16.mxu0 %v8889_v26 }
0x15f1   :  { %v11239_v7 = vpop.f32.mrb[84].mxu1 }
0x15f2   :  { %v5124_v12 = vsel %vm359_vm7, %v11239_v7, 0.0  ;;  %v11247_v16 = vpop.f32.mrb[85].mxu1 }
0x15f3   :  { %v11235_v30 = vpop.f32.mrb[80].mxu0  ;;  %v5125_v27 = vrot.slane %v5124_v12, 4  ;;  %v5131_v45 = vsel %vm5116_vm2, %v11247_v16, 0.0  ;;  %v5104_v37 = vpop.f32.mrb[86].mxu1 }
0x15f4   :  { %v5109_v48 = vsel %vm359_vm7, %v11235_v30, 0.0  ;;  %v11241_v58 = vpop.f32.mrb[81].mxu0  ;;  %v5132_v19 = vrot.slane %v5131_v45, 4  ;;  %v5105_v62 = vpop.f32.mrb[87].mxu1 }
0x15f5   :  { %v5110_v11 = vrot.slane %v5109_v48, 4  ;;  %v5117_v25 = vsel %vm5116_vm2, %v11241_v58, 0.0  ;;  %v5039_v20 = vpop.f32.mrb[82].mxu0  ;;  %v5126_v39 = vadd.f32 %v5125_v27, %v5124_v12 }
0x15f6   :  { %v5118_v28 = vrot.slane %v5117_v25, 4  ;;  %v5040_v35 = vpop.f32.mrb[83].mxu0  ;;  %v5133_v44 = vadd.f32 %v5132_v19, %v5131_v45 }
0x15f7   :  { %v5111_v34 = vadd.f32 %v5110_v11, %v5109_v48  ;;  %v5127_v31 = vrot.slane %v5126_v39, 2 }
0x15f8   :  { %v5119_v40 = vadd.f32 %v5118_v28, %v5117_v25  ;;  %v5134_v52 = vrot.slane %v5133_v44, 2 }
0x15f9   :  { %v5112_v42 = vrot.slane %v5111_v34, 2  ;;  %v5128_v53 = vadd.f32 %v5127_v31, %v5126_v39 }
0x15fa   :  { %v5120_v50 = vrot.slane %v5119_v40, 2  ;;  %v5135_v56 = vadd.f32 %v5134_v52, %v5133_v44 }
0x15fb   :  { %v5113_v51 = vadd.f32 %v5112_v42, %v5111_v34  ;;  %v5129_v22 = vrot.slane %v5128_v53, 1 }
0x15fc   :  { %v5121_v54 = vadd.f32 %v5120_v50, %v5119_v40  ;;  %v5136_v32 = vrot.slane %v5135_v56, 1 }
0x15fd   :  { %v5114_v55 = vrot.slane %v5113_v51, 1  ;;  %v5130_v43 = vadd.f32 %v5129_v22, %v5128_v53 }
0x15fe   :  { %v5122_v59 = vrot.slane %v5121_v54, 1  ;;  %v5137_v21 = vadd.f32 %v5136_v32, %v5135_v56  ;;  %v11328_v32 = vld [vmem:[%s11858_s18 + $0x128] sm:$0xff]  }
0x15ff   :  { %v5115_v26 = vadd.f32 %v5114_v55, %v5113_v51 }
0x1600   :  { %v5123_v46 = vadd.f32 %v5122_v59, %v5121_v54  ;;  %v11322_v59 = vld [vmem:[%s11858_s18 + $0x120] sm:$0xff]  }
0x1601   :  { %v5138_v5 = vadd.f32 %v5130_v43, %v5115_v26  ;;  %v5706_v26 = vld [vmem:[#allocation5 + $0x10] sm:$0x6] }
0x1602   :  { %v5139_v61 = vadd.f32 %v5137_v21, %v5123_v46  ;;  %v5709_v43 = vpack.c.bf16 %v5706_v26, %v5706_v26  ;;  %v11334_v46 = vld [vmem:[%s11858_s18 + $0xe0] sm:$0xff]   ;;  %v11530_v26 = vld [vmem:[%s11858_s18 + $0x38] sm:$0xff]  }
0x1603   :  { %v11339_v21 = vld [vmem:[%s11858_s18 + $0xa0] sm:$0xff]  }
0x1604   :  { %7634 = vmatprep.mubr.msk.f32.mxu0 %vm88_vm1, %v5139_v61  ;;  %v5727_v61 = vshll.u32 %v5709_v43, 16 }
0x1605   :  { %5232 = vmatmul.mubr.f32.vlgmr.msra.gmra.mrb[78].mxu0 %v5138_v5  ;;  %v11344_v5 = vld [vmem:[%s11858_s18 + $0xe8] sm:$0xff]  }
0x1606   :  { %8944 = vmatpush1.bf16.msra.mxu0 %v11200_v47  ;;  %5517 = vmatprep.mubr.f32.mxu0 %v11253_v63 }
0x1607   :  { %8946 = vmatprep.subr.bf16.mxu0 %v11202_v57 }
0x160a   :  { %8948 = vmatpush1.bf16.msra.mxu0 %v8895_v0 }
0x160b   :  { %8950 = vmatprep.subr.bf16.mxu0 %v8897_v10 }
0x160e   :  { %8952 = vmatpush1.bf16.msra.mxu0 %v8899_v4 }
0x160f   :  { %8954 = vmatprep.subr.bf16.mxu0 %v8901_v6 }
0x1612   :  { %8956 = vmatpush1.bf16.msra.mxu0 %v8903_v29  ;;  %v11364_v29 = vld [vmem:[%s11858_s18 + $0xf0] sm:$0xff]  }
0x1613   :  { %8027 = vmatprep.subr.bf16.mxu0 %v11334_v46 }
0x16d8   :  { %v5233_v47 = vpop.f32.mrb[78].mxu0 }
0x16d9   :  { %v5237_v3 = vmul.f32 0.055555556, %v5233_v47  ;;  %v5235_v57 = vpop.f32.mrb[79].mxu0  ;;  %v5725_v47 = vshrl.u32 %v5709_v43, 16 }
0x16da   :  { %v11370_v57 = vld [vmem:[%s11858_s18 + $0x138] sm:$0xff]  }
0x16db   :  { %7635 = vmatmul.mubr.msk.f32.vlgmr.msra.gmra.mrb[82].mxu1 %vm88_vm1, %v5237_v3  ;;  %v5729_v3 = vrot.slane %v5727_v61, 1 }
0x16dc   :  { %8907 = vmatpush1.bf16.msra.mxu1 %v11072_v8 }
0x16dd   :  { %8908 = vmatprep.subr.bf16.mxu1 %v9413_v18 }
0x16e0   :  { %8910 = vmatpush1.bf16.msra.mxu1 %v11082_v23 }
0x16e1   :  { %8911 = vmatprep.subr.bf16.mxu1 %v9413_v18 }
0x16e4   :  { %8913 = vmatpush1.bf16.msra.mxu1 %v11093_v2 }
0x16e5   :  { %8914 = vmatprep.subr.bf16.mxu1 %v9413_v18 }
0x16e8   :  { %8916 = vmatpush1.bf16.msra.mxu1 %v11103_v33 }
0x16e9   :  { %8917 = vmatprep.subr.bf16.mxu1 %v9413_v18 }
0x16ec   :  { %8919 = vmatpush1.bf16.msra.mxu1 %v11113_v36 }
0x16ed   :  { %8920 = vmatprep.subr.bf16.mxu1 %v9413_v18 }
0x16f0   :  { %8922 = vmatpush1.bf16.msra.mxu1 %v11123_v38 }
0x16f1   :  { %8923 = vmatprep.subr.bf16.mxu1 %v9413_v18 }
0x16f4   :  { %8925 = vmatpush1.bf16.msra.mxu1 %v11133_v24 }
0x16f5   :  { %8926 = vmatprep.subr.bf16.mxu1 %v9413_v18 }
0x16f8   :  { %8928 = vmatpush1.bf16.msra.mxu1 %v11143_v41 }
0x16f9   :  { %8929 = vmatprep.subr.bf16.mxu1 %v9413_v18 }
0x16fc   :  { %8931 = vmatpush1.bf16.msra.mxu1 %v11154_v49 }
0x16fd   :  { %8932 = vmatprep.subr.bf16.mxu1 %v9413_v18 }
0x1700   :  { %8934 = vmatpush1.bf16.msra.mxu1 %v11163_v17 }
0x1701   :  { %8935 = vmatprep.subr.bf16.mxu1 %v9413_v18 }
0x1704   :  { %8937 = vmatpush1.bf16.msra.mxu1 %v11188_v1 }
0x1705   :  { %8938 = vmatprep.subr.bf16.mxu1 %v9413_v18 }
0x1708   :  { %8940 = vmatpush1.bf16.msra.mxu1 %v11218_v13 }
0x1709   :  { %8643 = vmatprep.subr.bf16.mxu1 %v11253_v63 }
0x17ae   :  { %v5323_v8 = vpop.f32.mrb[82].mxu1 }
0x17af   :  { %v5331_v23 = vrot.slane %v5323_v8, %v10333_v14  ;;  %v5325_v2 = vpop.f32.mrb[83].mxu1  ;;  %v11376_v8 = vld [vmem:[%s11858_s18 + $0xb0] sm:$0xff]  }
0x17b0   :  { %v5335_v33 = vrot.slane %v5325_v2, %v10333_v14  ;;  %v11388_v2 = vld [vmem:[%s11858_s18 + $0xf8] sm:$0xff]  }
0x17b1   :  { %v11292_v36 = vsub.f32 %v11235_v30, %v5331_v23  ;;  %v11295_v38 = vsub.f32 %v11239_v7, %v5331_v23  ;;  %v11382_v23 = vld [vmem:[%s11858_s18 + $0x40] sm:$0xff]  }
0x17b2   :  { %v11298_v24 = vsub.f32 %v11241_v58, %v5335_v33  ;;  %v11301_v18 = vsub.f32 %v11247_v16, %v5335_v33  ;;  %v5730_v33 = vor.u32 %v5729_v3, %v5725_v47  ;;  %v11538_v3 = vld [vmem:[%s11858_s18 + $0xd0] sm:$0xff]  }
0x17b3   :  { %v5338_v41 = vmul.f32 %v11292_v36, %v11292_v36  ;;  %v5356_v49 = vmul.f32 %v11295_v38, %v11295_v38 }
0x17b4   :  { %v5339_v17 = vmul.f32 %v11298_v24, %v11298_v24  ;;  %v5357_v1 = vmul.f32 %v11301_v18, %v11301_v18 }
0x17b5   :  { %v5340_v0 = vsel %vm359_vm7, %v5338_v41, 0.0  ;;  %v5358_v13 = vsel %vm359_vm7, %v5356_v49, 0.0  ;;  %v11394_v41 = vld [vmem:[%s11858_s18] sm:$0xff]   ;;  %v11400_v49 = vld [vmem:[%s11858_s18 + $0xb8] sm:$0xff]  }
0x17b6   :  { %v5341_v10 = vrot.slane %v5340_v0, 4  ;;  %v5359_v4 = vrot.slane %v5358_v13, 4  ;;  %v5347_v6 = vsel %vm5116_vm2, %v5339_v17, 0.0  ;;  %v5365_v30 = vsel %vm5116_vm2, %v5357_v1, 0.0  ;;  %v11406_v17 = vld [vmem:[%s11858_s18 + $0x48] sm:$0xff]  }
0x17b7   :  { %v5348_v48 = vrot.slane %v5347_v6, 4  ;;  %v5366_v7 = vrot.slane %v5365_v30, 4  ;;  %v11414_v1 = vld [vmem:[%s11858_s18 + $0x8] sm:$0xff]  }
0x17b8   :  { %v5342_v58 = vadd.f32 %v5341_v10, %v5340_v0  ;;  %v5360_v11 = vadd.f32 %v5359_v4, %v5358_v13  ;;  %v11421_v0 = vld [vmem:[%s11858_s18 + $0x50] sm:$0xff]   ;;  %v11433_v10 = vld [vmem:[%s11858_s18 + $0x58] sm:$0xff]  }
0x17b9   :  { %v5349_v12 = vadd.f32 %v5348_v48, %v5347_v6  ;;  %v5367_v25 = vadd.f32 %v5366_v7, %v5365_v30  ;;  %v11427_v13 = vld [vmem:[%s11858_s18 + $0x10] sm:$0xff]   ;;  %v11439_v4 = vld [vmem:[%s11858_s18 + $0x18] sm:$0xff]   ;;  %v11445_v6 = vld [vmem:[%s11858_s18 + $0x60] sm:$0xff]   ;;  %v5542_v7 = vsub.s32 1, %v9560_v9 }
0x17ba   :  { %v5343_v16 = vrot.slane %v5342_v58, 2  ;;  %v5361_v20 = vrot.slane %v5360_v11, 2  ;;  %v11451_v30 = vld [vmem:[%s11858_s18 + $0x20] sm:$0xff]  }
0x17bb   :  { %v5350_v27 = vrot.slane %v5349_v12, 2  ;;  %v5368_v28 = vrot.slane %v5367_v25, 2  ;;  %v5534_v48 = vld [vmem:[%s11854_s14] sm:$0x3] }
0x17bc   :  { %v5344_v45 = vadd.f32 %v5343_v16, %v5342_v58  ;;  %v5362_v37 = vadd.f32 %v5361_v20, %v5360_v11  ;;  %v5548_v11 = vld [vmem:[%s11855_s15] sm:$0x3]  ;;  %v11467_v20 = vld [vmem:[%s11858_s18 + $0x68] sm:$0xff]  }
0x17bd   :  { %v5351_v35 = vadd.f32 %v5350_v27, %v5349_v12  ;;  %v5369_v34 = vadd.f32 %v5368_v28, %v5367_v25  ;;  %v5539_v25 = vrot.slane %v5534_v48, %v10333_v14  ;;  %v5543_v28 = vrot.slane %v5534_v48, %v5542_v7 }
0x17be   :  { %v5345_v19 = vrot.slane %v5344_v45, 1  ;;  %v5363_v62 = vrot.slane %v5362_v37, 1 }
0x17bf   :  { %v5352_v39 = vrot.slane %v5351_v35, 1  ;;  %v5370_v40 = vrot.slane %v5369_v34, 1 }
0x17c0   :  { %v5346_v42 = vadd.f32 %v5345_v19, %v5344_v45  ;;  %v5364_v44 = vadd.f32 %v5363_v62, %v5362_v37  ;;  %v5553_v45 = vrot.slane %v5548_v11, %v10333_v14 }
0x17c1   :  { %v5353_v31 = vadd.f32 %v5352_v39, %v5351_v35  ;;  %v5371_v50 = vadd.f32 %v5370_v40, %v5369_v34  ;;  %v11477_v35 = vld [vmem:[%s11858_s18 + $0x28] sm:$0xff]   ;;  %v11482_v34 = vld [vmem:[%s11858_s18 + $0x100] sm:$0xff]   ;;  %v11496_v40 = vld [vmem:[%s11858_s18 + $0x70] sm:$0xff]  }
0x17c2   :  { %v5372_v52 = vadd.f32 %v5364_v44, %v5346_v42 }
0x17c3   :  { %v5373_v51 = vadd.f32 %v5371_v50, %v5353_v31  ;;  %v11508_v50 = vld [vmem:[%s11858_s18 + $0x108] sm:$0xff]  }
0x17c5   :  { %7636 = vmatprep.mubr.msk.f32.mxu1 %vm88_vm1, %v5373_v51  ;;  %v11513_v51 = vld [vmem:[%s11858_s18 + $0xc8] sm:$0xff]  }
0x17c6   :  { %5442 = vmatmul.mubr.f32.vlgmr.msra.gmra.mrb[88].mxu1 %v5372_v52 }
0x17c7   :  { %8651 = vmatprep.mubr.msk.bf16.mxu1 %vm9410_vm0, %v11253_v63  ;;  %8644 = vmatpush3.bf16.msra.mxu1 %v11322_v59 }
0x17c8   :  { %8645 = vmatprep.subr.bf16.mxu1 %v11253_v63 }
0x17cb   :  { %8646 = vmatpush3.bf16.msra.mxu1 %v11328_v32 }
0x17cc   :  { %8647 = vmatprep.subr.bf16.mxu1 %v11253_v63 }
0x17cf   :  { %8648 = vmatpush3.bf16.msra.mxu1 %v11351_v60 }
0x17d0   :  { %8649 = vmatprep.subr.bf16.mxu1 %v11253_v63 }
0x17d3   :  { %8650 = vmatpush3.bf16.msra.mxu1 %v11370_v57 }
0x17d4   :  { %8054 = vmatprep.subr.bf16.mxu1 %v11382_v23 }
0x17d6   :  { %8652 = vmatmul.mubr.msk.bf16.vlgmr.msra.gmra.mrb[92].mxu1 %vm88_vm1, %v5730_v33 }
0x17d7   :  { %8055 = vmatpush3.bf16.msra.mxu1 %v11394_v41 }
0x17d8   :  { %8056 = vmatprep.subr.bf16.mxu1 %v11406_v17 }
0x17db   :  { %8057 = vmatpush3.bf16.msra.mxu1 %v11414_v1 }
0x17dc   :  { %8058 = vmatprep.subr.bf16.mxu1 %v11421_v0 }
0x17df   :  { %8059 = vmatpush3.bf16.msra.mxu1 %v11427_v13 }
0x17e0   :  { %8060 = vmatprep.subr.bf16.mxu1 %v11433_v10 }
0x17e3   :  { %8061 = vmatpush3.bf16.msra.mxu1 %v11439_v4 }
0x17e4   :  { %8062 = vmatprep.subr.bf16.mxu1 %v11445_v6 }
0x17e7   :  { %8063 = vmatpush3.bf16.msra.mxu1 %v11451_v30 }
0x17e8   :  { %8064 = vmatprep.subr.bf16.mxu1 %v11467_v20 }
0x17eb   :  { %8065 = vmatpush3.bf16.msra.mxu1 %v11477_v35 }
0x17ec   :  { %8066 = vmatprep.subr.bf16.mxu1 %v11496_v40 }
0x1899   :  { %v5443_v53 = vpop.f32.mrb[88].mxu1 }
0x189a   :  { %v5447_v54 = vmul.f32 0.055555556, %v5443_v53  ;;  %v5445_v55 = vpop.f32.mrb[89].mxu1 }
0x189b   :  { %v11523_v55 = vld [vmem:[%s11858_s18 + $0x110] sm:$0xff]  }
0x189c   :  { %v5448_v56 = vadd.f32 1e-05, %v5447_v54  ;;  %v11518_v54 = vld [vmem:[%s11858_s18 + $0x78] sm:$0xff]  }
0x189e   :  { %9370 = vrsqrt.f32 %v5448_v56 }
0x18a8   :  { %v9371_v22 = vpop.eup %9370 }
0x18a9   :  { %7637 = vmatmul.mubr.msk.f32.vlgmr.msra.gmra.mrb[84].mxu0 %vm88_vm1, %v9371_v22 }
0x18aa   :  { %8028 = vmatpush3.bf16.msra.mxu0 %v11339_v21 }
0x18ab   :  { %8029 = vmatprep.subr.bf16.mxu0 %v11344_v5 }
0x18ae   :  { %8030 = vmatpush3.bf16.msra.mxu0 %v11357_v15 }
0x18af   :  { %8031 = vmatprep.subr.bf16.mxu0 %v11364_v29 }
0x18b2   :  { %8032 = vmatpush3.bf16.msra.mxu0 %v11376_v8 }
0x18b3   :  { %8033 = vmatprep.subr.bf16.mxu0 %v11388_v2 }
0x18b6   :  { %8034 = vmatpush3.bf16.msra.mxu0 %v11400_v49 }
0x18b7   :  { %8035 = vmatprep.subr.bf16.mxu0 %v11482_v34 }
0x197c   :  { %v5519_v58 = vpop.f32.mrb[84].mxu0 }
0x197d   :  { %v5527_v12 = vrot.slane %v5519_v58, %v10333_v14  ;;  %v5521_v16 = vpop.f32.mrb[85].mxu0 }
0x197e   :  { %v5531_v27 = vrot.slane %v5521_v16, %v10333_v14 }
0x197f   :  { %v5532_v9 = vmul.f32 %v5527_v12, %v11292_v36  ;;  %v5568_v37 = vmul.f32 %v5527_v12, %v11295_v38  ;;  %v11487_v36 = vld [vmem:[%s11858_s18 + $0xc0] sm:$0xff]   ;;  %v5557_v38 = vrot.slane %v5548_v11, %v5542_v7  ;;  %v11546_v12 = vld [vmem:[%s11858_s18 + $0x118] sm:$0xff]  }
0x1980   :  { %v5533_v14 = vmul.f32 %v5531_v27, %v11298_v24  ;;  %v5569_v19 = vmul.f32 %v5531_v27, %v11301_v18  ;;  %8036 = vmatpush3.bf16.msra.mxu0 %v11487_v36  ;;  %v11503_v18 = vld [vmem:[%s11858_s18 + $0x30] sm:$0xff]  }
0x1981   :  { %v5546_v62 = vmul.f32 %v5539_v25, %v5532_v9  ;;  %v5570_v39 = vmul.f32 %v5568_v37, %v5539_v25  ;;  %8067 = vmatpush3.bf16.msra.mxu1 %v11503_v18  ;;  %8037 = vmatprep.subr.bf16.mxu0 %v11508_v50  ;;  %v11551_v25 = vld [vmem:[%s11858_s18 + $0xd8] sm:$0xff]  }
0x1982   :  { %v5547_v42 = vmul.f32 %v5543_v28, %v5533_v14  ;;  %v5571_v44 = vmul.f32 %v5569_v19, %v5543_v28  ;;  %8068 = vmatprep.subr.bf16.mxu1 %v11518_v54 }
0x1983   :  { %v5560_v31 = vadd.f32 %v5553_v45, %v5546_v62  ;;  %v5572_v24 = vadd.f32 %v5570_v39, %v5553_v45 }
0x1984   :  { %v5561_v52 = vadd.f32 %v5557_v38, %v5547_v42  ;;  %v5573_v53 = vadd.f32 %v5571_v44, %v5557_v38  ;;  %8038 = vmatpush3.bf16.msra.mxu0 %v11513_v51 }
0x1985   :  { %vm5562_vm7 = vcmp.ge.f32.partialorder %v5560_v31, 0.0  ;;  %v5564_v56 = vmul.f32 0.2, %v5560_v31  ;;  %v5576_v22 = vmul.f32 0.2, %v5572_v24  ;;  %vm5574_vm4 = vcmp.ge.f32.partialorder %v5572_v24, 0.0  ;;  %8039 = vmatprep.subr.bf16.mxu0 %v11523_v55  ;;  %8069 = vmatpush3.bf16.msra.mxu1 %v11530_v26 }
0x1986   :  { %vm5563_vm3 = vcmp.ge.f32.partialorder %v5561_v52, 0.0  ;;  %v5565_v43 = vmul.f32 0.2, %v5561_v52  ;;  %v5577_v61 = vmul.f32 0.2, %v5573_v53  ;;  %vm5575_vm5 = vcmp.ge.f32.partialorder %v5573_v53, 0.0  ;;  %8667 = vmatprep.subr.bf16.mxu1 %v11253_v63 }
0x1987   :  { %v5566_v47 = vsel %vm5562_vm7, %v5560_v31, %v5564_v56  ;;  %v5578_v58 = vsel %vm5574_vm4, %v5572_v24, %v5576_v22 }
0x1988   :  { %v5582_v33 = vrot.slane %v5566_v47, 7  ;;  %v5567_v48 = vsel %vm5563_vm3, %v5561_v52, %v5565_v43  ;;  %v5579_v11 = vsel %vm5575_vm5, %v5573_v53, %v5577_v61  ;;  %8040 = vmatpush3.bf16.msra.mxu0 %v11538_v3  ;;  %v5596_v16 = vrot.slane %v5578_v58, 2 }
0x1989   :  { %v5583_v7 = vrot.slane %v5567_v48, 7  ;;  %v5597_v27 = vrot.slane %v5579_v11, 2  ;;  %8041 = vmatprep.subr.bf16.mxu0 %v11546_v12 }
0x198a   :  { %5584 = vrot.lane.b32.xlu0 %v5582_v33, %s9416_s29 }
0x198b   :  { %5586 = vrot.lane.b32.xlu1 %v5583_v7, %s9416_s29  ;;  %v11566_v7 = vld [vmem:[%s11858_s18 + $0x80] sm:$0xff]  }
0x198c   :  { %8042 = vmatpush3.bf16.msra.mxu0 %v11551_v25 }
0x198d   :  { %8655 = vmatprep.subr.bf16.mxu0 %v11253_v63 }
0x198e   :  { %5598 = vrot.lane.b32.xlu0 %v5596_v16, %s9416_s29  ;;  %v11574_v16 = vld [vmem:[%s11858_s18 + $0x88] sm:$0xff]  }
0x198f   :  { %5600 = vrot.lane.b32.xlu1 %v5597_v27, %s9416_s29 }
0x19fc   :  { %v5585_v28 = vpop.permute.xlu0 %5584 }
0x19fd   :  { %5592 = vst.msk [vmem:[#allocation5] sm:$0xe] %vm5591_vm13, %v5585_v28  ;;  %v5587_v9 = vpop.permute.xlu1 %5586 }
0x19fe   :  { %v5588_v45 = vsel %vm88_vm1, %v5585_v28, %v5587_v9  ;;  %v11585_v9 = vld [vmem:[%s11858_s18 + $0x90] sm:$0xff]  }
0x19ff   :  { %5593 = vst [vmem:[#allocation5 + $0x8] sm:$0xe] %v5588_v45 }
0x1a00   :  { %v5599_v37 = vpop.permute.xlu0 %5598 }
0x1a01   :  { %5606 = vst.msk [vmem:[#allocation5] sm:$0xc0] %vm5605_vm8, %v5599_v37  ;;  %v5601_v14 = vpop.permute.xlu1 %5600 }
0x1a02   :  { %5609 = vst.msk [vmem:[#allocation5 + $0x18] sm:$0x1] %vm5608_vm9, %v5599_v37  ;;  %v5602_v38 = vsel %vm88_vm1, %v5599_v37, %v5601_v14 }
0x1a03   :  { %5607 = vst [vmem:[#allocation5 + $0x20] ss:$-20 sps:$4 sm:$0xc1] %v5602_v38  }
0x1a04   :  { %v5704_v19 = vld [vmem:[#allocation5] sm:$0x6] }
0x1a05   :  { %v5651_v62 = vld [vmem:[#allocation5] sm:$0x3]  ;;  %v5707_v39 = vpack.c.bf16 %v5704_v19, %v5704_v19  ;;  %v11594_v19 = vld [vmem:[%s11858_s18 + $0x98] sm:$0xff]  }
0x1a06   :  { %v5652_v42 = vld [vmem:[#allocation5 + $0x8] sm:$0x3]  ;;  %v5654_v53 = vpack.c.bf16 %v5651_v62, %v5651_v62  ;;  %v5653_v62 = vld [vmem:[#allocation5 + $0x10] sm:$0x3] }
0x1a07   :  { %v5705_v44 = vld [vmem:[#allocation5 + $0x8] sm:$0x6]  ;;  %v5655_v31 = vpack.c.bf16 %v5652_v42, %v5652_v42  ;;  %v5713_v52 = vshll.u32 %v5707_v39, 16  ;;  %v5711_v33 = vshrl.u32 %v5707_v39, 16 }
0x1a08   :  { %v5708_v24 = vpack.c.bf16 %v5705_v44, %v5705_v44 }
0x1a09   :  { %6091 = vmatprep.mubr.bf16.mxu1 %v5655_v31  ;;  %v5715_v22 = vrot.slane %v5713_v52, 1  ;;  %v9331_v31 = vld [vmem:[%s11858_s18 + $0x140] sm:$0xff]  }
0x1a0a   :  { %v5720_v56 = vshll.u32 %v5708_v24, 16  ;;  %6092 = vmatmul.mubr.bf16.vlgmr.msra.gmra.mrb[96].mxu1 %v5654_v53  ;;  %v5658_v43 = vld [vmem:[#allocation5 + $0x8] sm:$0x60]  ;;  %v5718_v61 = vshrl.u32 %v5708_v24, 16 }
0x1a0b   :  { %8668 = vmatpush3.bf16.msra.mxu1 %v11322_v59  ;;  %8675 = vmatprep.mubr.msk.bf16.mxu1 %vm9410_vm0, %v11253_v63  ;;  %v5661_v58 = vpack.c.bf16 %v5658_v43, %v5658_v43  ;;  %v5716_v11 = vor.u32 %v5715_v22, %v5711_v33  ;;  %v6141_v59 = vld [vmem:[#allocation5 + $0x10] sm:$0xc0]  ;;  %v6140_v38 = vld [vmem:[#allocation5 + $0x8] sm:$0xc0] }
0x1a0c   :  { %v5722_v47 = vrot.slane %v5720_v56, 1  ;;  %8669 = vmatprep.subr.bf16.mxu1 %v11253_v63  ;;  %v9332_v24 = vld [vmem:[%s11858_s18 + $0x188] sm:$0xff]   ;;  %v9334_v33 = vld [vmem:[%s11858_s18 + $0x190] sm:$0xff]  }
0x1a0d   :  { %v6245_v27 = vshrl.u32 %v5661_v58, 16  ;;  %v6248_v28 = vshll.u32 %v5661_v58, 16  ;;  %v6387_v56 = vld [vmem:[#allocation5 + $0x8] sm:$0xc]  ;;  %v9336_v58 = vld [vmem:[%s11858_s18 + $0x198] sm:$0xff]  }
0x1a0e   :  { %v5723_v48 = vor.u32 %v5722_v47, %v5718_v61  ;;  %v9333_v43 = vld [vmem:[%s11858_s18 + $0x148] sm:$0xff]   ;;  %v6390_v61 = vpack.c.bf16 %v6387_v56, %v6387_v56  ;;  %v9354_v56 = vld [vmem:[%s11858_s18 + $0x230] sm:$0xff]  }
0x1a0f   :  { %8670 = vmatpush3.bf16.msra.mxu1 %v11328_v32  ;;  %v6144_v32 = vpack.c.bf16 %v6141_v59, %v6141_v59  ;;  %v6247_v45 = vrot.slane %v6245_v27, 2  ;;  %v6250_v37 = vrot.slane %v6248_v28, 3  ;;  %v9338_v59 = vld [vmem:[%s11858_s18 + $0x1a0] sm:$0xff]   ;;  %v9340_v27 = vld [vmem:[%s11858_s18 + $0x1a8] sm:$0xff]  }
0x1a10   :  { %5888 = vmatprep.mubr.bf16.mxu0 %v5723_v48  ;;  %8671 = vmatprep.subr.bf16.mxu1 %v11253_v63  ;;  %v6396_v48 = vrot.slane %v6390_v61, 1  ;;  %v6604_v28 = vld [vmem:[#allocation5] sm:$0x80] }
0x1a11   :  { %5889 = vmatmul.mubr.bf16.vlgmr.msra.gmra.mrb[88].mxu0 %v5716_v11  ;;  %v6150_v14 = vrot.slane %v6144_v32, 3  ;;  %v9337_v11 = vld [vmem:[%s11858_s18 + $0x158] sm:$0xff]   ;;  %v9358_v61 = vld [vmem:[%s11858_s18 + $0x240] sm:$0xff]  }
0x1a12   :  { %8656 = vmatpush3.bf16.msra.mxu0 %v11566_v7  ;;  %8663 = vmatprep.mubr.msk.bf16.mxu0 %vm9410_vm0, %v11253_v63  ;;  %v6607_v32 = vld [vmem:[#allocation5 + $0x18] sm:$0x1] }
0x1a13   :  { %8657 = vmatprep.subr.bf16.mxu0 %v11253_v63  ;;  %8672 = vmatpush3.bf16.msra.mxu1 %v11351_v60  ;;  %v6251_v60 = vor.u32 %v6250_v37, %v6247_v45  ;;  %v9342_v45 = vld [vmem:[%s11858_s18 + $0x1b0] sm:$0xff]   ;;  %v6610_v37 = vpack.c.bf16 %v6607_v32, %v6604_v28  ;;  %v7000_v28 = vld [vmem:[#allocation5 + $0x18] sm:$0x3] }
0x1a14   :  { %8673 = vmatprep.subr.bf16.mxu1 %v11253_v63 }
0x1a16   :  { %8658 = vmatpush3.bf16.msra.mxu0 %v11574_v16 }
0x1a17   :  { %8659 = vmatprep.subr.bf16.mxu0 %v11253_v63  ;;  %8674 = vmatpush3.bf16.msra.mxu1 %v11370_v57  ;;  %v6143_v57 = vpack.c.bf16 %v6140_v38, %v6140_v38  ;;  %v9344_v38 = vld [vmem:[%s11858_s18 + $0x1b8] sm:$0xff]  }
0x1a18   :  { %8108 = vmatprep.subr.bf16.mxu1 %v11382_v23  ;;  %v5656_v23 = vpack.c.bf16 %v5653_v62, %v5653_v62  ;;  %v9345_v62 = vld [vmem:[%s11858_s18 + $0x178] sm:$0xff]  }
0x1a19   :  { %v6149_v39 = vrot.slane %v6143_v57, 3 }
0x1a1a   :  { %8660 = vmatpush3.bf16.msra.mxu0 %v11585_v9  ;;  %8676 = vmatmul.mubr.msk.bf16.vlgmr.msra.gmra.mrb[100].mxu1 %vm88_vm1, %v6150_v14  ;;  %v9343_v14 = vld [vmem:[%s11858_s18 + $0x170] sm:$0xff]  }
0x1a1b   :  { %8661 = vmatprep.subr.bf16.mxu0 %v11253_v63  ;;  %8109 = vmatpush3.bf16.msra.mxu1 %v11394_v41 }
0x1a1c   :  { %6297 = vmatprep.mubr.bf16.mxu1 %v6251_v60  ;;  %8110 = vmatprep.subr.bf16.mxu1 %v11406_v17  ;;  %v6614_v60 = vshrl.u32 %v6610_v37, 16 }
0x1a1e   :  { %8662 = vmatpush3.bf16.msra.mxu0 %v11594_v19  ;;  %v6616_v57 = vrot.slane %v6614_v60, 3  ;;  %v7002_v60 = vld [vmem:[#allocation5 + $0x28] sm:$0x3] }
0x1a1f   :  { %8081 = vmatprep.subr.bf16.mxu0 %v11334_v46  ;;  %8111 = vmatpush3.bf16.msra.mxu1 %v11414_v1  ;;  %v5657_v46 = vld [vmem:[#allocation5] sm:$0x60] }
0x1a20   :  { %8112 = vmatprep.subr.bf16.mxu1 %v11421_v0  ;;  %v11633_v1 = vld [vmem:[%s11858_s18 + $0x1c0] sm:$0xff]  }
0x1a21   :  { %8664 = vmatmul.mubr.msk.bf16.vlgmr.msra.gmra.mrb[92].mxu0 %vm88_vm1, %v5656_v23  ;;  %v6139_v0 = vld [vmem:[#allocation5] sm:$0xc0] }
0x1a22   :  { %8082 = vmatpush3.bf16.msra.mxu0 %v11339_v21  ;;  %6188 = vmatprep.mubr.bf16.mxu0 %v6149_v39  ;;  %v5660_v21 = vpack.c.bf16 %v5657_v46, %v5657_v46  ;;  %v11726_v39 = vld [vmem:[%s11858_s18 + $0x260] sm:$0xff]  }
0x1a23   :  { %8083 = vmatprep.subr.bf16.mxu0 %v11344_v5  ;;  %8113 = vmatpush3.bf16.msra.mxu1 %v11427_v13  ;;  %v6386_v46 = vld [vmem:[#allocation5] sm:$0xc] }
0x1a24   :  { %8114 = vmatprep.subr.bf16.mxu1 %v11433_v10  ;;  %v6237_v5 = vshrl.u32 %v5660_v21, 16  ;;  %v6142_v10 = vpack.c.bf16 %v6139_v0, %v6139_v0 }
0x1a26   :  { %8084 = vmatpush3.bf16.msra.mxu0 %v11357_v15  ;;  %v6240_v15 = vshll.u32 %v5660_v21, 16  ;;  %v6766_v21 = vld [vmem:[#allocation5 + $0x10] sm:$0x18] }
0x1a27   :  { %8085 = vmatprep.subr.bf16.mxu0 %v11364_v29  ;;  %8115 = vmatpush3.bf16.msra.mxu1 %v11439_v4  ;;  %v11621_v29 = vpop.f32.mrb[92].mxu1  ;;  %v6605_v4 = vld [vmem:[#allocation5 + $0x8] sm:$0x80] }
0x1a28   :  { %8116 = vmatprep.subr.bf16.mxu1 %v11445_v6  ;;  %v6242_v17 = vrot.slane %v6240_v15, 3  ;;  %v6608_v6 = vld [vmem:[#allocation5 + $0x20] sm:$0x1]  ;;  %v6389_v15 = vpack.c.bf16 %v6386_v46, %v6386_v46 }
0x1a2a   :  { %8086 = vmatpush3.bf16.msra.mxu0 %v11376_v8  ;;  %v8653_v8 = vpop.f32.mrb[93].mxu1 }
0x1a2b   :  { %8087 = vmatprep.subr.bf16.mxu0 %v11388_v2  ;;  %8117 = vmatpush3.bf16.msra.mxu1 %v11451_v30  ;;  %v5933_v2 = vpop.f32.mrb[94].mxu1  ;;  %v11642_v30 = vld [vmem:[%s11858_s18 + $0x1c8] sm:$0xff]   ;;  %v6769_v8 = vpack.c.bf16 %v6766_v21, %v6766_v21 }
0x1a2c   :  { %8118 = vmatprep.subr.bf16.mxu1 %v11467_v20  ;;  %v8654_v41 = vpop.f32.mrb[95].mxu1  ;;  %v6611_v20 = vpack.c.bf16 %v6608_v6, %v6605_v4  ;;  %v11733_v2 = vld [vmem:[%s11858_s18 + $0x268] sm:$0xff]  }
0x1a2d   :  { %v6606_v41 = vld [vmem:[#allocation5 + $0x10] sm:$0x80]  ;;  %v6787_v0 = vshrl.u32 %v6769_v8, 16  ;;  %v6765_v6 = vld [vmem:[#allocation5 + $0x8] sm:$0x18] }
0x1a2e   :  { %8088 = vmatpush3.bf16.msra.mxu0 %v11400_v49  ;;  %v6239_v49 = vrot.slane %v6237_v5, 2 }
0x1a2f   :  { %8089 = vmatprep.subr.bf16.mxu0 %v11482_v34  ;;  %8119 = vmatpush3.bf16.msra.mxu1 %v11477_v35  ;;  %v5659_v35 = vld [vmem:[#allocation5 + $0x10] sm:$0x60]  ;;  %v6148_v34 = vrot.slane %v6142_v10, 3 }
0x1a30   :  { %8120 = vmatprep.subr.bf16.mxu1 %v11496_v40  ;;  %v6243_v13 = vor.u32 %v6242_v17, %v6239_v49  ;;  %v6388_v40 = vld [vmem:[#allocation5 + $0x10] sm:$0xc]  ;;  %v6609_v49 = vld [vmem:[#allocation5 + $0x28] sm:$0x1]  ;;  %v6395_v17 = vrot.slane %v6389_v15, 1 }
0x1a31   :  { %v11743_v10 = vld [vmem:[%s11858_s18 + $0x270] sm:$0xff]   ;;  %v6612_v4 = vpack.c.bf16 %v6609_v49, %v6606_v41 }
0x1a32   :  { %8090 = vmatpush3.bf16.msra.mxu0 %v11487_v36  ;;  %v11653_v36 = vld [vmem:[%s11858_s18 + $0x1d0] sm:$0xff]  }
0x1a33   :  { %8091 = vmatprep.subr.bf16.mxu0 %v11508_v50  ;;  %8121 = vmatpush3.bf16.msra.mxu1 %v11503_v18  ;;  %v5662_v18 = vpack.c.bf16 %v5659_v35, %v5659_v35  ;;  %v6622_v50 = vshrl.u32 %v6611_v20, 16 }
0x1a34   :  { %8122 = vmatprep.subr.bf16.mxu1 %v11518_v54  ;;  %v6391_v54 = vpack.c.bf16 %v6388_v40, %v6388_v40  ;;  %v6768_v40 = vpack.c.bf16 %v6765_v6, %v6765_v6 }
0x1a36   :  { %8092 = vmatpush3.bf16.msra.mxu0 %v11513_v51  ;;  %v6625_v51 = vshll.u32 %v6611_v20, 16  ;;  %v6397_v44 = vrot.slane %v6391_v54, 1  ;;  %v6789_v20 = vrot.slane %v6787_v0, 1  ;;  %v7001_v54 = vld [vmem:[#allocation5 + $0x20] sm:$0x3] }
0x1a37   :  { %8093 = vmatprep.subr.bf16.mxu0 %v11523_v55  ;;  %8123 = vmatpush3.bf16.msra.mxu1 %v11530_v26  ;;  %v11664_v55 = vld [vmem:[%s11858_s18 + $0x1d8] sm:$0xff]   ;;  %v9330_v26 = vld [vmem:[%s11858_s18 + $0x180] sm:$0xff]  }
0x1a38   :  { %8691 = vmatprep.subr.bf16.mxu1 %v11253_v63  ;;  %v6627_v42 = vrot.slane %v6625_v51, 4 }
0x1a3a   :  { %8094 = vmatpush3.bf16.msra.mxu0 %v11538_v3  ;;  %6298 = vmatmul.mubr.bf16.vlgmr.msra.gmra.mrb[104].mxu1 %v6243_v13  ;;  %v6253_v3 = vshrl.u32 %v5662_v18, 16  ;;  %v6790_v13 = vshll.u32 %v6769_v8, 16 }
0x1a3b   :  { %8095 = vmatprep.subr.bf16.mxu0 %v11546_v12  ;;  %8692 = vmatpush3.bf16.msra.mxu1 %v11633_v1  ;;  %v6256_v12 = vshll.u32 %v5662_v18, 16  ;;  %v6630_v18 = vshrl.u32 %v6612_v4, 16 }
0x1a3c   :  { %8699 = vmatprep.mubr.msk.bf16.mxu1 %vm9410_vm0, %v11253_v63  ;;  %8693 = vmatprep.subr.bf16.mxu1 %v11253_v63  ;;  %v6255_v52 = vrot.slane %v6253_v3, 2  ;;  %v6792_v35 = vrot.slane %v6790_v13, 2  ;;  %v6779_v3 = vshrl.u32 %v6768_v40, 16 }
0x1a3d   :  { %v6258_v53 = vrot.slane %v6256_v12, 3  ;;  %v6782_v12 = vshll.u32 %v6768_v40, 16 }
0x1a3e   :  { %8096 = vmatpush3.bf16.msra.mxu0 %v11551_v25  ;;  %v6624_v25 = vrot.slane %v6622_v50, 3  ;;  %v6633_v50 = vshll.u32 %v6612_v4, 16  ;;  %v6793_v51 = vor.u32 %v6792_v35, %v6789_v20 }
0x1a3f   :  { %8679 = vmatprep.subr.bf16.mxu0 %v11253_v63  ;;  %8694 = vmatpush3.bf16.msra.mxu1 %v11642_v30  ;;  %v6259_v47 = vor.u32 %v6258_v53, %v6255_v52  ;;  %v6784_v52 = vrot.slane %v6782_v12, 2 }
0x1a40   :  { %8695 = vmatprep.subr.bf16.mxu1 %v11253_v63  ;;  %v6628_v22 = vor.u32 %v6627_v42, %v6624_v25  ;;  %v9352_v25 = vld [vmem:[%s11858_s18 + $0x228] sm:$0xff]   ;;  %v6632_v42 = vrot.slane %v6630_v18, 3 }
0x1a41   :  { %6189 = vmatmul.mubr.bf16.vlgmr.msra.gmra.mrb[96].mxu0 %v6148_v34  ;;  %v11754_v34 = vld [vmem:[%s11858_s18 + $0x278] sm:$0xff]  }
0x1a42   :  { %8680 = vmatpush3.bf16.msra.mxu0 %v11566_v7  ;;  %8687 = vmatprep.mubr.msk.bf16.mxu0 %vm9410_vm0, %v11253_v63  ;;  %v9335_v7 = vld [vmem:[%s11858_s18 + $0x150] sm:$0xff]  }
0x1a43   :  { %8681 = vmatprep.subr.bf16.mxu0 %v11253_v63  ;;  %8696 = vmatpush3.bf16.msra.mxu1 %v11653_v36 }
0x1a44   :  { %8697 = vmatprep.subr.bf16.mxu1 %v11253_v63 }
0x1a46   :  { %8682 = vmatpush3.bf16.msra.mxu0 %v11574_v16  ;;  %v9339_v16 = vld [vmem:[%s11858_s18 + $0x160] sm:$0xff]  }
0x1a47   :  { %8683 = vmatprep.subr.bf16.mxu0 %v11253_v63  ;;  %8698 = vmatpush3.bf16.msra.mxu1 %v11664_v55 }
0x1a48   :  { %8162 = vmatprep.subr.bf16.mxu1 %v9330_v26 }
0x1a4a   :  { %8684 = vmatpush3.bf16.msra.mxu0 %v11585_v9  ;;  %8700 = vmatmul.mubr.msk.bf16.vlgmr.msra.gmra.mrb[108].mxu1 %vm88_vm1, %v6397_v44  ;;  %v9341_v9 = vld [vmem:[%s11858_s18 + $0x168] sm:$0xff]   ;;  %v6635_v44 = vrot.slane %v6633_v50, 4 }
0x1a4b   :  { %8685 = vmatprep.subr.bf16.mxu0 %v11253_v63  ;;  %8163 = vmatpush3.bf16.msra.mxu1 %v9331_v31 }
0x1a4c   :  { %6674 = vmatprep.mubr.bf16.mxu1 %v6628_v22  ;;  %8164 = vmatprep.subr.bf16.mxu1 %v9332_v24  ;;  %v6636_v53 = vor.u32 %v6635_v44, %v6632_v42  ;;  %v9355_v22 = vld [vmem:[%s11858_s18 + $0x1f0] sm:$0xff]  }
0x1a4e   :  { %8686 = vmatpush3.bf16.msra.mxu0 %v11594_v19  ;;  %v6617_v19 = vshll.u32 %v6610_v37, 16 }
0x1a4f   :  { %8135 = vmatprep.subr.bf16.mxu0 %v9330_v26  ;;  %8165 = vmatpush3.bf16.msra.mxu1 %v9333_v43  ;;  %v9351_v26 = vld [vmem:[%s11858_s18 + $0x1e0] sm:$0xff]  }
0x1a50   :  { %8166 = vmatprep.subr.bf16.mxu1 %v9334_v33  ;;  %v6619_v23 = vrot.slane %v6617_v19, 4  ;;  %v7005_v19 = vpack.c.bf16 %v7002_v60, %v7002_v60 }
0x1a51   :  { %8688 = vmatmul.mubr.msk.bf16.vlgmr.msra.gmra.mrb[100].mxu0 %vm88_vm1, %v6259_v47  ;;  %v9359_v47 = vld [vmem:[%s11858_s18 + $0x200] sm:$0xff]  }
0x1a52   :  { %8136 = vmatpush3.bf16.msra.mxu0 %v9331_v31  ;;  %6555 = vmatprep.mubr.bf16.mxu0 %v6396_v48  ;;  %v6620_v5 = vor.u32 %v6619_v23, %v6616_v57  ;;  %v9353_v31 = vld [vmem:[%s11858_s18 + $0x1e8] sm:$0xff]  }
0x1a53   :  { %8137 = vmatprep.subr.bf16.mxu0 %v9332_v24  ;;  %8167 = vmatpush3.bf16.msra.mxu1 %v9335_v7  ;;  %v6781_v24 = vrot.slane %v6779_v3, 1  ;;  %v9361_v48 = vld [vmem:[%s11858_s18 + $0x208] sm:$0xff]  }
0x1a54   :  { %8168 = vmatprep.subr.bf16.mxu1 %v9336_v58 }
0x1a56   :  { %8138 = vmatpush3.bf16.msra.mxu0 %v9333_v43  ;;  %v9356_v43 = vld [vmem:[%s11858_s18 + $0x238] sm:$0xff]  }
0x1a57   :  { %8139 = vmatprep.subr.bf16.mxu0 %v9334_v33  ;;  %8169 = vmatpush3.bf16.msra.mxu1 %v9337_v11  ;;  %v9360_v33 = vld [vmem:[%s11858_s18 + $0x248] sm:$0xff]  }
0x1a58   :  { %8170 = vmatprep.subr.bf16.mxu1 %v9338_v59 }
0x1a5a   :  { %8140 = vmatpush3.bf16.msra.mxu0 %v9335_v7  ;;  %v9362_v7 = vld [vmem:[%s11858_s18 + $0x250] sm:$0xff]  }
0x1a5b   :  { %8141 = vmatprep.subr.bf16.mxu0 %v9336_v58  ;;  %8171 = vmatpush3.bf16.msra.mxu1 %v9339_v16  ;;  %v9363_v58 = vld [vmem:[%s11858_s18 + $0x210] sm:$0xff]  }
0x1a5c   :  { %8172 = vmatprep.subr.bf16.mxu1 %v9340_v27 }
0x1a5e   :  { %8142 = vmatpush3.bf16.msra.mxu0 %v9337_v11  ;;  %v6764_v11 = vld [vmem:[#allocation5] sm:$0x18] }
0x1a5f   :  { %8143 = vmatprep.subr.bf16.mxu0 %v9338_v59  ;;  %8173 = vmatpush3.bf16.msra.mxu1 %v9341_v9  ;;  %v9364_v59 = vld [vmem:[%s11858_s18 + $0x258] sm:$0xff]  }
0x1a60   :  { %8174 = vmatprep.subr.bf16.mxu1 %v9342_v45 }
0x1a62   :  { %8144 = vmatpush3.bf16.msra.mxu0 %v9339_v16  ;;  %v6767_v16 = vpack.c.bf16 %v6764_v11, %v6764_v11 }
0x1a63   :  { %8145 = vmatprep.subr.bf16.mxu0 %v9340_v27  ;;  %8175 = vmatpush3.bf16.msra.mxu1 %v9343_v14  ;;  %v9365_v27 = vld [vmem:[%s11858_s18 + $0x218] sm:$0xff]  }
0x1a64   :  { %8176 = vmatprep.subr.bf16.mxu1 %v9344_v38  ;;  %v6771_v32 = vshrl.u32 %v6767_v16, 16 }
0x1a66   :  { %8146 = vmatpush3.bf16.msra.mxu0 %v9341_v9  ;;  %v6774_v9 = vshll.u32 %v6767_v16, 16  ;;  %v6773_v37 = vrot.slane %v6771_v32, 1 }
0x1a67   :  { %8147 = vmatprep.subr.bf16.mxu0 %v9342_v45  ;;  %8177 = vmatpush3.bf16.msra.mxu1 %v9345_v62  ;;  %v7003_v45 = vpack.c.bf16 %v7000_v28, %v7000_v28 }
0x1a68   :  { %8715 = vmatprep.subr.bf16.mxu1 %v11253_v63 }
0x1a6a   :  { %8148 = vmatpush3.bf16.msra.mxu0 %v9343_v14  ;;  %6675 = vmatmul.mubr.bf16.vlgmr.msra.gmra.mrb[112].mxu1 %v6620_v5  ;;  %v6776_v14 = vrot.slane %v6774_v9, 2 }
0x1a6b   :  { %8149 = vmatprep.subr.bf16.mxu0 %v9344_v38  ;;  %8716 = vmatpush3.bf16.msra.mxu1 %v11726_v39 }
0x1a6c   :  { %8723 = vmatprep.mubr.msk.bf16.mxu1 %vm9410_vm0, %v11253_v63  ;;  %8717 = vmatprep.subr.bf16.mxu1 %v11253_v63  ;;  %v6777_v38 = vor.u32 %v6776_v14, %v6773_v37 }
0x1a6e   :  { %8150 = vmatpush3.bf16.msra.mxu0 %v9345_v62 }
0x1a6f   :  { %8703 = vmatprep.subr.bf16.mxu0 %v11253_v63  ;;  %8718 = vmatpush3.bf16.msra.mxu1 %v11733_v2 }
0x1a70   :  { %8719 = vmatprep.subr.bf16.mxu1 %v11253_v63 }
0x1a71   :  { %6556 = vmatmul.mubr.bf16.vlgmr.msra.gmra.mrb[104].mxu0 %v6395_v17 }
0x1a72   :  { %8704 = vmatpush3.bf16.msra.mxu0 %v11633_v1  ;;  %8711 = vmatprep.mubr.msk.bf16.mxu0 %vm9410_vm0, %v11253_v63  ;;  %v9350_v1 = vld [vmem:[%s11858_s18 + $0x220] sm:$0xff]  }
0x1a73   :  { %8705 = vmatprep.subr.bf16.mxu0 %v11253_v63  ;;  %8720 = vmatpush3.bf16.msra.mxu1 %v11743_v10 }
0x1a74   :  { %8721 = vmatprep.subr.bf16.mxu1 %v11253_v63 }
0x1a76   :  { %8706 = vmatpush3.bf16.msra.mxu0 %v11642_v30  ;;  %v7004_v30 = vpack.c.bf16 %v7001_v54, %v7001_v54 }
0x1a77   :  { %8707 = vmatprep.subr.bf16.mxu0 %v11253_v63  ;;  %8722 = vmatpush3.bf16.msra.mxu1 %v11754_v34 }
0x1a78   :  { %8216 = vmatprep.subr.bf16.mxu1 %v9350_v1 }
0x1a7a   :  { %8708 = vmatpush3.bf16.msra.mxu0 %v11653_v36  ;;  %8724 = vmatmul.mubr.msk.bf16.vlgmr.msra.gmra.mrb[116].mxu1 %vm88_vm1, %v6793_v51  ;;  %v6785_v36 = vor.u32 %v6784_v52, %v6781_v24 }
0x1a7b   :  { %8709 = vmatprep.subr.bf16.mxu0 %v11253_v63  ;;  %8217 = vmatpush3.bf16.msra.mxu1 %v9351_v26 }
0x1a7c   :  { %7041 = vmatprep.mubr.bf16.mxu1 %v7004_v30  ;;  %8218 = vmatprep.subr.bf16.mxu1 %v9352_v25 }
0x1a7e   :  { %8710 = vmatpush3.bf16.msra.mxu0 %v11664_v55  ;;  %v9357_v55 = vld [vmem:[%s11858_s18 + $0x1f8] sm:$0xff]  }
0x1a7f   :  { %8189 = vmatprep.subr.bf16.mxu0 %v9350_v1  ;;  %8219 = vmatpush3.bf16.msra.mxu1 %v9353_v31 }
0x1a80   :  { %8220 = vmatprep.subr.bf16.mxu1 %v9354_v56 }
0x1a81   :  { %8712 = vmatmul.mubr.msk.bf16.vlgmr.msra.gmra.mrb[108].mxu0 %vm88_vm1, %v6636_v53 }
0x1a82   :  { %8190 = vmatpush3.bf16.msra.mxu0 %v9351_v26  ;;  %6951 = vmatprep.mubr.bf16.mxu0 %v6785_v36 }
0x1a83   :  { %8191 = vmatprep.subr.bf16.mxu0 %v9352_v25  ;;  %8221 = vmatpush3.bf16.msra.mxu1 %v9355_v22 }
0x1a84   :  { %8222 = vmatprep.subr.bf16.mxu1 %v9356_v43 }
0x1a86   :  { %8192 = vmatpush3.bf16.msra.mxu0 %v9353_v31 }
0x1a87   :  { %8193 = vmatprep.subr.bf16.mxu0 %v9354_v56  ;;  %8223 = vmatpush3.bf16.msra.mxu1 %v9357_v55 }
0x1a88   :  { %8224 = vmatprep.subr.bf16.mxu1 %v9358_v61 }
0x1a8a   :  { %8194 = vmatpush3.bf16.msra.mxu0 %v9355_v22 }
0x1a8b   :  { %8195 = vmatprep.subr.bf16.mxu0 %v9356_v43  ;;  %8225 = vmatpush3.bf16.msra.mxu1 %v9359_v47 }
0x1a8c   :  { %8226 = vmatprep.subr.bf16.mxu1 %v9360_v33 }
0x1a8e   :  { %8196 = vmatpush3.bf16.msra.mxu0 %v9357_v55 }
0x1a8f   :  { %8197 = vmatprep.subr.bf16.mxu0 %v9358_v61  ;;  %8227 = vmatpush3.bf16.msra.mxu1 %v9361_v48 }
0x1a90   :  { %8228 = vmatprep.subr.bf16.mxu1 %v9362_v7 }
0x1a92   :  { %8198 = vmatpush3.bf16.msra.mxu0 %v9359_v47 }
0x1a93   :  { %8199 = vmatprep.subr.bf16.mxu0 %v9360_v33  ;;  %8229 = vmatpush3.bf16.msra.mxu1 %v9363_v58 }
0x1a94   :  { %8230 = vmatprep.subr.bf16.mxu1 %v9364_v59 }
0x1a96   :  { %8200 = vmatpush3.bf16.msra.mxu0 %v9361_v48 }
0x1a97   :  { %8201 = vmatprep.subr.bf16.mxu0 %v9362_v7  ;;  %8231 = vmatpush3.bf16.msra.mxu1 %v9365_v27 }
0x1a9a   :  { %8202 = vmatpush3.bf16.msra.mxu0 %v9363_v58  ;;  %7042 = vmatmul.mubr.bf16.vlgmr.msra.gmra.mrb[120].mxu1 %v7003_v45 }
0x1a9b   :  { %8203 = vmatprep.subr.bf16.mxu0 %v9364_v59 }
0x1a9e   :  { %8204 = vmatpush3.bf16.msra.mxu0 %v9365_v27 }
0x1a9f   :  { %8727 = vmatprep.subr.bf16.mxu0 %v11253_v63 }
0x1aa1   :  { %6952 = vmatmul.mubr.bf16.vlgmr.msra.gmra.mrb[112].mxu0 %v6777_v38 }
0x1aa2   :  { %8728 = vmatpush3.bf16.msra.mxu0 %v11726_v39  ;;  %8735 = vmatprep.mubr.msk.bf16.mxu0 %vm9410_vm0, %v11253_v63  ;;  %vm7111_vm0 = vcmask 9216  }
0x1aa3   :  { %8729 = vmatprep.subr.bf16.mxu0 %v11253_v63 }
0x1aa6   :  { %8730 = vmatpush3.bf16.msra.mxu0 %v11733_v2 }
0x1aa7   :  { %8731 = vmatprep.subr.bf16.mxu0 %v11253_v63 }
0x1aaa   :  { %8732 = vmatpush3.bf16.msra.mxu0 %v11743_v10 }
0x1aab   :  { %8733 = vmatprep.subr.bf16.mxu0 %v11253_v63 }
0x1aae   :  { %8734 = vmatpush3.bf16.msra.mxu0 %v11754_v34 }
0x1ab1   :  { %8736 = vmatmul.mubr.msk.bf16.vlgmr.msra.gmra.mrb[116].mxu0 %vm88_vm1, %v7005_v19 }
0x1add   :  { %v8070_v62 = vpop.f32.mrb[96].mxu1 }
0x1ade   :  { %v8071_v57 = vpop.f32.mrb[97].mxu1 }
0x1adf   :  { %v8072_v23 = vadd.f32 %v8071_v57, %v8070_v62  ;;  %v8073_v39 = vpop.f32.mrb[98].mxu1 }
0x1ae0   :  { %v8074_v46 = vpop.f32.mrb[99].mxu1 }
0x1ae4   :  { %v8043_v21 = vpop.f32.mrb[88].mxu0 }
0x1ae5   :  { %v8044_v5 = vpop.f32.mrb[89].mxu0 }
0x1ae6   :  { %v8045_v15 = vadd.f32 %v8044_v5, %v8043_v21  ;;  %v8046_v8 = vpop.f32.mrb[90].mxu0 }
0x1ae7   :  { %v8047_v2 = vpop.f32.mrb[91].mxu0 }
0x1ae8   :  { %v5931_v41 = vadd.f32 %v8045_v15, %v11621_v29 }
0x1aea   :  { %v6094_v49 = vadd.f32 %v8072_v23, %v5931_v41 }
0x1aed   :  { %v6230_v17 = vpop.f32.mrb[100].mxu1 }
0x1aee   :  { %v8677_v63 = vpop.f32.mrb[101].mxu1 }
0x1aef   :  { %v6233_v0 = vpop.f32.mrb[102].mxu1 }
0x1af0   :  { %v8678_v13 = vpop.f32.mrb[103].mxu1 }
0x1af4   :  { %v6133_v10 = vpop.f32.mrb[92].mxu0 }
0x1af5   :  { %v6134_v4 = vadd.f32 %v6133_v10, %v6094_v49  ;;  %v8665_v6 = vpop.f32.mrb[93].mxu0  ;;  %v7846_v49 = vld [vmem:[%s11859_s19] ss:$0 sm:$0xff]  ;;  %s9417_s19 = smov [#allocation6]  }
0x1af6   :  { %v6136_v20 = vpop.f32.mrb[94].mxu0  ;;  %s7120_s16 = sshll.u32 %s9417_s19, 4  ;;  %s7121_s16 = int_to_ptr.vmem [resolvable:$true] %s7120_s16 }
0x1af7   :  { %v8666_v35 = vpop.f32.mrb[95].mxu0  ;;  %s9385_s11 = scalar_lea.vmem %s7121_s16, 64  ;;  %p9390_p1 = scmp.lt.s32.totalorder %s7121_s16, %s7121_s16 }
0x1af8   :  { %p9386_p0 = scmp.ne.s32.totalorder %s7121_s16, %s9385_s11  ;;  %p9391_p2 = scmp.lt.s32.totalorder %s9385_s11, %s9385_s11 }
0x1afa   :  { %p9392_p3 = por %p9391_p2, %p9390_p1 }
0x1afc   :  { %p9393_p4 = pnand %p9392_p3, %p9386_p0 }
0x1b0d   :  { %v8124_v34 = vpop.f32.mrb[104].mxu1 }
0x1b0e   :  { %v8125_v40 = vpop.f32.mrb[105].mxu1 }
0x1b0f   :  { %v8126_v1 = vadd.f32 %v8125_v40, %v8124_v34  ;;  %v8127_v18 = vpop.f32.mrb[106].mxu1 }
0x1b10   :  { %v8128_v50 = vpop.f32.mrb[107].mxu1 }
0x1b14   :  { %v8097_v51 = vpop.f32.mrb[96].mxu0 }
0x1b15   :  { %v8098_v54 = vpop.f32.mrb[97].mxu0 }
0x1b16   :  { %v8099_v26 = vadd.f32 %v8098_v54, %v8097_v51  ;;  %v8100_v3 = vpop.f32.mrb[98].mxu0 }
0x1b17   :  { %v8101_v29 = vpop.f32.mrb[99].mxu0 }
0x1b18   :  { %v6231_v12 = vadd.f32 %v8099_v26, %v6230_v17 }
0x1b1a   :  { %v6300_v25 = vadd.f32 %v8126_v1, %v6231_v12 }
0x1b1d   :  { %v6597_v42 = vpop.f32.mrb[108].mxu1 }
0x1b1e   :  { %v8701_v44 = vpop.f32.mrb[109].mxu1 }
0x1b1f   :  { %v6600_v30 = vpop.f32.mrb[110].mxu1 }
0x1b20   :  { %v8702_v31 = vpop.f32.mrb[111].mxu1 }
0x1b24   :  { %v6339_v24 = vpop.f32.mrb[100].mxu0 }
0x1b25   :  { %v6340_v52 = vadd.f32 %v6339_v24, %v6300_v25  ;;  %v8689_v53 = vpop.f32.mrb[101].mxu0 }
0x1b26   :  { %v6342_v56 = vpop.f32.mrb[102].mxu0 }
0x1b27   :  { %v8690_v36 = vpop.f32.mrb[103].mxu0 }
0x1b3d   :  { %v8178_v22 = vpop.f32.mrb[112].mxu1 }
0x1b3e   :  { %v8179_v43 = vpop.f32.mrb[113].mxu1 }
0x1b3f   :  { %v8180_v55 = vadd.f32 %v8179_v43, %v8178_v22  ;;  %v8181_v61 = vpop.f32.mrb[114].mxu1 }
0x1b40   :  { %v8182_v47 = vpop.f32.mrb[115].mxu1 }
0x1b44   :  { %v8151_v33 = vpop.f32.mrb[104].mxu0 }
0x1b45   :  { %v8152_v48 = vpop.f32.mrb[105].mxu0 }
0x1b46   :  { %v8153_v7 = vadd.f32 %v8152_v48, %v8151_v33  ;;  %v8154_v58 = vpop.f32.mrb[106].mxu0 }
0x1b47   :  { %v8155_v11 = vpop.f32.mrb[107].mxu0 }
0x1b48   :  { %v6598_v59 = vadd.f32 %v8153_v7, %v6597_v42 }
0x1b4a   :  { %v6603_v16 = vadd.f32 %v6598_v59, %v6134_v4 }
0x1b4d   :  { %v6993_v27 = vpop.f32.mrb[116].mxu1 }
0x1b4e   :  { %v8725_v28 = vpop.f32.mrb[117].mxu1 }
0x1b4f   :  { %v6996_v32 = vpop.f32.mrb[118].mxu1 }
0x1b50   :  { %v8726_v9 = vpop.f32.mrb[119].mxu1 }
0x1b54   :  { %v6716_v45 = vpop.f32.mrb[108].mxu0 }
0x1b55   :  { %v6717_v37 = vadd.f32 %v8180_v55, %v6716_v45  ;;  %v8713_v14 = vpop.f32.mrb[109].mxu0 }
0x1b56   :  { %v6719_v38 = vpop.f32.mrb[110].mxu0 }
0x1b57   :  { %v6722_v60 = vadd.f32 %v6717_v37, %v6340_v52  ;;  %v8714_v19 = vpop.f32.mrb[111].mxu0 }
0x1b6d   :  { %v8232_v62 = vpop.f32.mrb[120].mxu1 }
0x1b6e   :  { %v8233_v57 = vpop.f32.mrb[121].mxu1 }
0x1b6f   :  { %v8234_v23 = vadd.f32 %v8233_v57, %v8232_v62  ;;  %v8235_v39 = vpop.f32.mrb[122].mxu1 }
0x1b70   :  { %v8236_v46 = vpop.f32.mrb[123].mxu1 }
0x1b74   :  { %v8205_v21 = vpop.f32.mrb[112].mxu0 }
0x1b75   :  { %v8206_v5 = vpop.f32.mrb[113].mxu0 }
0x1b76   :  { %v8207_v15 = vadd.f32 %v8206_v5, %v8205_v21  ;;  %v8208_v8 = vpop.f32.mrb[114].mxu0 }
0x1b77   :  { %v8209_v2 = vpop.f32.mrb[115].mxu0 }
0x1b78   :  { %v6994_v41 = vadd.f32 %v8207_v15, %v6993_v27 }
0x1b7a   :  { %v6999_v17 = vadd.f32 %v6994_v41, %v6603_v16 }
0x1b7c   :  { %v7097_v63 = vadd.f32 %v7846_v49, %v6999_v17 }
0x1b7e   :  { %v7098_v0 = vsub.f32 0.0, %v7097_v63 }
0x1b80   :  { %v7099_v13 = vmul.f32 1.442695, %v7098_v0 }
0x1b82   :  { %9372 = vpow2.f32 %v7099_v13 }
0x1b84   :  { %v7083_v10 = vpop.f32.mrb[116].mxu0 }
0x1b85   :  { %v7084_v4 = vadd.f32 %v8234_v23, %v7083_v10  ;;  %v8737_v6 = vpop.f32.mrb[117].mxu0 }
0x1b86   :  { %v7086_v20 = vpop.f32.mrb[118].mxu0 }
0x1b87   :  { %v7089_v35 = vadd.f32 %v7084_v4, %v6722_v60  ;;  %v8738_v34 = vpop.f32.mrb[119].mxu0 }
0x1b89   :  { %v7104_v40 = vadd.f32 %v7846_v49, %v7089_v35 }
0x1b8b   :  { %v7105_v1 = vsub.f32 0.0, %v7104_v40 }
0x1b8c   :  { %v9373_v18 = vpop.eup %9372 }
0x1b8d   :  { %v7101_v50 = vadd.f32 1.0, %v9373_v18  ;;  %v7106_v51 = vmul.f32 1.442695, %v7105_v1 }
0x1b8f   :  { %9374 = vrcp.f32 %v7101_v50 }
0x1b90   :  { %9376 = vpow2.f32 %v7106_v51 }
0x1b99   :  { %v9375_v54 = vpop.eup %9374 }
0x1b9a   :  { %v9377_v26 = vpop.eup %9376  ;;  %7112 = vst.msk [vmem:[#allocation6] sm:$0x3] %vm7111_vm0, %v9375_v54 }
0x1b9b   :  { %v7108_v3 = vadd.f32 1.0, %v9377_v26 }
0x1b9d   :  { %9378 = vrcp.f32 %v7108_v3 }
0x1ba7   :  { %v9379_v29 = vpop.eup %9378 }
0x1ba8   :  { %7113 = vst.msk [vmem:[#allocation6 + $0x2] sm:$0x3] %vm7111_vm0, %v9379_v29 }
0x1ba9   :  { %9396 = shalt.err (!%p9393_p4)
}
0x1baa   :  { %s9397_s9 = scalar_lea.hbm %s11860_s20, 64 }
0x1bab   :  { %p9398_p5 = scmp.ne.s32.totalorder %s11860_s20, %s9397_s9  ;;  %p9401_p6 = scmp.lt.u32.totalorder %s9397_s9, %s11860_s20 }
0x1bad   :  { %p9403_p7 = pnand %p9401_p6, %p9398_p5 }
0x1baf   :  { %9406 = shalt.err (!%p9403_p7)
}
0x1bb0   :  { %7123 = dma.vmem_to_hbm [thread:$0]  %s7121_s16, 64, %s11860_s20, [#allocation7]  }
0x1bb1   :  { %9407 = dma.done.wait [#allocation7], 64  }
0x1bb2   :  { %9408 = vsyncadd [#allocation7], 4294967232 }
0x1bb3   :  { %7127 = vsyncpa [#allocation7], 1 }

</bundles_post_ra>
